<compile_context>
chip_gen: v5e
topology: v5e:2x2
jax: 0.10.0
libtpu: 0.0.40
codegen_flags: <defaults>
</compile_context>

<pallas_src>
import functools

import jax
import jax.numpy as jnp
from jax import lax
from jax.experimental import pallas as pl
from jax.experimental.pallas import tpu as pltpu


# ----------------------------- in-kernel helpers ------------------------------

def _silu(v, approx):
    """x * sigmoid(x) with the divide kept on the EUP (approx reciprocal)."""
    return v * pl.reciprocal(1.0 + jnp.exp(-v), approx=approx)


def _sliding_max5(x, axis):
    """Window-5, stride-1, same-size sliding max along `axis`, -inf edges.

    Log-tree (width 1 -> 2 -> 4 -> 5): 3 maxes and 3 offset slices on a -inf
    halo'd copy, instead of 4 + 4 for the naive scan."""
    n = x.shape[axis]
    fshape = list(x.shape)
    fshape[axis] = 2
    fill = jnp.full(tuple(fshape), -jnp.inf, x.dtype)
    xp = jnp.concatenate([fill, x, fill], axis=axis)            # length n + 4
    sl = lambda v, s, e: lax.slice_in_dim(v, s, e, axis=axis)
    m2 = jnp.maximum(sl(xp, 0, n + 3), sl(xp, 1, n + 4))        # width-2 windows
    m4 = jnp.maximum(sl(m2, 0, n + 1), sl(m2, 2, n + 3))        # width-4 windows
    return jnp.maximum(sl(m4, 0, n), sl(xp, 4, n + 4))          # width-5 windows


def _maxpool5(x_hwc):
    """5x5 max pool, stride 1, pad 2 (-inf), on an (H, W, C) tile (separable)."""
    return _sliding_max5(_sliding_max5(x_hwc, 0), 1)


# -------------------------------- fused kernel --------------------------------

def _spp_kernel(x_ref, w1_ref, b1_ref, w2_ref, b2_ref, o_ref, z_ref, *,
                approx_silu):
    """Fused SPP for one batch element (NHWC tile).

    cv1 (1x1+BN+SiLU) -> maxpools k=5/9/13 -> cv2 (1x1+BN+SiLU).  The channel
    concat is realized by writing the four branches into lane quadrants of the
    (H*W, 4*c_) VMEM scratch z_ref and doing ONE K=4*c_ matmul against the
    un-split cv2 weight."""
    _, H, W, c1 = x_ref.shape
    c_ = w1_ref.shape[1]
    c2 = w2_ref.shape[1]
    cdt = z_ref.dtype                                            # compute dtype

    # cv1: 1x1 conv as (H*W, c1) @ (c1, c_); f32 accumulation + folded-BN bias.
    # TODO(synk): at real SPP widths (W=13/20) pad W to a multiple of 8 so this
    #             reshape and the pooling view are layout no-ops.
    x = x_ref[0].reshape(H * W, c1)
    a = jnp.dot(x, w1_ref[...], preferred_element_type=jnp.float32) + b1_ref[...]
    a = _silu(a, approx_silu).astype(cdt)                        # (H*W, c_)

    # Branch 0 (identity) + chained 5x5 pools (== 9x9, 13x13) into quadrants.
    z_ref[:, 0:c_] = a
    p = a.reshape(H, W, c_)
    for br in range(1, 4):
        p = _maxpool5(p)
        z_ref[:, br * c_:(br + 1) * c_] = p.reshape(H * W, c_)

    # cv2: ONE matmul over the concatenated K dimension (accumulation on MXU).
    y = jnp.dot(z_ref[...], w2_ref[...],
                preferred_element_type=jnp.float32) + b2_ref[...]
    y = _silu(y, approx_silu)
    o_ref[0] = y.reshape(H, W, c2).astype(o_ref.dtype)


# ---------------------------------- wrapper -----------------------------------

def _vmem_limit_bytes(H, W, c1, c_, c2, compute_dtype):
    """Shape-derived scoped-VMEM budget (clamped; 32 MiB default at toy sizes)."""
    cb = jnp.dtype(compute_dtype).itemsize
    hw = H * W
    est = (2 * hw * c1 * cb                      # double-buffered input block
           + 2 * hw * c2 * 4                     # double-buffered output block
           + 2 * (c1 * c_ + 4 * c_ * c2) * cb    # weight blocks
           + hw * 4 * c_ * cb                    # concat scratch
           + 8 * hw * c_ * 4 + 2 * hw * c2 * 4)  # pooling / f32 temporaries
    return int(min(max(2 * est, 32 * 1024 * 1024), 100 * 1024 * 1024))


def spp_forward(x_nchw, p, *, compute_dtype=jnp.bfloat16, approx_silu=True):
    """Public SPP forward: takes/returns NCHW f32, computes NHWC inside."""
    N, c1, H, W = x_nchw.shape
    c_ = p["w_cv1"].shape[1]
    c2 = p["w_cv2"].shape[1]
    out_dtype = x_nchw.dtype

    # TODO(synk): keep the surrounding model NHWC to drop this transpose pair.
    x = jnp.transpose(x_nchw, (0, 2, 3, 1)).astype(compute_dtype)   # NHWC
    w1 = p["w_cv1"].astype(compute_dtype)
    w2 = p["w_cv2"].astype(compute_dtype)                           # (4*c_, c2)
    b1 = p["b_cv1"].reshape(1, c_).astype(jnp.float32)
    b2 = p["b_cv2"].reshape(1, c2).astype(jnp.float32)

    itemsize = jnp.dtype(compute_dtype).itemsize
    flops = 2 * N * H * W * (c1 * c_ + 4 * c_ * c2)
    transcendentals = N * H * W * (c_ + c2)
    bytes_accessed = (N * H * W * c1 * itemsize
                      + (c1 * c_ + 4 * c_ * c2) * itemsize
                      + N * H * W * c2 * jnp.dtype(out_dtype).itemsize)

    kernel = functools.partial(_spp_kernel, approx_silu=approx_silu)

    out = pl.pallas_call(
        kernel,
        grid=(N,),
        in_specs=[
            pl.BlockSpec((1, H, W, c1), lambda n: (n, 0, 0, 0)),
            pl.BlockSpec((c1, c_), lambda n: (0, 0)),
            pl.BlockSpec((1, c_), lambda n: (0, 0)),
            pl.BlockSpec((4 * c_, c2), lambda n: (0, 0)),
            pl.BlockSpec((1, c2), lambda n: (0, 0)),
        ],
        out_specs=pl.BlockSpec((1, H, W, c2), lambda n: (n, 0, 0, 0)),
        out_shape=jax.ShapeDtypeStruct((N, H, W, c2), out_dtype),
        scratch_shapes=[pltpu.VMEM((H * W, 4 * c_), compute_dtype)],
        compiler_params=pltpu.CompilerParams(
            dimension_semantics=("parallel",),
            vmem_limit_bytes=_vmem_limit_bytes(H, W, c1, c_, c2, compute_dtype)),
        cost_estimate=pl.CostEstimate(
            flops=flops,
            transcendentals=transcendentals,
            bytes_accessed=bytes_accessed),
    )(x, w1, b1, w2, b2)

    return jnp.transpose(out, (0, 3, 1, 2))                         # back to NCHW


# ------------------------------- Param helpers --------------------------------

def fold_bn(w, gamma, beta, mean, var, eps):
    """Fold eval-mode BatchNorm into a bias-free conv whose last axis is Cout."""
    scale = gamma / jnp.sqrt(var + eps)
    return w * scale, beta - mean * scale


def init_params(key, c1, c2):
    c_ = c1 // 2
    ks = iter(jax.random.split(key, 16))

    def normal(shape, s=0.2):
        return s * jax.random.normal(next(ks), shape, jnp.float32)

    def bn(c):
        gamma = 1.0 + 0.1 * jax.random.normal(next(ks), (c,), jnp.float32)
        beta = 0.1 * jax.random.normal(next(ks), (c,), jnp.float32)
        mean = 0.1 * jax.random.normal(next(ks), (c,), jnp.float32)
        var = 1.0 + 0.1 * jnp.abs(jax.random.normal(next(ks), (c,), jnp.float32))
        return gamma, beta, mean, var

    p = {}
    # cv1: Conv(c1, c_, 1, 1) = 1x1 conv + BN + SiLU, BN folded.
    p["w_cv1"], p["b_cv1"] = fold_bn(normal((c1, c_)), *bn(c_), eps=1e-3)
    # cv2: Conv(4*c_, c2, 1, 1) = 1x1 conv + BN + SiLU, BN folded.
    p["w_cv2"], p["b_cv2"] = fold_bn(normal((4 * c_, c2)), *bn(c2), eps=1e-3)
    return p, c_


# ----------------------------- Pure-JAX reference ------------------------------

def spp_reference(x_nchw, p):
    silu = lambda v: v * jax.nn.sigmoid(v)
    hp = lax.Precision.HIGHEST
    x = jnp.transpose(x_nchw, (0, 2, 3, 1))                         # NHWC

    a = silu(jnp.einsum("nhwc,co->nhwo", x, p["w_cv1"], precision=hp)
             + p["b_cv1"])

    def maxpool(v, k):
        r = k // 2
        return lax.reduce_window(v, -jnp.inf, lax.max,
                                 (1, k, k, 1), (1, 1, 1, 1),
                                 [(0, 0), (r, r), (r, r), (0, 0)])

    z = jnp.concatenate([a] + [maxpool(a, k) for k in (5, 9, 13)], axis=-1)
    y = silu(jnp.einsum("nhwc,co->nhwo", z, p["w_cv2"], precision=hp)
             + p["b_cv2"])
    return jnp.transpose(y, (0, 3, 1, 2))


# ------------------------------------ main -------------------------------------

if __name__ == "__main__":
    key = jax.random.PRNGKey(0)
    k_x, k_p = jax.random.split(key)

    N, c1, c2, H, W = 2, 4, 4, 16, 16
    x = jax.random.normal(k_x, (N, c1, H, W), jnp.float32)
    params, c_ = init_params(k_p, c1, c2)

    ref = jax.block_until_ready(spp_reference(x, params))

    # Strict structural check: f32 compute, exact reciprocal in SiLU.
    out_f32 = jax.block_until_ready(
        spp_forward(x, params, compute_dtype=jnp.float32, approx_silu=False))
    assert out_f32.shape == (N, c2, H, W), out_f32.shape
    err_f32 = float(jnp.max(jnp.abs(out_f32 - ref)))
    assert err_f32 < 5e-4, err_f32

    # Production path: bf16 MXU inputs, f32 accumulation, EUP approx reciprocal.
    out_bf16 = jax.block_until_ready(spp_forward(x, params))
    assert out_bf16.shape == (N, c2, H, W), out_bf16.shape
    err_bf16 = float(jnp.max(jnp.abs(out_bf16 - ref)))
    tol_bf16 = 2e-2 + 2e-2 * float(jnp.max(jnp.abs(ref)))
    assert err_bf16 < tol_bf16, (err_bf16, tol_bf16)

    print("KERNEL_OK")
</pallas_src>

<mosaic_0001>
module attributes {stable_mosaic.version = 11 : i64} {
  func.func @_spp_kernel(%arg0: i32, %arg1: memref<1x16x16x4xf32, #tpu.memory_space<vmem>>, %arg2: memref<4x2xf32, #tpu.memory_space<vmem>>, %arg3: memref<1x2xf32, #tpu.memory_space<vmem>>, %arg4: memref<8x4xf32, #tpu.memory_space<vmem>>, %arg5: memref<1x4xf32, #tpu.memory_space<vmem>>, %arg6: memref<1x16x16x4xf32, #tpu.memory_space<vmem>>, %arg7: memref<256x8xf32, #tpu.memory_space<vmem>>) attributes {dimension_semantics = [#tpu.dimension_semantics<parallel>], iteration_bounds = array<i64: 2>, scalar_prefetch = 0 : i64, scratch_operands = 1 : i64, tpu.core_type = #tpu.core_type<tc>, window_params = [{transform_indices = @transform_0, window_bounds = array<i64: 1, 16, 16, 4>}, {pipeline_mode = #tpu.pipeline_mode<synchronous>, transform_indices = @transform_1, window_bounds = array<i64: 4, 2>}, {pipeline_mode = #tpu.pipeline_mode<synchronous>, transform_indices = @transform_2, window_bounds = array<i64: 1, 2>}, {pipeline_mode = #tpu.pipeline_mode<synchronous>, transform_indices = @transform_3, window_bounds = array<i64: 8, 4>}, {pipeline_mode = #tpu.pipeline_mode<synchronous>, transform_indices = @transform_4, window_bounds = array<i64: 1, 4>}, {transform_indices = @transform_5, window_bounds = array<i64: 1, 16, 16, 4>}]} {
    %c0 = arith.constant 0 : index
    %c0_0 = arith.constant 0 : index
    %c0_1 = arith.constant 0 : index
    %c0_2 = arith.constant 0 : index
    %0 = vector.load %arg1[%c0, %c0_0, %c0_1, %c0_2] : memref<1x16x16x4xf32, #tpu.memory_space<vmem>>, vector<1x16x16x4xf32>
    %1 = vector.shape_cast %0 : vector<1x16x16x4xf32> to vector<16x16x4xf32>
    %2 = vector.shape_cast %1 : vector<16x16x4xf32> to vector<256x4xf32>
    %c0_3 = arith.constant 0 : index
    %c0_4 = arith.constant 0 : index
    %3 = vector.load %arg2[%c0_3, %c0_4] : memref<4x2xf32, #tpu.memory_space<vmem>>, vector<4x2xf32>
    %cst = arith.constant dense<0.000000e+00> : vector<256x2xf32>
    %4 = tpu.matmul %2, %3, %cst {dimension_numbers = #tpu.dot_dimension_numbers<[1], [0], [0], [1], [0, 0, 1, 1], [], []>} : vector<256x4xf32>, vector<4x2xf32>, vector<256x2xf32> -> vector<256x2xf32>
    %c0_5 = arith.constant 0 : index
    %c0_6 = arith.constant 0 : index
    %5 = vector.load %arg3[%c0_5, %c0_6] : memref<1x2xf32, #tpu.memory_space<vmem>>, vector<1x2xf32>
    %6 = vector.broadcast %5 : vector<1x2xf32> to vector<256x2xf32>
    %7 = arith.addf %4, %6 : vector<256x2xf32>
    %cst_7 = arith.constant 0.000000e+00 : f32
    %8 = vector.broadcast %cst_7 : f32 to vector<256x2xf32>
    %9 = arith.subf %8, %7 : vector<256x2xf32>
    %10 = math.exp %9 : vector<256x2xf32>
    %cst_8 = arith.constant 1.000000e+00 : f32
    %11 = vector.broadcast %cst_8 : f32 to vector<256x2xf32>
    %12 = arith.addf %11, %10 : vector<256x2xf32>
    %13 = tpu.reciprocal %12 : vector<256x2xf32> -> vector<256x2xf32>
    %14 = arith.mulf %7, %13 : vector<256x2xf32>
    %c0_9 = arith.constant 0 : index
    %c0_10 = arith.constant 0 : index
    %15 = vector.load %arg7[%c0_9, %c0_10] : memref<256x8xf32, #tpu.memory_space<vmem>>, vector<256x2xf32>
    tpu.vector_store %arg7[%c0_9, %c0_10], %14 {strides = array<i32>} : memref<256x8xf32, #tpu.memory_space<vmem>>, vector<256x2xf32>,
    %16 = vector.shape_cast %14 : vector<256x2xf32> to vector<16x16x2xf32>
    %cst_11 = arith.constant 0xFF800000 : f32
    %17 = vector.broadcast %cst_11 : f32 to vector<2x16x2xf32>
    %18 = tpu.concatenate %17, %16, %17 in 0 : vector<2x16x2xf32>, vector<16x16x2xf32>, vector<2x16x2xf32> -> vector<20x16x2xf32>
    %19 = vector.extract_strided_slice %18 {offsets = [0, 0, 0], sizes = [19, 16, 2], strides = [1, 1, 1]} : vector<20x16x2xf32> to vector<19x16x2xf32>
    %20 = vector.extract_strided_slice %18 {offsets = [1, 0, 0], sizes = [19, 16, 2], strides = [1, 1, 1]} : vector<20x16x2xf32> to vector<19x16x2xf32>
    %21 = arith.maximumf %19, %20 : vector<19x16x2xf32>
    %22 = vector.extract_strided_slice %21 {offsets = [0, 0, 0], sizes = [17, 16, 2], strides = [1, 1, 1]} : vector<19x16x2xf32> to vector<17x16x2xf32>
    %23 = vector.extract_strided_slice %21 {offsets = [2, 0, 0], sizes = [17, 16, 2], strides = [1, 1, 1]} : vector<19x16x2xf32> to vector<17x16x2xf32>
    %24 = arith.maximumf %22, %23 : vector<17x16x2xf32>
    %25 = vector.extract_strided_slice %24 {offsets = [0, 0, 0], sizes = [16, 16, 2], strides = [1, 1, 1]} : vector<17x16x2xf32> to vector<16x16x2xf32>
    %26 = vector.extract_strided_slice %18 {offsets = [4, 0, 0], sizes = [16, 16, 2], strides = [1, 1, 1]} : vector<20x16x2xf32> to vector<16x16x2xf32>
    %27 = arith.maximumf %25, %26 : vector<16x16x2xf32>
    %cst_12 = arith.constant 0xFF800000 : f32
    %28 = vector.broadcast %cst_12 : f32 to vector<16x2x2xf32>
    %29 = tpu.concatenate %28, %27, %28 in 1 : vector<16x2x2xf32>, vector<16x16x2xf32>, vector<16x2x2xf32> -> vector<16x20x2xf32>
    %30 = vector.extract_strided_slice %29 {offsets = [0, 0, 0], sizes = [16, 19, 2], strides = [1, 1, 1]} : vector<16x20x2xf32> to vector<16x19x2xf32>
    %31 = vector.extract_strided_slice %29 {offsets = [0, 1, 0], sizes = [16, 19, 2], strides = [1, 1, 1]} : vector<16x20x2xf32> to vector<16x19x2xf32>
    %32 = arith.maximumf %30, %31 : vector<16x19x2xf32>
    %33 = vector.extract_strided_slice %32 {offsets = [0, 0, 0], sizes = [16, 17, 2], strides = [1, 1, 1]} : vector<16x19x2xf32> to vector<16x17x2xf32>
    %34 = vector.extract_strided_slice %32 {offsets = [0, 2, 0], sizes = [16, 17, 2], strides = [1, 1, 1]} : vector<16x19x2xf32> to vector<16x17x2xf32>
    %35 = arith.maximumf %33, %34 : vector<16x17x2xf32>
    %36 = vector.extract_strided_slice %35 {offsets = [0, 0, 0], sizes = [16, 16, 2], strides = [1, 1, 1]} : vector<16x17x2xf32> to vector<16x16x2xf32>
    %37 = vector.extract_strided_slice %29 {offsets = [0, 4, 0], sizes = [16, 16, 2], strides = [1, 1, 1]} : vector<16x20x2xf32> to vector<16x16x2xf32>
    %38 = arith.maximumf %36, %37 : vector<16x16x2xf32>
    %39 = vector.shape_cast %38 : vector<16x16x2xf32> to vector<256x2xf32>
    %c0_13 = arith.constant 0 : index
    %c2 = arith.constant 2 : index
    %40 = vector.load %arg7[%c0_13, %c2] : memref<256x8xf32, #tpu.memory_space<vmem>>, vector<256x2xf32>
    tpu.vector_store %arg7[%c0_13, %c2], %39 {strides = array<i32>} : memref<256x8xf32, #tpu.memory_space<vmem>>, vector<256x2xf32>,
    %cst_14 = arith.constant 0xFF800000 : f32
    %41 = vector.broadcast %cst_14 : f32 to vector<2x16x2xf32>
    %42 = tpu.concatenate %41, %38, %41 in 0 : vector<2x16x2xf32>, vector<16x16x2xf32>, vector<2x16x2xf32> -> vector<20x16x2xf32>
    %43 = vector.extract_strided_slice %42 {offsets = [0, 0, 0], sizes = [19, 16, 2], strides = [1, 1, 1]} : vector<20x16x2xf32> to vector<19x16x2xf32>
    %44 = vector.extract_strided_slice %42 {offsets = [1, 0, 0], sizes = [19, 16, 2], strides = [1, 1, 1]} : vector<20x16x2xf32> to vector<19x16x2xf32>
    %45 = arith.maximumf %43, %44 : vector<19x16x2xf32>
    %46 = vector.extract_strided_slice %45 {offsets = [0, 0, 0], sizes = [17, 16, 2], strides = [1, 1, 1]} : vector<19x16x2xf32> to vector<17x16x2xf32>
    %47 = vector.extract_strided_slice %45 {offsets = [2, 0, 0], sizes = [17, 16, 2], strides = [1, 1, 1]} : vector<19x16x2xf32> to vector<17x16x2xf32>
    %48 = arith.maximumf %46, %47 : vector<17x16x2xf32>
    %49 = vector.extract_strided_slice %48 {offsets = [0, 0, 0], sizes = [16, 16, 2], strides = [1, 1, 1]} : vector<17x16x2xf32> to vector<16x16x2xf32>
    %50 = vector.extract_strided_slice %42 {offsets = [4, 0, 0], sizes = [16, 16, 2], strides = [1, 1, 1]} : vector<20x16x2xf32> to vector<16x16x2xf32>
    %51 = arith.maximumf %49, %50 : vector<16x16x2xf32>
    %cst_15 = arith.constant 0xFF800000 : f32
    %52 = vector.broadcast %cst_15 : f32 to vector<16x2x2xf32>
    %53 = tpu.concatenate %52, %51, %52 in 1 : vector<16x2x2xf32>, vector<16x16x2xf32>, vector<16x2x2xf32> -> vector<16x20x2xf32>
    %54 = vector.extract_strided_slice %53 {offsets = [0, 0, 0], sizes = [16, 19, 2], strides = [1, 1, 1]} : vector<16x20x2xf32> to vector<16x19x2xf32>
    %55 = vector.extract_strided_slice %53 {offsets = [0, 1, 0], sizes = [16, 19, 2], strides = [1, 1, 1]} : vector<16x20x2xf32> to vector<16x19x2xf32>
    %56 = arith.maximumf %54, %55 : vector<16x19x2xf32>
    %57 = vector.extract_strided_slice %56 {offsets = [0, 0, 0], sizes = [16, 17, 2], strides = [1, 1, 1]} : vector<16x19x2xf32> to vector<16x17x2xf32>
    %58 = vector.extract_strided_slice %56 {offsets = [0, 2, 0], sizes = [16, 17, 2], strides = [1, 1, 1]} : vector<16x19x2xf32> to vector<16x17x2xf32>
    %59 = arith.maximumf %57, %58 : vector<16x17x2xf32>
    %60 = vector.extract_strided_slice %59 {offsets = [0, 0, 0], sizes = [16, 16, 2], strides = [1, 1, 1]} : vector<16x17x2xf32> to vector<16x16x2xf32>
    %61 = vector.extract_strided_slice %53 {offsets = [0, 4, 0], sizes = [16, 16, 2], strides = [1, 1, 1]} : vector<16x20x2xf32> to vector<16x16x2xf32>
    %62 = arith.maximumf %60, %61 : vector<16x16x2xf32>
    %63 = vector.shape_cast %62 : vector<16x16x2xf32> to vector<256x2xf32>
    %c0_16 = arith.constant 0 : index
    %c4 = arith.constant 4 : index
    %64 = vector.load %arg7[%c0_16, %c4] : memref<256x8xf32, #tpu.memory_space<vmem>>, vector<256x2xf32>
    tpu.vector_store %arg7[%c0_16, %c4], %63 {strides = array<i32>} : memref<256x8xf32, #tpu.memory_space<vmem>>, vector<256x2xf32>,
    %cst_17 = arith.constant 0xFF800000 : f32
    %65 = vector.broadcast %cst_17 : f32 to vector<2x16x2xf32>
    %66 = tpu.concatenate %65, %62, %65 in 0 : vector<2x16x2xf32>, vector<16x16x2xf32>, vector<2x16x2xf32> -> vector<20x16x2xf32>
    %67 = vector.extract_strided_slice %66 {offsets = [0, 0, 0], sizes = [19, 16, 2], strides = [1, 1, 1]} : vector<20x16x2xf32> to vector<19x16x2xf32>
    %68 = vector.extract_strided_slice %66 {offsets = [1, 0, 0], sizes = [19, 16, 2], strides = [1, 1, 1]} : vector<20x16x2xf32> to vector<19x16x2xf32>
    %69 = arith.maximumf %67, %68 : vector<19x16x2xf32>
    %70 = vector.extract_strided_slice %69 {offsets = [0, 0, 0], sizes = [17, 16, 2], strides = [1, 1, 1]} : vector<19x16x2xf32> to vector<17x16x2xf32>
    %71 = vector.extract_strided_slice %69 {offsets = [2, 0, 0], sizes = [17, 16, 2], strides = [1, 1, 1]} : vector<19x16x2xf32> to vector<17x16x2xf32>
    %72 = arith.maximumf %70, %71 : vector<17x16x2xf32>
    %73 = vector.extract_strided_slice %72 {offsets = [0, 0, 0], sizes = [16, 16, 2], strides = [1, 1, 1]} : vector<17x16x2xf32> to vector<16x16x2xf32>
    %74 = vector.extract_strided_slice %66 {offsets = [4, 0, 0], sizes = [16, 16, 2], strides = [1, 1, 1]} : vector<20x16x2xf32> to vector<16x16x2xf32>
    %75 = arith.maximumf %73, %74 : vector<16x16x2xf32>
    %cst_18 = arith.constant 0xFF800000 : f32
    %76 = vector.broadcast %cst_18 : f32 to vector<16x2x2xf32>
    %77 = tpu.concatenate %76, %75, %76 in 1 : vector<16x2x2xf32>, vector<16x16x2xf32>, vector<16x2x2xf32> -> vector<16x20x2xf32>
    %78 = vector.extract_strided_slice %77 {offsets = [0, 0, 0], sizes = [16, 19, 2], strides = [1, 1, 1]} : vector<16x20x2xf32> to vector<16x19x2xf32>
    %79 = vector.extract_strided_slice %77 {offsets = [0, 1, 0], sizes = [16, 19, 2], strides = [1, 1, 1]} : vector<16x20x2xf32> to vector<16x19x2xf32>
    %80 = arith.maximumf %78, %79 : vector<16x19x2xf32>
    %81 = vector.extract_strided_slice %80 {offsets = [0, 0, 0], sizes = [16, 17, 2], strides = [1, 1, 1]} : vector<16x19x2xf32> to vector<16x17x2xf32>
    %82 = vector.extract_strided_slice %80 {offsets = [0, 2, 0], sizes = [16, 17, 2], strides = [1, 1, 1]} : vector<16x19x2xf32> to vector<16x17x2xf32>
    %83 = arith.maximumf %81, %82 : vector<16x17x2xf32>
    %84 = vector.extract_strided_slice %83 {offsets = [0, 0, 0], sizes = [16, 16, 2], strides = [1, 1, 1]} : vector<16x17x2xf32> to vector<16x16x2xf32>
    %85 = vector.extract_strided_slice %77 {offsets = [0, 4, 0], sizes = [16, 16, 2], strides = [1, 1, 1]} : vector<16x20x2xf32> to vector<16x16x2xf32>
    %86 = arith.maximumf %84, %85 : vector<16x16x2xf32>
    %87 = vector.shape_cast %86 : vector<16x16x2xf32> to vector<256x2xf32>
    %c0_19 = arith.constant 0 : index
    %c6 = arith.constant 6 : index
    %88 = vector.load %arg7[%c0_19, %c6] : memref<256x8xf32, #tpu.memory_space<vmem>>, vector<256x2xf32>
    tpu.vector_store %arg7[%c0_19, %c6], %87 {strides = array<i32>} : memref<256x8xf32, #tpu.memory_space<vmem>>, vector<256x2xf32>,
    %c0_20 = arith.constant 0 : index
    %c0_21 = arith.constant 0 : index
    %89 = vector.load %arg7[%c0_20, %c0_21] : memref<256x8xf32, #tpu.memory_space<vmem>>, vector<256x8xf32>
    %c0_22 = arith.constant 0 : index
    %c0_23 = arith.constant 0 : index
    %90 = vector.load %arg4[%c0_22, %c0_23] : memref<8x4xf32, #tpu.memory_space<vmem>>, vector<8x4xf32>
    %cst_24 = arith.constant dense<0.000000e+00> : vector<256x4xf32>
    %91 = tpu.matmul %89, %90, %cst_24 {dimension_numbers = #tpu.dot_dimension_numbers<[1], [0], [0], [1], [0, 0, 1, 1], [], []>} : vector<256x8xf32>, vector<8x4xf32>, vector<256x4xf32> -> vector<256x4xf32>
    %c0_25 = arith.constant 0 : index
    %c0_26 = arith.constant 0 : index
    %92 = vector.load %arg5[%c0_25, %c0_26] : memref<1x4xf32, #tpu.memory_space<vmem>>, vector<1x4xf32>
    %93 = vector.broadcast %92 : vector<1x4xf32> to vector<256x4xf32>
    %94 = arith.addf %91, %93 : vector<256x4xf32>
    %cst_27 = arith.constant 0.000000e+00 : f32
    %95 = vector.broadcast %cst_27 : f32 to vector<256x4xf32>
    %96 = arith.subf %95, %94 : vector<256x4xf32>
    %97 = math.exp %96 : vector<256x4xf32>
    %cst_28 = arith.constant 1.000000e+00 : f32
    %98 = vector.broadcast %cst_28 : f32 to vector<256x4xf32>
    %99 = arith.addf %98, %97 : vector<256x4xf32>
    %100 = tpu.reciprocal %99 : vector<256x4xf32> -> vector<256x4xf32>
    %101 = arith.mulf %94, %100 : vector<256x4xf32>
    %102 = vector.shape_cast %101 : vector<256x4xf32> to vector<16x16x4xf32>
    %c0_29 = arith.constant 0 : index
    %c0_30 = arith.constant 0 : index
    %c0_31 = arith.constant 0 : index
    %c0_32 = arith.constant 0 : index
    %103 = vector.load %arg6[%c0_29, %c0_30, %c0_31, %c0_32] : memref<1x16x16x4xf32, #tpu.memory_space<vmem>>, vector<1x16x16x4xf32>
    %104 = vector.shape_cast %103 : vector<1x16x16x4xf32> to vector<16x16x4xf32>
    %105 = vector.shape_cast %102 : vector<16x16x4xf32> to vector<1x16x16x4xf32>
    tpu.vector_store %arg6[%c0_29, %c0_30, %c0_31, %c0_32], %105 {strides = array<i32>} : memref<1x16x16x4xf32, #tpu.memory_space<vmem>>, vector<1x16x16x4xf32>,
    return
  }
  func.func @transform_0(%arg0: i32) -> (i32, i32, i32, i32) {
    %c0_i32 = arith.constant 0 : i32
    %c0_i32_0 = arith.constant 0 : i32
    %c0_i32_1 = arith.constant 0 : i32
    %c0_i32_2 = arith.constant 0 : i32
    return %arg0, %c0_i32, %c0_i32_0, %c0_i32_1 : i32, i32, i32, i32
  }
  func.func @transform_1(%arg0: i32) -> (i32, i32) {
    %c0_i32 = arith.constant 0 : i32
    %c0_i32_0 = arith.constant 0 : i32
    %c0_i32_1 = arith.constant 0 : i32
    return %c0_i32, %c0_i32_0 : i32, i32
  }
  func.func @transform_2(%arg0: i32) -> (i32, i32) {
    %c0_i32 = arith.constant 0 : i32
    %c0_i32_0 = arith.constant 0 : i32
    %c0_i32_1 = arith.constant 0 : i32
    return %c0_i32, %c0_i32_0 : i32, i32
  }
  func.func @transform_3(%arg0: i32) -> (i32, i32) {
    %c0_i32 = arith.constant 0 : i32
    %c0_i32_0 = arith.constant 0 : i32
    %c0_i32_1 = arith.constant 0 : i32
    return %c0_i32, %c0_i32_0 : i32, i32
  }
  func.func @transform_4(%arg0: i32) -> (i32, i32) {
    %c0_i32 = arith.constant 0 : i32
    %c0_i32_0 = arith.constant 0 : i32
    %c0_i32_1 = arith.constant 0 : i32
    return %c0_i32, %c0_i32_0 : i32, i32
  }
  func.func @transform_5(%arg0: i32) -> (i32, i32, i32, i32) {
    %c0_i32 = arith.constant 0 : i32
    %c0_i32_0 = arith.constant 0 : i32
    %c0_i32_1 = arith.constant 0 : i32
    %c0_i32_2 = arith.constant 0 : i32
    return %arg0, %c0_i32, %c0_i32_0, %c0_i32_1 : i32, i32, i32, i32
  }
}

</mosaic_0001>

<bundles_post_ra>
// kernel: tpu_custom_call.1
= control target key start
LH: loop header
LB: loop body
LE: loop exit
PB: predicated region body
PF: predicated region fallthrough
CT: control target
= control target key end

     0   :  { %s5313_s18 = smov 0   ;;  %s9243_s0 = inlined_call_operand.vmem [shape: f32[2,16,16,4], index: 0, kind: input, shape index: {}]   ;;  %s9244_s1 = inlined_call_operand.vmem [shape: f32[4,2], index: 1, kind: input, shape index: {}]   ;;  %s9245_s2 = inlined_call_operand.vmem [shape: f32[1,2], index: 2, kind: input, shape index: {}]   ;;  %s9246_s3 = inlined_call_operand.vmem [shape: f32[8,4], index: 3, kind: input, shape index: {}]   ;;  %s9247_s4 = inlined_call_operand.vmem [shape: f32[1,4], index: 4, kind: input, shape index: {}]   ;;  %s9248_s5 = inlined_call_operand.vmem [shape: f32[2,16,16,4], index: 5, kind: output, shape index: {}]  }
   0x1 LB: > { %s4921_s19 = sadd.s32 4294967295, %s5278_s18   ;;  %p4925_p0 = scmp.ge.s32.totalorder %s5278_s18, 1  ;;  %s5278_s18 = sphi %s5313_s18, %s15_s18  }
   0x2   : > { %p187_p1 = scmp.lt.s32.totalorder %s5278_s18, 3 }
   0x4   : > { %p188_p2 = pnand %p4925_p0, %p187_p1 }
   0x6   : > { %191 = sbr.rel (%p188_p2) target bundleno = 1068 (0x42c), region = 40 }
   0xb   : > { %v257_v0 = vld [vmem:[%s9244_s1] sm:$0xf]  ;;  %vm359_vm0 = vcmask 1043456   ;;  %p215_p3 = scmp.lt.s32.totalorder %s4921_s19, 1  ;;  %vm262_vm1 = vcmask 31744   ;;  %s5280_s30 = smov 2  }
   0xc   : > { %4930 = vmatpush.msk.msra.mxu0 %vm359_vm0, %v257_v0  ;;  %4999 = vmatpush.msk.msra.mxu2 %vm359_vm0, %v257_v0  ;;  %v5403_v33 = vld [vmem:[%s9245_s2] ss:$0 sm:$0xff]  ;;  %s5281_s6 = smov 4   ;;  %s5282_s7 = smov 6  }
   0xd   : > { %s9837_s19 = smov (!%p215_p3, %s4921_s19), 1 }
   0xe   : > { %s4997_s22 = sshll.u32 %s9837_s19, 8 }
   0xf   : > { %s5334_s25 = scalar_lea.vmem %s9243_s0, %s4997_s22  ;;  %s8901_s14 = scalar_lea.vmem %s9248_s5, %s4997_s22 }
  0x10   : > { %v225_v1 = vld [vmem:[%s5334_s25] sm:$0xff]  ;;  %v226_v3 = vld [vmem:[%s5334_s25 + $0x8] sm:$0xff]  ;;  %v227_v5 = vld [vmem:[%s5334_s25 + $0x10] sm:$0xff] }
  0x11   : > { %v241_v2 = vld [vmem:[%s5334_s25 + $0x80] sm:$0xff]  ;;  %4931 = vmatmul.msk.f32.vlgmr.msra.gmra.mxu0 %vm262_vm1, %v225_v1  ;;  %v242_v4 = vld [vmem:[%s5334_s25 + $0x88] sm:$0xff]  ;;  %v243_v6 = vld [vmem:[%s5334_s25 + $0x90] sm:$0xff] }
  0x12   : > { %4947 = vmatmul.msk.f32.vlgmr.msra.gmra.mxu2 %vm262_vm1, %v241_v2  ;;  %v228_v7 = vld [vmem:[%s5334_s25 + $0x18] sm:$0xff]  ;;  %v229_v9 = vld [vmem:[%s5334_s25 + $0x20] sm:$0xff]  ;;  %v230_v11 = vld [vmem:[%s5334_s25 + $0x28] sm:$0xff] }
  0x13   : > { %v244_v8 = vld [vmem:[%s5334_s25 + $0x98] sm:$0xff]  ;;  %v245_v10 = vld [vmem:[%s5334_s25 + $0xa0] sm:$0xff]  ;;  %v246_v12 = vld [vmem:[%s5334_s25 + $0xa8] sm:$0xff] }
  0x14   : > { %v231_v13 = vld [vmem:[%s5334_s25 + $0x30] sm:$0xff]  ;;  %v232_v15 = vld [vmem:[%s5334_s25 + $0x38] sm:$0xff]  ;;  %v233_v17 = vld [vmem:[%s5334_s25 + $0x40] sm:$0xff] }
  0x15   : > { %v247_v14 = vld [vmem:[%s5334_s25 + $0xb0] sm:$0xff]  ;;  %v248_v16 = vld [vmem:[%s5334_s25 + $0xb8] sm:$0xff]  ;;  %v249_v18 = vld [vmem:[%s5334_s25 + $0xc0] sm:$0xff] }
  0x16   : > { %v234_v19 = vld [vmem:[%s5334_s25 + $0x48] sm:$0xff]  ;;  %v235_v21 = vld [vmem:[%s5334_s25 + $0x50] sm:$0xff]  ;;  %v236_v23 = vld [vmem:[%s5334_s25 + $0x58] sm:$0xff] }
  0x17   : > { %v250_v20 = vld [vmem:[%s5334_s25 + $0xc8] sm:$0xff]  ;;  %v251_v22 = vld [vmem:[%s5334_s25 + $0xd0] sm:$0xff]  ;;  %v252_v24 = vld [vmem:[%s5334_s25 + $0xd8] sm:$0xff] }
  0x18   : > { %v237_v25 = vld [vmem:[%s5334_s25 + $0x60] sm:$0xff]  ;;  %v238_v27 = vld [vmem:[%s5334_s25 + $0x68] sm:$0xff]  ;;  %v239_v29 = vld [vmem:[%s5334_s25 + $0x70] sm:$0xff] }
  0x19   : > { %4932 = vmatmul.msk.f32.gmra.mxu0 %vm262_vm1, %v226_v3  ;;  %v253_v26 = vld [vmem:[%s5334_s25 + $0xe0] sm:$0xff]  ;;  %v254_v28 = vld [vmem:[%s5334_s25 + $0xe8] sm:$0xff]  ;;  %v255_v30 = vld [vmem:[%s5334_s25 + $0xf0] sm:$0xff] }
  0x1a   : > { %4948 = vmatmul.msk.f32.gmra.mxu2 %vm262_vm1, %v242_v4  ;;  %v240_v31 = vld [vmem:[%s5334_s25 + $0x78] sm:$0xff] }
  0x1b   : > { %v256_v32 = vld [vmem:[%s5334_s25 + $0xf8] sm:$0xff] }
  0x21   : > { %4933 = vmatmul.msk.f32.gmra.mxu0 %vm262_vm1, %v227_v5 }
  0x22   : > { %4949 = vmatmul.msk.f32.gmra.mxu2 %vm262_vm1, %v243_v6 }
  0x29   : > { %4934 = vmatmul.msk.f32.gmra.mxu0 %vm262_vm1, %v228_v7 }
  0x2a   : > { %4950 = vmatmul.msk.f32.gmra.mxu2 %vm262_vm1, %v244_v8 }
  0x31   : > { %4935 = vmatmul.msk.f32.gmra.mxu0 %vm262_vm1, %v229_v9 }
  0x32   : > { %4951 = vmatmul.msk.f32.gmra.mxu2 %vm262_vm1, %v245_v10 }
  0x39   : > { %4936 = vmatmul.msk.f32.gmra.mxu0 %vm262_vm1, %v230_v11 }
  0x3a   : > { %4952 = vmatmul.msk.f32.gmra.mxu2 %vm262_vm1, %v246_v12 }
  0x41   : > { %4937 = vmatmul.msk.f32.gmra.mxu0 %vm262_vm1, %v231_v13 }
  0x42   : > { %4953 = vmatmul.msk.f32.gmra.mxu2 %vm262_vm1, %v247_v14 }
  0x49   : > { %4938 = vmatmul.msk.f32.gmra.mxu0 %vm262_vm1, %v232_v15 }
  0x4a   : > { %4954 = vmatmul.msk.f32.gmra.mxu2 %vm262_vm1, %v248_v16 }
  0x51   : > { %4939 = vmatmul.msk.f32.gmra.mxu0 %vm262_vm1, %v233_v17 }
  0x52   : > { %4955 = vmatmul.msk.f32.gmra.mxu2 %vm262_vm1, %v249_v18 }
  0x59   : > { %4940 = vmatmul.msk.f32.gmra.mxu0 %vm262_vm1, %v234_v19 }
  0x5a   : > { %4956 = vmatmul.msk.f32.gmra.mxu2 %vm262_vm1, %v250_v20 }
  0x61   : > { %4941 = vmatmul.msk.f32.gmra.mxu0 %vm262_vm1, %v235_v21 }
  0x62   : > { %4957 = vmatmul.msk.f32.gmra.mxu2 %vm262_vm1, %v251_v22 }
  0x69   : > { %4942 = vmatmul.msk.f32.gmra.mxu0 %vm262_vm1, %v236_v23 }
  0x6a   : > { %4958 = vmatmul.msk.f32.gmra.mxu2 %vm262_vm1, %v252_v24 }
  0x71   : > { %4943 = vmatmul.msk.f32.gmra.mxu0 %vm262_vm1, %v237_v25 }
  0x72   : > { %4959 = vmatmul.msk.f32.gmra.mxu2 %vm262_vm1, %v253_v26 }
  0x79   : > { %4944 = vmatmul.msk.f32.gmra.mxu0 %vm262_vm1, %v238_v27 }
  0x7a   : > { %4960 = vmatmul.msk.f32.gmra.mxu2 %vm262_vm1, %v254_v28 }
  0x81   : > { %4945 = vmatmul.msk.f32.gmra.mxu0 %vm262_vm1, %v239_v29 }
  0x82   : > { %4961 = vmatmul.msk.f32.gmra.mxu2 %vm262_vm1, %v255_v30 }
  0x89   : > { %4946 = vmatmul.msk.f32.gmra.mxu0 %vm262_vm1, %v240_v31 }
  0x8a   : > { %4962 = vmatmul.msk.f32.gmra.mxu2 %vm262_vm1, %v256_v32 }
  0x8e   : > { %v380_v34 = vpop.f32.mrf.mxu0 }
  0x8f   : > { %v5406_v35 = vadd.f32 %v5403_v33, %v380_v34 }
  0x91   : > { %v476_v36 = vsub.f32 0.0, %v5406_v35 }
  0x93   : > { %v508_v37 = vmul.f32 1.442695, %v476_v36 }
  0x95   : > { %v428_v38 = vpop.f32.mrf.mxu2  ;;  %5014 = vpow2.f32 %v508_v37 }
  0x96   : > { %v5410_v39 = vadd.f32 %v5403_v33, %v428_v38  ;;  %v383_v40 = vpop.f32.mrf.mxu0 }
  0x97   : > { %v5414_v42 = vadd.f32 %v5403_v33, %v383_v40 }
  0x98   : > { %v492_v41 = vsub.f32 0.0, %v5410_v39 }
  0x99   : > { %v477_v44 = vsub.f32 0.0, %v5414_v42 }
  0x9a   : > { %v540_v43 = vmul.f32 1.442695, %v492_v41 }
  0x9b   : > { %v5015_v45 = vpop.eup %5014  ;;  %v510_v46 = vmul.f32 1.442695, %v477_v44 }
  0x9c   : > { %5016 = vpow2.f32 %v540_v43  ;;  %v5417_v47 = vadd.f32 1.0, %v5015_v45 }
  0x9d   : > { %v431_v48 = vpop.f32.mrf.mxu2  ;;  %5018 = vpow2.f32 %v510_v46 }
  0x9e   : > { %v5420_v49 = vadd.f32 %v5403_v33, %v431_v48  ;;  %5020 = vrcp.f32 %v5417_v47  ;;  %v386_v50 = vpop.f32.mrf.mxu0  ;;  %v615_v9 = vand.u32 2147483648, %v5417_v47  ;;  %v613_v19 = vand.u32 2147483647, %v5417_v47 }
  0x9f   : > { %v5425_v52 = vadd.f32 %v5403_v33, %v386_v50  ;;  %vm609_vm2 = vweird.f32 %v5417_v47 }
  0xa0   : > { %v493_v51 = vsub.f32 0.0, %v5420_v49  ;;  %v616_v21 = vor.u32 1.1754944e-38, %v615_v9  ;;  %vm5481_vm5 = vcmp.eq.f32.partialorder %v613_v19, 8.507059e+37 }
  0xa1   : > { %v478_v55 = vsub.f32 0.0, %v5425_v52 }
  0xa2   : > { %v5017_v53 = vpop.eup %5016  ;;  %v542_v54 = vmul.f32 1.442695, %v493_v51 }
  0xa3   : > { %v5428_v56 = vadd.f32 1.0, %v5017_v53  ;;  %v5019_v57 = vpop.eup %5018  ;;  %v512_v58 = vmul.f32 1.442695, %v478_v55 }
  0xa4   : > { %5022 = vpow2.f32 %v542_v54  ;;  %v5430_v59 = vpop.eup %5020  ;;  %v5433_v61 = vadd.f32 1.0, %v5019_v57 }
  0xa5   : > { %5024 = vrcp.f32 %v5428_v56  ;;  %v434_v60 = vpop.f32.mrf.mxu2  ;;  %v605_v0 = vmul.f32 %v5430_v59, %v5417_v47  ;;  %v839_v15 = vand.u32 2147483648, %v5428_v56  ;;  %v837_v23 = vand.u32 2147483647, %v5428_v56 }
  0xa6   : > { %5026 = vpow2.f32 %v512_v58  ;;  %v5436_v62 = vadd.f32 %v5403_v33, %v434_v60  ;;  %v389_v63 = vpop.f32.mrf.mxu0  ;;  %v629_v20 = vand.u32 2147483648, %v5433_v61  ;;  %vm610_vm3 = vweird.f32 %v5430_v59 }
  0xa7   : > { %5028 = vrcp.f32 %v5433_v61  ;;  %v5443_v3 = vadd.f32 %v5403_v33, %v389_v63  ;;  %v606_v8 = vsub.f32 1.0, %v605_v0  ;;  %vm833_vm4 = vweird.f32 %v5428_v56  ;;  %vm5510_vm9 = vmor %vm609_vm2, %vm610_vm3 }
  0xa8   : > { %v494_v1 = vsub.f32 0.0, %v5436_v62  ;;  %v5477_v29 = vor.u32 1.1754944e-38, %v839_v15  ;;  %v627_v30 = vand.u32 2147483647, %v5433_v61  ;;  %vm623_vm6 = vweird.f32 %v5433_v61 }
  0xa9   : > { %v479_v14 = vsub.f32 0.0, %v5443_v3  ;;  %v607_v18 = vmul.f32 %v5430_v59, %v606_v8  ;;  %v5486_v36 = vor.u32 1.1754944e-38, %v629_v20  ;;  %vm5497_vm8 = vcmp.eq.f32.partialorder %v837_v23, 8.507059e+37 }
  0xaa   : > { %v5023_v2 = vpop.eup %5022  ;;  %v544_v6 = vmul.f32 1.442695, %v494_v1  ;;  %vm5523_vm12 = vcmp.eq.f32.partialorder %v627_v30, 8.507059e+37 }
  0xab   : > { %v5445_v4 = vpop.eup %5024  ;;  %v5447_v5 = vadd.f32 1.0, %v5023_v2  ;;  %v514_v25 = vmul.f32 1.442695, %v479_v14  ;;  %v608_v32 = vadd.f32 %v5430_v59, %v607_v18 }
  0xac   : > { %v5027_v7 = vpop.eup %5026  ;;  %v829_v10 = vmul.f32 %v5445_v4, %v5428_v56  ;;  %vm834_vm7 = vweird.f32 %v5445_v4 }
  0xad   : > { %5030 = vrcp.f32 %v5447_v5  ;;  %v437_v11 = vpop.f32.mrf.mxu2  ;;  %v5453_v12 = vpop.eup %5028  ;;  %v5455_v13 = vadd.f32 1.0, %v5027_v7  ;;  %vm847_vm10 = vweird.f32 %v5447_v5  ;;  %v851_v54 = vand.u32 2147483647, %v5447_v5  ;;  %vm5538_vm13 = vmor %vm833_vm4, %vm834_vm7 }
  0xae   : > { %5032 = vpow2.f32 %v544_v6  ;;  %v619_v16 = vmul.f32 %v5453_v12, %v5433_v61  ;;  %v392_v17 = vpop.f32.mrf.mxu0  ;;  %v830_v22 = vsub.f32 1.0, %v829_v10  ;;  %v5468_v26 = vadd.f32 %v5403_v33, %v437_v11 }
  0xaf   : > { %5034 = vrcp.f32 %v5455_v13  ;;  %v5471_v27 = vadd.f32 %v5403_v33, %v392_v17  ;;  %v612_v58 = vsel %vm5510_vm9, %v5430_v59, %v608_v32  ;;  %vm624_vm11 = vweird.f32 %v5453_v12 }
  0xb0   : > { %v620_v24 = vsub.f32 1.0, %v619_v16  ;;  %5036 = vpow2.f32 %v514_v25  ;;  %v831_v38 = vmul.f32 %v5445_v4, %v830_v22  ;;  %v495_v41 = vsub.f32 0.0, %v5468_v26  ;;  %vm5558_vm2 = vmor %vm623_vm6, %vm624_vm11 }
  0xb1   : > { %v480_v50 = vsub.f32 0.0, %v5471_v27  ;;  %v853_v60 = vand.u32 2147483648, %v5447_v5  ;;  %v641_v63 = vand.u32 2147483647, %v5455_v13  ;;  %v643_v2 = vand.u32 2147483648, %v5455_v13 }
  0xb2   : > { %v621_v46 = vmul.f32 %v5453_v12, %v620_v24  ;;  %v832_v0 = vadd.f32 %v5445_v4, %v831_v38  ;;  %v546_v6 = vmul.f32 1.442695, %v495_v41  ;;  %v617_v56 = vsel %vm5481_vm5, %v616_v21, %v612_v58 }
  0xb3   : > { %v5473_v28 = vpop.eup %5030  ;;  %v516_v9 = vmul.f32 1.442695, %v480_v50  ;;  %vm637_vm3 = vweird.f32 %v5455_v13  ;;  %vm5588_vm6 = vcmp.eq.f32.partialorder %v851_v54, 8.507059e+37  ;;  %vm642_vm7 = vcmp.eq.f32.partialorder %v641_v63, 8.507059e+37 }
  0xb4   : > { %v5033_v31 = vpop.eup %5032  ;;  %v843_v37 = vmul.f32 %v5473_v28, %v5447_v5  ;;  %v622_v8 = vadd.f32 %v5453_v12, %v621_v46  ;;  %vm848_vm15 = vweird.f32 %v5473_v28  ;;  %v836_v22 = vsel %vm5538_vm13, %v5445_v4, %v832_v0 }
  0xb5   : > { %v5492_v40 = vadd.f32 1.0, %v5033_v31  ;;  %v440_v43 = vpop.f32.mrf.mxu2  ;;  %v5495_v44 = vpop.eup %5034  ;;  %vm5584_vm5 = vmor %vm847_vm10, %vm848_vm15  ;;  %v854_v31 = vor.u32 1.1754944e-38, %v853_v60  ;;  %v644_v32 = vor.u32 1.1754944e-38, %v643_v2  ;;  %v5631_v63 = vmul.f32 %v617_v56, %v5406_v35 }
  0xb6   : > { %v844_v48 = vsub.f32 1.0, %v843_v37  ;;  %v5504_v51 = vadd.f32 %v5403_v33, %v440_v43  ;;  %v633_v55 = vmul.f32 %v5495_v44, %v5455_v13  ;;  %v395_v57 = vpop.f32.mrf.mxu0  ;;  %v5037_v7 = vpop.eup %5036  ;;  %vm638_vm14 = vweird.f32 %v5495_v44 }
  0xb7   : > { %5038 = vrcp.f32 %v5492_v40  ;;  %v5544_v15 = vadd.f32 1.0, %v5037_v7  ;;  %v5548_v17 = vadd.f32 %v5403_v33, %v395_v57  ;;  %v626_v21 = vsel %vm5558_vm2, %v5453_v12, %v622_v8  ;;  %vm5574_vm4 = vmor %vm637_vm3, %vm638_vm14  ;;  %9428 = vst [vmem:[#allocation4_spill] sm:$0xff] %v5631_v63 }
  0xb8   : > { %v634_v1 = vsub.f32 1.0, %v633_v55  ;;  %v845_v59 = vmul.f32 %v5473_v28, %v844_v48  ;;  %v496_v10 = vsub.f32 0.0, %v5504_v51  ;;  %5040 = vpow2.f32 %v546_v6 }
  0xb9   : > { %5042 = vpow2.f32 %v516_v9  ;;  %v481_v25 = vsub.f32 0.0, %v5548_v17  ;;  %v841_v37 = vsel %vm5497_vm8, %v5477_v29, %v836_v22  ;;  %v631_v38 = vsel %vm5523_vm12, %v5486_v36, %v626_v21 }
  0xba   : > { %v635_v14 = vmul.f32 %v5495_v44, %v634_v1  ;;  %v548_v16 = vmul.f32 1.442695, %v496_v10  ;;  %5044 = vrcp.f32 %v5544_v15  ;;  %v846_v61 = vadd.f32 %v5473_v28, %v845_v59 }
  0xbb   : > { %vm861_vm9 = vweird.f32 %v5492_v40  ;;  %v518_v41 = vmul.f32 1.442695, %v481_v25  ;;  %v865_v50 = vand.u32 2147483647, %v5492_v40  ;;  %v867_v55 = vand.u32 2147483648, %v5492_v40 }
  0xbc   : > { %v636_v20 = vadd.f32 %v5495_v44, %v635_v14  ;;  %5046 = vpow2.f32 %v548_v16  ;;  %v850_v46 = vsel %vm5584_vm5, %v5473_v28, %v846_v61  ;;  %v657_v60 = vand.u32 2147483648, %v5544_v15 }
  0xbd   : > { %v5550_v18 = vpop.eup %5038  ;;  %v443_v30 = vpop.f32.mrf.mxu2  ;;  %5048 = vpow2.f32 %v518_v41  ;;  %v5634_v0 = vmul.f32 %v841_v37, %v5410_v39  ;;  %v855_v1 = vsel %vm5588_vm6, %v854_v31, %v850_v46  ;;  %v5639_v6 = vmul.f32 %v631_v38, %v5414_v42 }
  0xbe   : > { %v857_v13 = vmul.f32 %v5550_v18, %v5492_v40  ;;  %v640_v24 = vsel %vm5574_vm4, %v5495_v44, %v636_v20  ;;  %v5041_v34 = vpop.eup %5040  ;;  %v398_v43 = vpop.f32.mrf.mxu0  ;;  %v5615_v36 = vadd.f32 %v5403_v33, %v443_v30  ;;  %vm862_vm8 = vweird.f32 %v5550_v18 }
  0xbf   : > { %v5043_v44 = vpop.eup %5042  ;;  %v645_v48 = vsel %vm642_vm7, %v644_v32, %v640_v24  ;;  %v5607_v53 = vadd.f32 1.0, %v5041_v34  ;;  %v5622_v57 = vadd.f32 %v5403_v33, %v398_v43  ;;  %9429 = vst [vmem:[#allocation5_spill] sm:$0xff] %v5634_v0  ;;  %vm5642_vm10 = vcmp.eq.f32.partialorder %v865_v50, 8.507059e+37  ;;  %vm5649_vm11 = vmor %vm861_vm9, %vm862_vm8 }
  0xc0   : > { %v858_v5 = vsub.f32 1.0, %v857_v13  ;;  %v5609_v45 = vpop.eup %5044  ;;  %v5612_v54 = vadd.f32 1.0, %v5043_v44  ;;  %v5625_v47 = vmul.f32 %v645_v48, %v5425_v52  ;;  %9430 = vst [vmem:[#allocation6_spill] sm:$0xff] %v5639_v6  ;;  %v497_v8 = vsub.f32 0.0, %v5615_v36 }
  0xc1   : > { %v647_v28 = vmul.f32 %v5609_v45, %v5544_v15  ;;  %5050 = vrcp.f32 %v5607_v53  ;;  %v868_v39 = vor.u32 1.1754944e-38, %v867_v55  ;;  %v655_v59 = vand.u32 2147483647, %v5544_v15 }
  0xc2   : > { %v859_v29 = vmul.f32 %v5550_v18, %v858_v5  ;;  %v5047_v58 = vpop.eup %5046  ;;  %9427 = vst [vmem:[#allocation3_spill] sm:$0xff] %v5625_v47  ;;  %5052 = vrcp.f32 %v5612_v54  ;;  %v482_v42 = vsub.f32 0.0, %v5622_v57  ;;  %v5658_v11 = vmul.f32 %v855_v1, %v5420_v49 }
  0xc3   : > { %v648_v2 = vsub.f32 1.0, %v647_v28  ;;  %v5654_v9 = vadd.f32 1.0, %v5047_v58  ;;  %v5049_v10 = vpop.eup %5048  ;;  %v5662_v14 = vmax.f32 %v5631_v63, %v5625_v47  ;;  %vm651_vm12 = vweird.f32 %v5544_v15 }
  0xc4   : > { %v860_v52 = vadd.f32 %v5550_v18, %v859_v29  ;;  %9435 = vst [vmem:[#allocation7_spill] sm:$0xff] %v5658_v11  ;;  %v658_v40 = vor.u32 1.1754944e-38, %v657_v60  ;;  %vm652_vm13 = vweird.f32 %v5609_v45  ;;  %vm875_vm14 = vweird.f32 %v5607_v53 }
  0xc5   : > { %v446_v16 = vpop.f32.mrf.mxu2  ;;  %v649_v19 = vmul.f32 %v5609_v45, %v648_v2  ;;  %5054 = vrcp.f32 %v5654_v9  ;;  %v879_v21 = vand.u32 2147483647, %v5607_v53  ;;  %v550_v61 = vmul.f32 1.442695, %v497_v8  ;;  %vm5703_vm4 = vmor %vm651_vm12, %vm652_vm13 }
  0xc6   : > { %v864_v20 = vsel %vm5649_vm11, %v5550_v18, %v860_v52  ;;  %vm5677_vm15 = vcmp.eq.f32.partialorder %v655_v59, 8.507059e+37  ;;  %v5682_v4 = vadd.f32 1.0, %v5049_v10  ;;  %v520_v12 = vmul.f32 1.442695, %v482_v42  ;;  %v401_v38 = vpop.f32.mrf.mxu0 }
  0xc7   : > { %v5665_v56 = vpop.eup %5050  ;;  %v5685_v24 = vadd.f32 %v5403_v33, %v446_v16  ;;  %v881_v18 = vand.u32 2147483648, %v5607_v53  ;;  %vm665_vm2 = vweird.f32 %v5612_v54  ;;  %v669_v30 = vand.u32 2147483647, %v5612_v54 }
  0xc8   : > { %v5053_v49 = vpop.eup %5052  ;;  %v871_v22 = vmul.f32 %v5665_v56, %v5607_v53  ;;  %v650_v31 = vadd.f32 %v5609_v45, %v649_v19  ;;  %vm876_vm3 = vweird.f32 %v5665_v56  ;;  %5056 = vrcp.f32 %v5682_v4 }
  0xc9   : > { %v661_v13 = vmul.f32 %v5053_v49, %v5612_v54  ;;  %v869_v5 = vsel %vm5642_vm10, %v868_v39, %v864_v20  ;;  %v671_v37 = vand.u32 2147483648, %v5612_v54  ;;  %5058 = vpow2.f32 %v550_v61  ;;  %vm5713_vm6 = vmor %vm875_vm14, %vm876_vm3 }
  0xca   : > { %v872_v25 = vsub.f32 1.0, %v871_v22  ;;  %vm666_vm5 = vweird.f32 %v5053_v49  ;;  %5060 = vpow2.f32 %v520_v12  ;;  %v498_v46 = vsub.f32 0.0, %v5685_v24 }
  0xcb   : > { %v662_v32 = vsub.f32 1.0, %v661_v13  ;;  %v5697_v41 = vpop.eup %5054  ;;  %vm5717_vm7 = vcmp.eq.f32.partialorder %v879_v21, 8.507059e+37  ;;  %v882_v29 = vor.u32 1.1754944e-38, %v881_v18  ;;  %v654_v28 = vsel %vm5703_vm4, %v5609_v45, %v650_v31  ;;  %vm5734_vm9 = vmor %vm665_vm2, %vm666_vm5 }
  0xcc   : > { %v873_v34 = vmul.f32 %v5665_v56, %v872_v25  ;;  %v885_v55 = vmul.f32 %v5697_v41, %v5654_v9  ;;  %v552_v60 = vmul.f32 1.442695, %v498_v46  ;;  %v5727_v53 = vadd.f32 %v5403_v33, %v401_v38 }
  0xcd   : > { %v663_v44 = vmul.f32 %v5053_v49, %v662_v32  ;;  %v5730_v1 = vmul.f32 %v869_v5, %v5436_v62  ;;  %vm670_vm8 = vcmp.eq.f32.partialorder %v669_v30, 8.507059e+37  ;;  %v672_v52 = vor.u32 1.1754944e-38, %v671_v37 }
  0xce   : > { %v874_v48 = vadd.f32 %v5665_v56, %v873_v34  ;;  %v886_v7 = vsub.f32 1.0, %v885_v55  ;;  %v5738_v8 = vpop.eup %5056  ;;  %vm889_vm10 = vweird.f32 %v5654_v9  ;;  %5062 = vpow2.f32 %v552_v60  ;;  %v404_v5 = vpop.f32.mrf.mxu0 }
  0xcf   : > { %v664_v58 = vadd.f32 %v5053_v49, %v663_v44  ;;  %9444 = vst [vmem:[#allocation8_spill] sm:$0xff] %v5730_v1  ;;  %v5059_v62 = vpop.eup %5058  ;;  %v659_v54 = vsel %vm5677_vm15, %v658_v40, %v654_v28  ;;  %v675_v59 = vmul.f32 %v5738_v8, %v5682_v4  ;;  %v483_v42 = vsub.f32 0.0, %v5727_v53 }
  0xd0   : > { %v878_v45 = vsel %vm5713_vm6, %v5665_v56, %v874_v48  ;;  %v887_v39 = vmul.f32 %v5697_v41, %v886_v7  ;;  %v5061_v10 = vpop.eup %5060  ;;  %vm890_vm11 = vweird.f32 %v5697_v41  ;;  %v893_v56 = vand.u32 2147483647, %v5654_v9 }
  0xd1   : > { %v668_v35 = vsel %vm5734_vm9, %v5053_v49, %v664_v58  ;;  %v5754_v19 = vadd.f32 1.0, %v5059_v62  ;;  %v449_v49 = vpop.f32.mrf.mxu2  ;;  %v883_v20 = vsel %vm5717_vm7, %v882_v29, %v878_v45  ;;  %v895_v40 = vand.u32 2147483648, %v5654_v9  ;;  %vm5772_vm12 = vmor %vm889_vm10, %vm890_vm11 }
  0xd2   : > { %v673_v16 = vsel %vm670_vm8, %v672_v52, %v668_v35  ;;  %v676_v22 = vsub.f32 1.0, %v675_v59  ;;  %v5759_v21 = vadd.f32 1.0, %v5061_v10  ;;  %v5762_v61 = vmul.f32 %v659_v54, %v5443_v3 }
  0xd3   : > { %v888_v23 = vadd.f32 %v5697_v41, %v887_v39  ;;  %v683_v13 = vand.u32 2147483647, %v5682_v4  ;;  %5064 = vrcp.f32 %v5754_v19  ;;  %v5768_v12 = vmul.f32 %v673_v16, %v5471_v27 }
  0xd4   : > { %9447 = vst [vmem:[#allocation9_spill] sm:$0xff] %v5762_v61  ;;  %v677_v18 = vmul.f32 %v5738_v8, %v676_v22  ;;  %v522_v30 = vmul.f32 1.442695, %v483_v42  ;;  %v5778_v3 = vadd.f32 %v5403_v33, %v449_v49  ;;  %v5063_v31 = vpop.eup %5062  ;;  %v5782_v32 = vmax.f32 %v5634_v0, %v5730_v1 }
  0xd5   : > { %9448 = vst [vmem:[#allocation10_spill] sm:$0xff] %v5768_v12  ;;  %v5785_v27 = vmul.f32 %v883_v20, %v5468_v26  ;;  %v685_v9 = vand.u32 2147483648, %v5682_v4  ;;  %5066 = vrcp.f32 %v5759_v21  ;;  %vm5789_vm13 = vcmp.eq.f32.partialorder %v893_v56, 8.507059e+37 }
  0xd6   : > { %9451 = vst [vmem:[#allocation11_spill] sm:$0xff] %v5782_v32  ;;  %v896_v37 = vor.u32 1.1754944e-38, %v895_v40  ;;  %v678_v38 = vadd.f32 %v5738_v8, %v677_v18  ;;  %vm680_vm14 = vweird.f32 %v5738_v8  ;;  %v5797_v43 = vmax.f32 %v5639_v6, %v5762_v61  ;;  %v407_v25 = vpop.f32.mrf.mxu0 }
  0xd7   : > { %9452 = vst [vmem:[#allocation12_spill] sm:$0xff] %v5785_v27  ;;  %v892_v26 = vsel %vm5772_vm12, %v5697_v41, %v888_v23  ;;  %vm679_vm15 = vweird.f32 %v5682_v4  ;;  %v5803_v44 = vadd.f32 1.0, %v5063_v31  ;;  %v1177_v46 = vmax.f32 %v5662_v14, %v5768_v12 }
  0xd8   : > { %vm5807_vm2 = vcmp.eq.f32.partialorder %v683_v13, 8.507059e+37  ;;  %5068 = vpow2.f32 %v522_v30  ;;  %v499_v50 = vsub.f32 0.0, %v5778_v3  ;;  %v5816_v29 = vmax.f32 %v5658_v11, %v5785_v27  ;;  %vm5818_vm3 = vmor %vm679_vm15, %vm680_vm14 }
  0xd9   : > { %v5812_v15 = vpop.eup %5064  ;;  %v686_v41 = vor.u32 1.1754944e-38, %v685_v9  ;;  %v907_v55 = vand.u32 2147483647, %v5754_v19  ;;  %5070 = vrcp.f32 %v5803_v44  ;;  %v897_v28 = vsel %vm5789_vm13, %v896_v37, %v892_v26  ;;  %v452_v62 = vpop.f32.mrf.mxu2 }
  0xda   : > { %9457 = vst [vmem:[#allocation13_spill] sm:$0xff] %v5816_v29  ;;  %v682_v58 = vsel %vm5818_vm3, %v5738_v8, %v678_v38  ;;  %v899_v60 = vmul.f32 %v5812_v15, %v5754_v19  ;;  %v909_v2 = vand.u32 2147483648, %v5754_v19  ;;  %v5836_v7 = vmax.f32 %v5625_v47, %v5768_v12 }
  0xdb   : > { %v5832_v52 = vpop.eup %5066  ;;  %vm903_vm4 = vweird.f32 %v5754_v19  ;;  %v554_v45 = vmul.f32 1.442695, %v499_v50  ;;  %v5840_v35 = vadd.f32 %v5403_v33, %v404_v5  ;;  %v5842_v54 = vrot.slane %v1177_v46, 6 }
  0xdc   : > { %v900_v8 = vsub.f32 1.0, %v899_v60  ;;  %v689_v39 = vmul.f32 %v5832_v52, %v5759_v21  ;;  %vm693_vm5 = vweird.f32 %v5759_v21  ;;  %v5848_v59 = vmul.f32 %v897_v28, %v5504_v51 }
  0xdd   : > { %v687_v42 = vsel %vm5807_vm2, %v686_v41, %v682_v58  ;;  %vm5852_vm6 = vcmp.eq.f32.partialorder %v907_v55, 8.507059e+37  ;;  %5072 = vpow2.f32 %v554_v45  ;;  %v910_v49 = vor.u32 1.1754944e-38, %v909_v2 }
  0xde   : > { %9460 = vst [vmem:[#allocation14_spill] sm:$0xff] %v5848_v59  ;;  %v5069_v16 = vpop.eup %5068  ;;  %v901_v56 = vmul.f32 %v5812_v15, %v900_v8  ;;  %v690_v20 = vsub.f32 1.0, %v689_v39  ;;  %v697_v40 = vand.u32 2147483647, %v5759_v21  ;;  %vm904_vm7 = vweird.f32 %v5812_v15 }
  0xdf   : > { %v5858_v22 = vpop.eup %5070  ;;  %v5861_v51 = vadd.f32 1.0, %v5069_v16  ;;  %v484_v23 = vsub.f32 0.0, %v5840_v35  ;;  %v5865_v13 = vadd.f32 %v5403_v33, %v452_v62  ;;  %v5868_v18 = vmul.f32 %v687_v42, %v5548_v17  ;;  %vm5881_vm8 = vmor %vm903_vm4, %vm904_vm7 }
  0xe0   : > { %v691_v30 = vmul.f32 %v5832_v52, %v690_v20  ;;  %v699_v31 = vand.u32 2147483648, %v5759_v21  ;;  %v913_v9 = vmul.f32 %v5858_v22, %v5803_v44  ;;  %v902_v5 = vadd.f32 %v5812_v15, %v901_v56 }
  0xe1   : > { %9463 = vst [vmem:[#allocation15_spill] sm:$0xff] %v5868_v18  ;;  %vm694_vm9 = vweird.f32 %v5832_v52  ;;  %v1147_v34 = vmax.f32 %v5631_v63, %v5836_v7  ;;  %5074 = vrcp.f32 %v5861_v51  ;;  %vm917_vm10 = vweird.f32 %v5803_v44  ;;  %v455_v45 = vpop.f32.mrf.mxu2 }
  0xe2   : > { %v692_v37 = vadd.f32 %v5832_v52, %v691_v30  ;;  %v914_v38 = vsub.f32 1.0, %v913_v9  ;;  %v524_v26 = vmul.f32 1.442695, %v484_v23  ;;  %v921_v48 = vand.u32 2147483647, %v5803_v44  ;;  %vm5897_vm11 = vmor %vm693_vm5, %vm694_vm9 }
  0xe3   : > { %v5073_v46 = vpop.eup %5072  ;;  %v923_v50 = vand.u32 2147483648, %v5803_v44  ;;  %v500_v4 = vsub.f32 0.0, %v5865_v13  ;;  %v5891_v41 = vadd.f32 %v5403_v33, %v407_v25  ;;  %v1178_v19 = vmax.f32 %v5797_v43, %v5868_v18 }
  0xe4   : > { %v915_v28 = vmul.f32 %v5858_v22, %v914_v38  ;;  %vm918_vm12 = vweird.f32 %v5858_v22  ;;  %v5903_v58 = vadd.f32 1.0, %v5073_v46  ;;  %v906_v60 = vsel %vm5881_vm8, %v5812_v15, %v902_v5 }
  0xe5   : > { %v696_v2 = vsel %vm5897_vm11, %v5832_v52, %v692_v37  ;;  %5076 = vpow2.f32 %v524_v26  ;;  %v556_v21 = vmul.f32 1.442695, %v500_v4  ;;  %v700_v62 = vor.u32 1.1754944e-38, %v699_v31  ;;  %vm5920_vm14 = vmor %vm917_vm10, %vm918_vm12  ;;  %v410_v31 = vpop.f32.mrf.mxu0 }
  0xe6   : > { %v916_v8 = vadd.f32 %v5858_v22, %v915_v28  ;;  %v713_v39 = vand.u32 2147483648, %v5861_v51  ;;  %5078 = vrcp.f32 %v5903_v58  ;;  %v5916_v16 = vmax.f32 %v5730_v1, %v5848_v59 }
  0xe7   : > { %v5075_v42 = vpop.eup %5074  ;;  %vm698_vm13 = vcmp.eq.f32.partialorder %v697_v40, 8.507059e+37  ;;  %5080 = vpow2.f32 %v556_v21  ;;  %v485_v52 = vsub.f32 0.0, %v5891_v41  ;;  %v5927_v56 = vmax.f32 %v5762_v61, %v5868_v18 }
  0xe8   : > { %9468 = vst [vmem:[#allocation16_spill] sm:$0xff] %v5916_v16  ;;  %v911_v20 = vsel %vm5852_vm6, %v910_v49, %v906_v60  ;;  %v701_v23 = vsel %vm698_vm13, %v700_v62, %v696_v2  ;;  %v703_v25 = vmul.f32 %v5075_v42, %v5861_v51  ;;  %v5932_v40 = vrot.slane %v1178_v19, 6 }
  0xe9   : > { %vm5934_vm15 = vcmp.eq.f32.partialorder %v921_v48, 8.507059e+37  ;;  %v924_v30 = vor.u32 1.1754944e-38, %v923_v50  ;;  %vm707_vm2 = vweird.f32 %v5861_v51  ;;  %v920_v9 = vsel %vm5920_vm14, %v5858_v22, %v916_v8 }
  0xea   : > { %v704_v5 = vsub.f32 1.0, %v703_v25  ;;  %v711_v10 = vand.u32 2147483647, %v5861_v51  ;;  %v714_v49 = vor.u32 1.1754944e-38, %v713_v39  ;;  %v5944_v37 = vmul.f32 %v911_v20, %v5615_v36  ;;  %v458_v39 = vpop.f32.mrf.mxu2 }
  0xeb   : > { %v5077_v17 = vpop.eup %5076  ;;  %v5947_v38 = vmul.f32 %v701_v23, %v5622_v57  ;;  %v526_v26 = vmul.f32 1.442695, %v485_v52  ;;  %v5950_v46 = vadd.f32 %v5403_v33, %v455_v45  ;;  %vm708_vm3 = vweird.f32 %v5075_v42 }
  0xec   : > { %9473 = vst [vmem:[#allocation17_spill] sm:$0xff] %v5944_v37  ;;  %v5952_v48 = vpop.eup %5078  ;;  %v705_v50 = vmul.f32 %v5075_v42, %v704_v5  ;;  %v5954_v22 = vadd.f32 1.0, %v5077_v17  ;;  %v5957_v4 = vadd.f32 %v5403_v33, %v410_v31  ;;  %v925_v36 = vsel %vm5934_vm15, %v924_v30, %v920_v9  ;;  %vm709_vm4 = vmor %vm707_vm2, %vm708_vm3 }
  0xed   : > { %9474 = vst [vmem:[#allocation18_spill] sm:$0xff] %v5947_v38  ;;  %v5081_v19 = vpop.eup %5080  ;;  %v927_v57 = vmul.f32 %v5952_v48, %v5903_v58  ;;  %5082 = vpow2.f32 %v526_v26  ;;  %v501_v55 = vsub.f32 0.0, %v5950_v46  ;;  %v935_v60 = vand.u32 2147483647, %v5903_v58  ;;  %v413_v9 = vpop.f32.mrf.mxu0 }
  0xee   : > { %v706_v28 = vadd.f32 %v5075_v42, %v705_v50  ;;  %v937_v2 = vand.u32 2147483648, %v5903_v58  ;;  %5084 = vrcp.f32 %v5954_v22  ;;  %v5969_v21 = vmax.f32 %v5768_v12, %v5947_v38 }
  0xef   : > { %v5975_v45 = vmax.f32 %v1147_v34, %v5947_v38  ;;  %v928_v62 = vsub.f32 1.0, %v927_v57  ;;  %v5979_v8 = vadd.f32 1.0, %v5081_v19  ;;  %v5982_v15 = vmul.f32 %v925_v36, %v5685_v24 }
  0xf0   : > { %v710_v52 = vsel %vm709_vm4, %v5075_v42, %v706_v28  ;;  %v558_v20 = vmul.f32 1.442695, %v501_v55  ;;  %v486_v23 = vsub.f32 0.0, %v5957_v4  ;;  %vm712_vm5 = vcmp.eq.f32.partialorder %v711_v10, 8.507059e+37 }
  0xf1   : > { %9475 = vst [vmem:[#allocation19_spill] sm:$0xff] %v5982_v15  ;;  %v1148_v25 = vmax.f32 %v5639_v6, %v5927_v56  ;;  %v929_v34 = vmul.f32 %v5952_v48, %v928_v62  ;;  %5086 = vrcp.f32 %v5979_v8  ;;  %v5991_v51 = vmax.f32 %v5785_v27, %v5944_v37 }
  0xf2   : > { %v715_v44 = vsel %vm712_vm5, %v714_v49, %v710_v52  ;;  %vm931_vm6 = vweird.f32 %v5903_v58  ;;  %v5995_v24 = vadd.f32 %v5403_v33, %v458_v39  ;;  %vm932_vm7 = vweird.f32 %v5952_v48 }
  0xf3   : > { %v5083_v42 = vpop.eup %5082  ;;  %vm5998_vm9 = vcmp.eq.f32.partialorder %v935_v60, 8.507059e+37  ;;  %5088 = vpow2.f32 %v558_v20  ;;  %v528_v31 = vmul.f32 1.442695, %v486_v23  ;;  %v6005_v49 = vmax.f32 %v5848_v59, %v5982_v15  ;;  %vm6018_vm8 = vmor %vm931_vm6, %vm932_vm7 }
  0xf4   : > { %v5085_v5 = vpop.eup %5084  ;;  %v938_v17 = vor.u32 1.1754944e-38, %v937_v2  ;;  %v6010_v50 = vmul.f32 %v715_v44, %v5727_v53  ;;  %v930_v19 = vadd.f32 %v5952_v48, %v929_v34  ;;  %v6014_v57 = vadd.f32 1.0, %v5083_v42 }
  0xf5   : > { %v717_v36 = vmul.f32 %v5085_v5, %v5954_v22  ;;  %v725_v28 = vand.u32 2147483647, %v5954_v22  ;;  %5090 = vpow2.f32 %v528_v31  ;;  %v502_v60 = vsub.f32 0.0, %v5995_v24 }
  0xf6   : > { %9478 = vst [vmem:[#allocation20_spill] sm:$0xff] %v6010_v50  ;;  %v6025_v53 = vadd.f32 %v5403_v33, %v413_v9  ;;  %v727_v39 = vand.u32 2147483648, %v5954_v22  ;;  %v949_v52 = vand.u32 2147483647, %v5979_v8  ;;  %5092 = vrcp.f32 %v6014_v57 }
  0xf7   : > { %v5087_v2 = vpop.eup %5086  ;;  %v718_v62 = vsub.f32 1.0, %v717_v36  ;;  %vm1237_vm10 = vcmask 1041408   ;;  %vm721_vm11 = vweird.f32 %v5954_v22  ;;  %vm945_vm12 = vweird.f32 %v5979_v8 }
  0xf8   : > { %v941_v58 = vmul.f32 %v5087_v2, %v5979_v8  ;;  %v951_v20 = vand.u32 2147483648, %v5979_v8  ;;  %v6035_v33 = vmax.f32 %v1148_v25, %v6010_v50  ;;  %v934_v34 = vsel %vm6018_vm8, %v5952_v48, %v930_v19 }
  0xf9   : > { %v5089_v23 = vpop.eup %5088  ;;  %v719_v44 = vmul.f32 %v5085_v5, %v718_v62  ;;  %vm722_vm13 = vweird.f32 %v5085_v5  ;;  %vm946_vm14 = vweird.f32 %v5087_v2  ;;  %v560_v9 = vmul.f32 1.442695, %v502_v60 }
  0xfa   : > { %v942_v42 = vsub.f32 1.0, %v941_v58  ;;  %v6040_v31 = vadd.f32 1.0, %v5089_v23  ;;  %vm726_vm15 = vcmp.eq.f32.partialorder %v725_v28, 8.507059e+37  ;;  %v728_v10 = vor.u32 1.1754944e-38, %v727_v39  ;;  %vm723_vm3 = vmor %vm721_vm11, %vm722_vm13 }
  0xfb   : > { %v720_v36 = vadd.f32 %v5085_v5, %v719_v44  ;;  %vm6042_vm2 = vcmp.eq.f32.partialorder %v949_v52, 8.507059e+37  ;;  %v5091_v25 = vpop.eup %5090  ;;  %v939_v12 = vsel %vm5998_vm9, %v938_v17, %v934_v34  ;;  %v952_v19 = vor.u32 1.1754944e-38, %v951_v20  ;;  %vm6055_vm4 = vmor %vm945_vm12, %vm946_vm14 }
  0xfc   : > { %v943_v48 = vmul.f32 %v5087_v2, %v942_v42  ;;  %5094 = vrcp.f32 %v6040_v31  ;;  %v5093_v55 = vpop.eup %5092  ;;  %v9252_v60 = vrot.slane %v6035_v33, 6  ;;  %v6059_v30 = vadd.f32 1.0, %v5091_v25 }
  0xfd   : > { %v724_v28 = vsel %vm723_vm3, %v5085_v5, %v720_v36  ;;  %5096 = vpow2.f32 %v560_v9  ;;  %v731_v39 = vmul.f32 %v5093_v55, %v6014_v57  ;;  %v487_v52 = vsub.f32 0.0, %v6025_v53 }
  0xfe   : > { %v729_v22 = vsel %vm726_vm15, %v728_v10, %v724_v28  ;;  %v944_v17 = vadd.f32 %v5087_v2, %v943_v48  ;;  %v6064_v58 = vmul.f32 %v939_v12, %v5778_v3  ;;  %v1165_v5 = vmax.f32 %v5782_v32, %v6005_v49 }
  0xff   : > { %v741_v8 = vand.u32 2147483648, %v6014_v57  ;;  %5098 = vrcp.f32 %v6059_v30  ;;  %v6072_v20 = vmax.f32 %v5868_v18, %v6010_v50  ;;  %v6075_v10 = vmul.f32 %v729_v22, %v5840_v35 }
 0x100   : > { %9485 = vst [vmem:[#allocation21_spill] sm:$0xff] %v6064_v58  ;;  %v948_v23 = vsel %vm6055_vm4, %v5087_v2, %v944_v17  ;;  %v732_v34 = vsub.f32 1.0, %v731_v39  ;;  %v6082_v12 = vsel %vm1237_vm10, %v9252_v60, -inf  ;;  %vm735_vm5 = vweird.f32 %v6014_v57 }
 0x101   : > { %9486 = vst [vmem:[#allocation22_spill] sm:$0xff] %v6075_v10  ;;  %v953_v3 = vsel %vm6042_vm2, %v952_v19, %v948_v23  ;;  %v739_v44 = vand.u32 2147483647, %v6014_v57  ;;  %vm736_vm6 = vweird.f32 %v5093_v55  ;;  %v530_v2 = vmul.f32 1.442695, %v487_v52 }
 0x102   : > { %v5095_v42 = vpop.eup %5094  ;;  %v6089_v35 = vmul.f32 %v953_v3, %v5865_v13  ;;  %v733_v9 = vmul.f32 %v5093_v55, %v732_v34  ;;  %v6093_v25 = vmax.f32 %v5944_v37, %v6064_v58  ;;  %v742_v48 = vor.u32 1.1754944e-38, %v741_v8  ;;  %vm737_vm9 = vmor %vm735_vm5, %vm736_vm6 }
 0x103   : > { %v5097_v36 = vpop.eup %5096  ;;  %v955_v26 = vmul.f32 %v5095_v42, %v6040_v31  ;;  %vm959_vm7 = vweird.f32 %v6040_v31  ;;  %v9488_v19 = vmax.f32 %v5662_v14, %v5969_v21  ;;  %v963_v62 = vand.u32 2147483647, %v6040_v31 }
 0x104   : > { %9487 = vst [vmem:[#allocation23_spill] sm:$0xff] %v6089_v35  ;;  %v734_v13 = vadd.f32 %v5093_v55, %v733_v9  ;;  %v965_v22 = vand.u32 2147483648, %v6040_v31  ;;  %vm960_vm8 = vweird.f32 %v5095_v42  ;;  %v6107_v52 = vadd.f32 1.0, %v5097_v36 }
 0x105   : > { %v6101_v28 = vmax.f32 %v9488_v19, %v6075_v10  ;;  %v5099_v17 = vpop.eup %5098  ;;  %v956_v39 = vsub.f32 1.0, %v955_v26  ;;  %5100 = vpow2.f32 %v530_v2  ;;  %v6110_v8 = vmax.f32 %v1165_v5, %v6089_v35  ;;  %vm6122_vm12 = vmor %vm959_vm7, %vm960_vm8 }
 0x106   : > { %v738_v14 = vsel %vm737_vm9, %v5093_v55, %v734_v13  ;;  %vm740_vm11 = vcmp.eq.f32.partialorder %v739_v44, 8.507059e+37  ;;  %v745_v23 = vmul.f32 %v5099_v17, %v6059_v30  ;;  %v1150_v3 = vmax.f32 %v5797_v43, %v6072_v20 }
 0x107   : > { %9489 = vst [vmem:[#allocation24_spill] sm:$0xff] %v6110_v8  ;;  %v743_v34 = vsel %vm740_vm11, %v742_v48, %v738_v14  ;;  %v957_v9 = vmul.f32 %v5095_v42, %v956_v39  ;;  %5102 = vrcp.f32 %v6107_v52  ;;  %v966_v55 = vor.u32 1.1754944e-38, %v965_v22 }
 0x108   : > { %v6118_v36 = vmul.f32 %v743_v34, %v5891_v41  ;;  %v746_v44 = vsub.f32 1.0, %v745_v23  ;;  %v9251_v2 = vrot.slane %v6101_v28, 6  ;;  %vm964_vm13 = vcmp.eq.f32.partialorder %v963_v62, 8.507059e+37 }
 0x109   : > { %v958_v48 = vadd.f32 %v5095_v42, %v957_v9  ;;  %v755_v43 = vand.u32 2147483648, %v6059_v30  ;;  %v9250_v26 = vrot.slane %v6110_v8, 6  ;;  %v1166_v41 = vmax.f32 %v5816_v29, %v6093_v25 }
 0x10a   : > { %9490 = vst [vmem:[#allocation25_spill] sm:$0xff] %v6118_v36  ;;  %v6130_v19 = vmax.f32 %v1150_v3, %v6118_v36  ;;  %v747_v31 = vmul.f32 %v5099_v17, %v746_v44  ;;  %vm749_vm14 = vweird.f32 %v6059_v30  ;;  %vm750_vm15 = vweird.f32 %v5099_v17 }
 0x10b   : > { %v5101_v13 = vpop.eup %5100  ;;  %v962_v22 = vsel %vm6122_vm12, %v5095_v42, %v958_v48  ;;  %v753_v62 = vand.u32 2147483647, %v6059_v30  ;;  %v6140_v39 = vmax.f32 %v5947_v38, %v6075_v10  ;;  %v6147_v9 = vsel %vm1237_vm10, -inf, %v9251_v2  ;;  %vm6162_vm2 = vmor %vm749_vm14, %vm750_vm15  ;;  %v461_v48 = vpop.f32.mrf.mxu2 }
 0x10c   : > { %v967_v14 = vsel %vm964_vm13, %v966_v55, %v962_v22  ;;  %v748_v23 = vadd.f32 %v5099_v17, %v747_v31  ;;  %v6142_v34 = vadd.f32 1.0, %v5101_v13  ;;  %v6151_v42 = vmax.f32 %v5982_v15, %v6089_v35 }
 0x10d   : > { %v5103_v3 = vpop.eup %5102  ;;  %v9254_v30 = vrot.slane %v6130_v19, 6  ;;  %v756_v5 = vor.u32 1.1754944e-38, %v755_v43  ;;  %v6157_v55 = vsel %vm1237_vm10, -inf, %v9250_v26  ;;  %v6160_v44 = vmul.f32 %v967_v14, %v5950_v46 }
 0x10e   : > { %9493 = vst [vmem:[#allocation26_spill] sm:$0xff] %v6151_v42  ;;  %v969_v31 = vmul.f32 %v5103_v3, %v6107_v52  ;;  %vm973_vm3 = vweird.f32 %v6107_v52  ;;  %v752_v13 = vsel %vm6162_vm2, %v5099_v17, %v748_v23  ;;  %v977_v43 = vand.u32 2147483647, %v6107_v52 }
 0x10f   : > { %9494 = vst [vmem:[#allocation27_spill] sm:$0xff] %v6157_v55  ;;  %v979_v22 = vand.u32 2147483648, %v6107_v52  ;;  %v6175_v46 = vsel %vm1237_vm10, %v5842_v54, %v5932_v40  ;;  %vm974_vm4 = vweird.f32 %v5103_v3  ;;  %5104 = vrcp.f32 %v6142_v34 }
 0x110   : > { %9495 = vst [vmem:[#allocation28_spill] sm:$0xff] %v6160_v44  ;;  %v970_v14 = vsub.f32 1.0, %v969_v31  ;;  %v1350_v26 = vsel %vm1237_vm10, %v5932_v40, -inf  ;;  %v6183_v17 = vsel %vm1237_vm10, %v9254_v30, -inf  ;;  %vm754_vm5 = vcmp.eq.f32.partialorder %v753_v62, 8.507059e+37  ;;  %vm6200_vm7 = vmor %vm973_vm3, %vm974_vm4  ;;  %v416_v62 = vpop.f32.mrf.mxu0 }
 0x111   : > { %v1151_v23 = vmax.f32 %v5836_v7, %v6140_v39  ;;  %vm1398_vm6 = vcmask 1046528   ;;  %v6188_v2 = vmax.f32 %v1166_v41, %v6160_v44  ;;  %v757_v31 = vsel %vm754_vm5, %v756_v5, %v752_v13  ;;  %v6230_v7 = vld [vmem:[%s9245_s2] ss:$0 sm:$0xff] }
 0x112   : > { %v971_v57 = vmul.f32 %v5103_v3, %v970_v14  ;;  %v1400_v60 = vrot.slane %v6175_v46, 1  ;;  %v6195_v30 = vmax.f32 %v6010_v50, %v6118_v36  ;;  %v1402_v41 = vrot.slane %v1350_v26, 1 }
 0x113   : > { %9498 = vst [vmem:[#allocation29_spill] sm:$0xff] %v6188_v2  ;;  %vm6204_vm9 = vcmp.eq.f32.partialorder %v977_v43, 8.507059e+37  ;;  %v980_v14 = vor.u32 1.1754944e-38, %v979_v22  ;;  %v1167_v38 = vmax.f32 %v5916_v16, %v6151_v42  ;;  %v6212_v50 = vmul.f32 %v757_v31, %v5957_v4 }
 0x114   : > { %9499 = vst [vmem:[#allocation30_spill] sm:$0xff] %v6195_v30  ;;  %v972_v5 = vadd.f32 %v5103_v3, %v971_v57  ;;  %v1403_v52 = vsel %vm1398_vm6, %v1400_v60, %v1402_v41  ;;  %v1529_v18 = vmax.f32 %v1350_v26, %v1402_v41  ;;  %vm763_vm8 = vweird.f32 %v6142_v34 }
 0x115   : > { %9504 = vst [vmem:[#allocation31_spill] sm:$0xff] %v6212_v50  ;;  %v5105_v61 = vpop.eup %5104  ;;  %v1528_v43 = vmax.f32 %v6175_v46, %v1403_v52  ;;  %v767_v40 = vand.u32 2147483647, %v6142_v34  ;;  %vm1623_vm11 = vcmask 1045504   ;;  %v1769_v4 = vrot.slane %v6175_v46, 4 }
 0x116   : > { %v976_v57 = vsel %vm6200_vm7, %v5103_v3, %v972_v5  ;;  %v759_v22 = vmul.f32 %v5105_v61, %v6142_v34  ;;  %v1627_v63 = vrot.slane %v1529_v18, 2  ;;  %v1771_v47 = vrot.slane %v1350_v26, 4 }
 0x117   : > { %v981_v31 = vsel %vm6204_vm9, %v980_v14, %v976_v57  ;;  %v1625_v41 = vrot.slane %v1528_v43, 2  ;;  %v1334_v3 = vsel %vm1237_vm10, -inf, %v5842_v54  ;;  %v6233_v5 = vadd.f32 %v6230_v7, %v461_v48 }
 0x118   : > { %v760_v6 = vsub.f32 1.0, %v759_v22  ;;  %v6236_v46 = vadd.f32 %v6230_v7, %v416_v62  ;;  %vm764_vm12 = vweird.f32 %v5105_v61  ;;  %v769_v13 = vand.u32 2147483648, %v6142_v34  ;;  %v464_v22 = vpop.f32.mrf.mxu2  ;;  %v419_v27 = vpop.f32.mrf.mxu0 }
 0x119   : > { %v1628_v18 = vsel %vm1623_vm11, %v1625_v41, %v1627_v63  ;;  %v1399_v26 = vrot.slane %v1334_v3, 1  ;;  %v6241_v14 = vmul.f32 %v981_v31, %v5995_v24  ;;  %v503_v57 = vsub.f32 0.0, %v6233_v5  ;;  %vm765_vm14 = vmor %vm763_vm8, %vm764_vm12 }
 0x11a   : > { %v761_v54 = vmul.f32 %v5105_v61, %v760_v6  ;;  %v1737_v52 = vmax.f32 %v1528_v43, %v1628_v18  ;;  %v6245_v48 = vmax.f32 %v1151_v23, %v6212_v50  ;;  %v1772_v62 = vsel %vm359_vm0, %v1769_v4, %v1771_v47 }
 0x11b   : > { %9505 = vst [vmem:[#allocation32_spill] sm:$0xff] %v6241_v14  ;;  %v1401_v37 = vsel %vm1398_vm6, %v1399_v26, %v1400_v60  ;;  %v488_v29 = vsub.f32 0.0, %v6236_v46  ;;  %vm768_vm13 = vcmp.eq.f32.partialorder %v767_v40, 8.507059e+37  ;;  %v770_v6 = vor.u32 1.1754944e-38, %v769_v13 }
 0x11c   : > { %9506 = vst [vmem:[#allocation33_spill] sm:$0xff] %v6245_v48  ;;  %v762_v63 = vadd.f32 %v5105_v61, %v761_v54  ;;  %v6250_v11 = vmax.f32 %v1737_v52, %v1772_v62  ;;  %v1527_v24 = vmax.f32 %v1334_v3, %v1401_v37  ;;  %v562_v43 = vmul.f32 1.442695, %v503_v57 }
 0x11d   : > { %v532_v23 = vmul.f32 1.442695, %v488_v29  ;;  %v6256_v31 = vadd.f32 %v6230_v7, %v464_v22  ;;  %v6259_v47 = vmax.f32 %v1167_v38, %v6241_v14  ;;  %v6264_v37 = vadd.f32 %v6230_v7, %v419_v27 }
 0x11e   : > { %9507 = vst [vmem:[#allocation34_spill] sm:$0xff] %v6250_v11  ;;  %v766_v60 = vsel %vm765_vm14, %v5105_v61, %v762_v63  ;;  %1946 = vrot.lane.b32.xlu0 %v6250_v11, %s5280_s30  ;;  %v1624_v40 = vrot.slane %v1527_v24, 2  ;;  %5106 = vpow2.f32 %v562_v43  ;;  %v9509_v29 = vrot.slane %v6035_v33, 6 }
 0x11f   : > { %9508 = vst [vmem:[#allocation35_spill] sm:$0xff] %v6259_v47  ;;  %v771_v34 = vsel %vm768_vm13, %v770_v6, %v766_v60  ;;  %v504_v13 = vsub.f32 0.0, %v6256_v31  ;;  %v9510_v18 = vrot.slane %v5975_v45, 6  ;;  %v1768_v26 = vrot.slane %v1334_v3, 4 }
 0x120   : > { %v1626_v61 = vsel %vm1623_vm11, %v1624_v40, %v1625_v41  ;;  %5108 = vpow2.f32 %v532_v23  ;;  %v489_v54 = vsub.f32 0.0, %v6264_v37  ;;  %v9512_v33 = vrot.slane %v6188_v2, 6 }
 0x121   : > { %v6272_v38 = vsel %vm1237_vm10, %v9510_v18, %v9509_v29  ;;  %v1736_v52 = vmax.f32 %v1527_v24, %v1626_v61  ;;  %v564_v27 = vmul.f32 1.442695, %v504_v13  ;;  %v9511_v57 = vmov %v9510_v18 }
 0x122   : > { %v1335_v22 = vsel %vm1237_vm10, -inf, %v9511_v57  ;;  %v1405_v62 = vrot.slane %v6272_v38, 1  ;;  %v6283_v63 = vsel %vm1237_vm10, %v9512_v33, -inf  ;;  %v6286_v6 = vmul.f32 %v771_v34, %v6025_v53 }
 0x123   : > { %v1152_v41 = vmax.f32 %v5927_v56, %v6195_v30  ;;  %v1770_v3 = vsel %vm359_vm0, %v1768_v26, %v1769_v4  ;;  %5110 = vpow2.f32 %v564_v27  ;;  %v534_v45 = vmul.f32 1.442695, %v489_v54  ;;  %v467_v56 = vpop.f32.mrf.mxu2 }
 0x124   : > { %9513 = vst [vmem:[#allocation36_spill] sm:$0xff] %v6286_v6  ;;  %v6291_v24 = vmax.f32 %v1736_v52, %v1770_v3  ;;  %v1404_v43 = vrot.slane %v1335_v22, 1  ;;  %v6295_v23 = vmax.f32 %v6064_v58, %v6160_v44  ;;  %v9268_v60 = vrot.slane %v6245_v48, 6  ;;  %v5107_v13 = vpop.eup %5106 }
 0x125   : > { %v9269_v40 = vrot.slane %v6259_v47, 6  ;;  %v9515_v53 = vrot.slane %v6082_v12, 1  ;;  %v9516_v4 = vrot.slane %v6183_v17, 1  ;;  %5112 = vpow2.f32 %v534_v45 }
 0x126   : > { %9514 = vst [vmem:[#allocation37_spill] sm:$0xff] %v6291_v24  ;;  %1944 = vrot.lane.b32.xlu1 %v6291_v24, %s5280_s30  ;;  %v1406_v18 = vsel %vm1398_vm6, %v1404_v43, %v1405_v62  ;;  %v5109_v26 = vpop.eup %5108  ;;  %v6316_v52 = vmax.f32 %v6075_v10, %v6212_v50  ;;  %v6319_v27 = vmax.f32 %v1152_v41, %v6286_v6  ;;  %v599_v57 = vadd.f32 1.0, %v5107_v13 }
 0x127   : > { %v1408_v34 = vsel %vm1398_vm6, %v1405_v62, %v9515_v53  ;;  %v6305_v29 = vmax.f32 %v6183_v17, %v9516_v4  ;;  %v6321_v33 = vadd.f32 1.0, %v5109_v26  ;;  %v1530_v3 = vmax.f32 %v1335_v22, %v1406_v18 }
 0x128   : > { %v6311_v61 = vmax.f32 %v6272_v38, %v1408_v34  ;;  %v6325_v62 = vadd.f32 %v6230_v7, %v467_v56  ;;  %v6330_v43 = vsel %vm1237_vm10, -inf, %v9268_v60  ;;  %v6334_v53 = vmax.f32 %v6089_v35, %v6241_v14  ;;  %v422_v34 = vpop.f32.mrf.mxu0 }
 0x129   : > { %9517 = vst [vmem:[#allocation38_spill] sm:$0xff] %v6305_v29  ;;  %v6339_v41 = vsel %vm1237_vm10, -inf, %v9269_v40  ;;  %5114 = vrcp.f32 %v599_v57  ;;  %v5111_v13 = vpop.eup %5110  ;;  %v6343_v56 = vmax.f32 %v6118_v36, %v6286_v6  ;;  %v1773_v18 = vrot.slane %v1335_v22, 4 }
 0x12a   : > { %9518 = vst [vmem:[#allocation39_spill] sm:$0xff] %v6339_v41  ;;  %5116 = vrcp.f32 %v6321_v33  ;;  %v1630_v4 = vrot.slane %v6311_v61, 2  ;;  %v991_v60 = vand.u32 2147483647, %v599_v57  ;;  %v6350_v40 = vadd.f32 1.0, %v5111_v13 }
 0x12b   : > { %v5113_v45 = vpop.eup %5112  ;;  %v1629_v35 = vrot.slane %v1530_v3, 2  ;;  %v9519_v10 = vrot.slane %v6272_v38, 4  ;;  %v505_v47 = vsub.f32 0.0, %v6325_v62  ;;  %v6357_v48 = vadd.f32 %v6230_v7, %v422_v34 }
 0x12c   : > { %v993_v22 = vand.u32 2147483648, %v599_v57  ;;  %v781_v26 = vand.u32 2147483647, %v6321_v33  ;;  %v783_v58 = vand.u32 2147483648, %v6321_v33  ;;  %5118 = vrcp.f32 %v6350_v40 }
 0x12d   : > { %v1775_v36 = vsel %vm359_vm0, %v1773_v18, %v9519_v10  ;;  %vm987_vm15 = vweird.f32 %v599_v57  ;;  %v6362_v13 = vadd.f32 1.0, %v5113_v45  ;;  %v1631_v54 = vsel %vm1623_vm11, %v1629_v35, %v1630_v4 }
 0x12e   : > { %v566_v29 = vmul.f32 1.442695, %v505_v47  ;;  %vm6365_vm2 = vcmp.eq.f32.partialorder %v991_v60, 8.507059e+37  ;;  %vm777_vm3 = vweird.f32 %v6321_v33  ;;  %v1738_v34 = vmax.f32 %v1530_v3, %v1631_v54 }
 0x12f   : > { %v5115_v55 = vpop.eup %5114  ;;  %v490_v18 = vsub.f32 0.0, %v6357_v48  ;;  %v9522_v15 = vrot.slane %v6082_v12, 1  ;;  %v1005_v8 = vand.u32 2147483647, %v6350_v40  ;;  %v1007_v35 = vand.u32 2147483648, %v6350_v40 }
 0x130   : > { %v5117_v1 = vpop.eup %5116  ;;  %v983_v45 = vmul.f32 %v5115_v55, %v599_v57  ;;  %5120 = vrcp.f32 %v6362_v13  ;;  %v994_v47 = vor.u32 1.1754944e-38, %v993_v22  ;;  %vm6378_vm4 = vcmp.eq.f32.partialorder %v781_v26, 8.507059e+37  ;;  %v425_v26 = vpop.f32.mrf.mxu0 }
 0x131   : > { %v1532_v59 = vmax.f32 %v6082_v12, %v9522_v15  ;;  %v773_v60 = vmul.f32 %v5117_v1, %v6321_v33  ;;  %v784_v54 = vor.u32 1.1754944e-38, %v783_v58  ;;  %vm988_vm5 = vweird.f32 %v5115_v55 }
 0x132   : > { %v984_v3 = vsub.f32 1.0, %v983_v45  ;;  %v6382_v16 = vmax.f32 %v1738_v34, %v1775_v36  ;;  %5122 = vpow2.f32 %v566_v29  ;;  %v5119_v15 = vpop.eup %5118  ;;  %vm1001_vm7 = vweird.f32 %v6350_v40  ;;  %vm6393_vm8 = vmor %vm987_vm15, %vm988_vm5 }
 0x133   : > { %v774_v32 = vsub.f32 1.0, %v773_v60  ;;  %v536_v30 = vmul.f32 1.442695, %v490_v18  ;;  %v1632_v42 = vrot.slane %v1532_v59, 2  ;;  %v997_v22 = vmul.f32 %v5119_v15, %v6350_v40 }
 0x134   : > { %v985_v11 = vmul.f32 %v5115_v55, %v984_v3  ;;  %vm6386_vm9 = vcmp.eq.f32.partialorder %v1005_v8, 8.507059e+37  ;;  %v1008_v0 = vor.u32 1.1754944e-38, %v1007_v35  ;;  %1948 = vrot.lane.b32.xlu0 %v6382_v16, %s5280_s30  ;;  %vm778_vm12 = vweird.f32 %v5117_v1 }
 0x135   : > { %v775_v36 = vmul.f32 %v5117_v1, %v774_v32  ;;  %vm1002_vm13 = vweird.f32 %v5119_v15  ;;  %v1633_v59 = vsel %vm1623_vm11, %v1630_v4, %v1632_v42  ;;  %v998_v8 = vsub.f32 1.0, %v997_v22  ;;  %vm779_vm14 = vmor %vm777_vm3, %vm778_vm12 }
 0x136   : > { %v5121_v29 = vpop.eup %5120  ;;  %v986_v34 = vadd.f32 %v5115_v55, %v985_v11  ;;  %v1739_v18 = vmax.f32 %v6311_v61, %v1633_v59  ;;  %v1776_v45 = vrot.slane %v6082_v12, 4  ;;  %v795_v57 = vand.u32 2147483647, %v6362_v13  ;;  %vm6415_vm15 = vmor %vm1001_vm7, %vm1002_vm13 }
 0x137   : > { %v776_v35 = vadd.f32 %v5117_v1, %v775_v36  ;;  %v787_v60 = vmul.f32 %v5121_v29, %v6362_v13  ;;  %5124 = vpow2.f32 %v536_v30  ;;  %v999_v42 = vmul.f32 %v5119_v15, %v998_v8 }
 0x138   : > { %v5123_v3 = vpop.eup %5122  ;;  %v990_v32 = vsel %vm6393_vm8, %v5115_v55, %v986_v34  ;;  %v797_v11 = vand.u32 2147483648, %v6362_v13  ;;  %v9529_v61 = vrot.slane %v6272_v38, 4  ;;  %v1168_v2 = vmax.f32 %v5991_v51, %v6295_v23 }
 0x139   : > { %v995_v4 = vsel %vm6365_vm2, %v994_v47, %v990_v32  ;;  %v780_v22 = vsel %vm779_vm14, %v5117_v1, %v776_v35  ;;  %v788_v55 = vsub.f32 1.0, %v787_v60  ;;  %v6419_v33 = vadd.f32 1.0, %v5123_v3 }
 0x13a   : > { %v1777_v12 = vsel %vm359_vm0, %v9529_v61, %v1776_v45  ;;  %v6422_v58 = vmul.f32 %v995_v4, %v6233_v5  ;;  %v785_v38 = vsel %vm6378_vm4, %v784_v54, %v780_v22  ;;  %v1000_v36 = vadd.f32 %v5119_v15, %v999_v42  ;;  %v470_v61 = vpop.f32.mrf.mxu2 }
 0x13b   : > { %v6426_v10 = vmax.f32 %v1739_v18, %v1777_v12  ;;  %v6429_v1 = vmul.f32 %v785_v38, %v6236_v46  ;;  %v789_v40 = vmul.f32 %v5121_v29, %v788_v55  ;;  %vm792_vm2 = vweird.f32 %v5121_v29 }
 0x13c   : > { %9532 = vst [vmem:[#allocation40_spill] sm:$0xff] %v6422_v58  ;;  %5126 = vrcp.f32 %v6419_v33  ;;  %v9534_v47 = vrot.slane %v6283_v63, 1  ;;  %v1004_v54 = vsel %vm6415_vm15, %v5119_v15, %v1000_v36  ;;  %v9535_v8 = vmax.f32 %v5969_v21, %v6316_v52 }
 0x13d   : > { %9533 = vst [vmem:[#allocation41_spill] sm:$0xff] %v6429_v1  ;;  %1950 = vrot.lane.b32.xlu0 %v6426_v10, %s5280_s30  ;;  %v5125_v46 = vpop.eup %5124  ;;  %v790_v45 = vadd.f32 %v5121_v29, %v789_v40  ;;  %vm791_vm3 = vweird.f32 %v6362_v13  ;;  %v9536_v35 = vrot.slane %v6319_v27, 6  ;;  %v6456_v15 = vmax.f32 %v1168_v2, %v6422_v58 }
 0x13e   : > { %v6435_v59 = vmax.f32 %v6283_v63, %v9534_v47  ;;  %v1185_v18 = vmax.f32 %v9535_v8, %v6429_v1  ;;  %v1009_v3 = vsel %vm6386_vm9, %v1008_v0, %v1004_v54  ;;  %vm793_vm4 = vmor %vm791_vm3, %vm792_vm2  ;;  %v798_v32 = vor.u32 1.1754944e-38, %v797_v11 }
 0x13f   : > { %v6453_v60 = vsel %vm1237_vm10, %v9536_v35, -inf  ;;  %9537 = vst [vmem:[#allocation42_spill] sm:$0xff] %v6456_v15  ;;  %v1169_v21 = vmax.f32 %v6005_v49, %v6334_v53  ;;  %v794_v42 = vsel %vm793_vm4, %v5121_v29, %v790_v45  ;;  %vm796_vm5 = vcmp.eq.f32.partialorder %v795_v57, 8.507059e+37 }
 0x140   : > { %v1154_v13 = vmax.f32 %v6072_v20, %v6343_v56  ;;  %v1250_v12 = vrot.slane %v1185_v18, 6  ;;  %v799_v4 = vsel %vm796_vm5, %v798_v32, %v794_v42  ;;  %v1019_v22 = vand.u32 2147483647, %v6419_v33 }
 0x141   : > { %v6466_v30 = vadd.f32 1.0, %v5125_v46  ;;  %v6471_v11 = vmax.f32 %v6160_v44, %v6422_v58  ;;  %v6474_v49 = vmul.f32 %v1009_v3, %v6256_v31  ;;  %v6477_v20 = vmul.f32 %v799_v4, %v6264_v37 }
 0x142   : > { %v5127_v0 = vpop.eup %5126  ;;  %v9297_v29 = vrot.slane %v6456_v15, 6  ;;  %v1021_v38 = vand.u32 2147483648, %v6419_v33  ;;  %v6483_v36 = vadd.f32 %v6230_v7, %v470_v61  ;;  %v6487_v40 = vmax.f32 %v6212_v50, %v6429_v1 }
 0x143   : > { %9538 = vst [vmem:[#allocation43_spill] sm:$0xff] %v6474_v49  ;;  %v1011_v57 = vmul.f32 %v5127_v0, %v6419_v33  ;;  %v1186_v47 = vmax.f32 %v1154_v13, %v6477_v20  ;;  %vm1015_vm7 = vweird.f32 %v6419_v33  ;;  %v6492_v31 = vadd.f32 %v6230_v7, %v425_v26 }
 0x144   : > { %9539 = vst [vmem:[#allocation44_spill] sm:$0xff] %v6477_v20  ;;  %v1338_v37 = vsel %vm1237_vm10, -inf, %v1250_v12  ;;  %vm6495_vm9 = vcmp.eq.f32.partialorder %v1019_v22, 8.507059e+37  ;;  %5128 = vrcp.f32 %v6466_v30  ;;  %v6501_v46 = vmax.f32 %v1169_v21, %v6474_v49 }
 0x145   : > { %v1012_v2 = vsub.f32 1.0, %v1011_v57  ;;  %v1251_v8 = vrot.slane %v1186_v47, 6  ;;  %vm1016_vm8 = vweird.f32 %v5127_v0  ;;  %v1170_v18 = vmax.f32 %v6093_v25, %v6471_v11 }
 0x146   : > { %9542 = vst [vmem:[#allocation45_spill] sm:$0xff] %v6501_v46  ;;  %v6508_v45 = vsel %vm1237_vm10, %v9297_v29, -inf  ;;  %v1022_v3 = vor.u32 1.1754944e-38, %v1021_v38  ;;  %v506_v32 = vsub.f32 0.0, %v6483_v36  ;;  %v1419_v42 = vrot.slane %v1338_v37, 1  ;;  %vm6515_vm12 = vmor %vm1015_vm7, %vm1016_vm8 }
 0x147   : > { %9543 = vst [vmem:[#allocation46_spill] sm:$0xff] %v6508_v45  ;;  %v1013_v35 = vmul.f32 %v5127_v0, %v1012_v2  ;;  %v1788_v13 = vrot.slane %v1338_v37, 4  ;;  %v1252_v61 = vsel %vm1237_vm10, %v1250_v12, %v1251_v8  ;;  %v1354_v21 = vsel %vm1237_vm10, %v1251_v8, -inf }
 0x148   : > { %v1420_v4 = vrot.slane %v1252_v61, 1  ;;  %v1422_v22 = vrot.slane %v1354_v21, 1  ;;  %v1789_v26 = vrot.slane %v1252_v61, 4  ;;  %v1791_v57 = vrot.slane %v1354_v21, 4 }
 0x149   : > { %v1014_v47 = vadd.f32 %v5127_v0, %v1013_v35  ;;  %v568_v2 = vmul.f32 1.442695, %v506_v32  ;;  %v491_v34 = vsub.f32 0.0, %v6492_v31  ;;  %vm805_vm14 = vweird.f32 %v6466_v30 }
 0x14a   : > { %v5129_v29 = vpop.eup %5128  ;;  %v1421_v12 = vsel %vm1398_vm6, %v1419_v42, %v1420_v4  ;;  %v1423_v8 = vsel %vm1398_vm6, %v1420_v4, %v1422_v22  ;;  %v1541_v5 = vmax.f32 %v1354_v21, %v1422_v22  ;;  %v1790_v55 = vsel %vm359_vm0, %v1788_v13, %v1789_v26 }
 0x14b   : > { %v1539_v44 = vmax.f32 %v1338_v37, %v1421_v12  ;;  %v1540_v33 = vmax.f32 %v1252_v61, %v1423_v8  ;;  %v1792_v50 = vsel %vm359_vm0, %v1789_v26, %v1791_v57  ;;  %v1018_v41 = vsel %vm6515_vm12, %v5127_v0, %v1014_v47 }
 0x14c   : > { %v1647_v38 = vrot.slane %v1541_v5, 2  ;;  %v1023_v35 = vsel %vm6495_vm9, %v1022_v3, %v1018_v41  ;;  %v801_v32 = vmul.f32 %v5129_v29, %v6466_v30  ;;  %v809_v42 = vand.u32 2147483647, %v6466_v30 }
 0x14d   : > { %v1644_v15 = vrot.slane %v1539_v44, 2  ;;  %v1645_v4 = vrot.slane %v1540_v33, 2  ;;  %v6532_v21 = vmul.f32 %v1023_v35, %v6325_v62  ;;  %5130 = vpow2.f32 %v568_v2 }
 0x14e   : > { %v802_v37 = vsub.f32 1.0, %v801_v32  ;;  %v811_v13 = vand.u32 2147483648, %v6466_v30  ;;  %v538_v61 = vmul.f32 1.442695, %v491_v34  ;;  %v9547_v0 = vrot.slane %v6130_v19, 6 }
 0x14f   : > { %9546 = vst [vmem:[#allocation47_spill] sm:$0xff] %v6532_v21  ;;  %v9548_v5 = vrot.slane %v6101_v28, 6  ;;  %v1646_v54 = vsel %vm1623_vm11, %v1644_v15, %v1645_v4  ;;  %v1648_v3 = vsel %vm1623_vm11, %v1645_v4, %v1647_v38  ;;  %v6545_v22 = vmax.f32 %v1170_v18, %v6532_v21 }
 0x150   : > { %vm806_vm13 = vweird.f32 %v5129_v29  ;;  %v1744_v62 = vmax.f32 %v1539_v44, %v1646_v54  ;;  %v1745_v26 = vmax.f32 %v1540_v33, %v1648_v3  ;;  %v803_v57 = vmul.f32 %v5129_v29, %v802_v37 }
 0x151   : > { %v6540_v41 = vsel %vm1237_vm10, %v9548_v5, %v9547_v0  ;;  %9549 = vst [vmem:[#allocation48_spill] sm:$0xff] %v6545_v22  ;;  %5132 = vpow2.f32 %v538_v61  ;;  %v1778_v28 = vrot.slane %v6147_v9, 4  ;;  %v812_v18 = vor.u32 1.1754944e-38, %v811_v13  ;;  %vm807_vm15 = vmor %vm805_vm14, %vm806_vm13  ;;  %v473_v0 = vpop.f32.mrf.mxu2 }
 0x152   : > { %v1410_v19 = vrot.slane %v6540_v41, 1  ;;  %v9305_v34 = vrot.slane %v6540_v41, 4  ;;  %v6551_v25 = vmax.f32 %v1744_v62, %v1790_v55  ;;  %v6553_v15 = vmax.f32 %v1745_v26, %v1792_v50 }
 0x153   : > { %v804_v38 = vadd.f32 %v5129_v29, %v803_v57  ;;  %v5131_v47 = vpop.eup %5130  ;;  %v9303_v44 = vrot.slane %v6545_v22, 6  ;;  %v9552_v2 = vrot.slane %v6147_v9, 1  ;;  %v9553_v12 = vrot.slane %v6183_v17, 1 }
 0x154   : > { %9550 = vst [vmem:[#allocation49_spill] sm:$0xff] %v6551_v25  ;;  %v6566_v50 = vsel %vm359_vm0, %v1778_v28, %v9305_v34  ;;  %vm810_vm2 = vcmp.eq.f32.partialorder %v809_v42, 8.507059e+37  ;;  %v6568_v33 = vadd.f32 1.0, %v5131_v47  ;;  %v9554_v32 = vrot.slane %v6453_v60, 1  ;;  %v9569_v34 = vld [vmem:[#allocation29_spill] sm:$0xff] }
 0x155   : > { %9551 = vst [vmem:[#allocation50_spill] sm:$0xff] %v6553_v15  ;;  %v1411_v30 = vsel %vm1398_vm6, %v9552_v2, %v1410_v19  ;;  %v1413_v8 = vsel %vm1398_vm6, %v1410_v19, %v9553_v12  ;;  %v808_v55 = vsel %vm807_vm15, %v5129_v29, %v804_v38  ;;  %v9304_v37 = vrot.slane %v6508_v45, 1  ;;  %v9561_v2 = vld [vmem:[#allocation5_spill] sm:$0xff] }
 0x156   : > { %v6571_v35 = vmax.f32 %v6147_v9, %v1411_v30  ;;  %v6576_v4 = vmax.f32 %v6453_v60, %v9554_v32  ;;  %v813_v13 = vsel %vm810_vm2, %v812_v18, %v808_v55  ;;  %v6580_v61 = vmax.f32 %v6540_v41, %v1413_v8  ;;  %v9562_v8 = vld [vmem:[#allocation34_spill] sm:$0xff] }
 0x157   : > { %v5133_v5 = vpop.eup %5132  ;;  %v6584_v29 = vmax.f32 %v6241_v14, %v6474_v49  ;;  %v6588_v9 = vmax.f32 %v6286_v6, %v6477_v20  ;;  %v6591_v42 = vmul.f32 %v813_v13, %v6357_v48  ;;  %5134 = vrcp.f32 %v6568_v33  ;;  %v9565_v14 = vld [vmem:[#allocation11_spill] sm:$0xff] }
 0x158   : > { %9555 = vst [vmem:[#allocation51_spill] sm:$0xff] %v6576_v4  ;;  %v9557_v54 = vrot.slane %v6501_v46, 6  ;;  %v6602_v62 = vsel %vm1237_vm10, %v9303_v44, -inf  ;;  %v6604_v26 = vadd.f32 1.0, %v5133_v5  ;;  %v1634_v57 = vrot.slane %v6571_v35, 2  ;;  %v9571_v46 = vld [vmem:[#allocation24_spill] sm:$0xff] }
 0x159   : > { %9556 = vst [vmem:[#allocation52_spill] sm:$0xff] %v6591_v42  ;;  %v1129_v48 = vmax.f32 %v6429_v1, %v6591_v42  ;;  %v1155_v19 = vmax.f32 %v6140_v39, %v6487_v40  ;;  %v9309_v28 = vrot.slane %v6580_v61, 2  ;;  %v6613_v38 = vadd.f32 %v6230_v7, %v473_v0  ;;  %v9563_v0 = vld [vmem:[#allocation26_spill] sm:$0xff] }
 0x15a   : > { %v6597_v3 = vsel %vm1237_vm10, -inf, %v9557_v54  ;;  %9559 = vst [vmem:[#allocation54_spill] sm:$0xff] %v6602_v62  ;;  %v6618_v18 = vmax.f32 %v6508_v45, %v9304_v37  ;;  %v6622_v47 = vmax.f32 %v6291_v24, %v6382_v16  ;;  %v1131_v30 = vmax.f32 %v6591_v42, %v9561_v2  ;;  %v9564_v37 = vld [vmem:[#allocation30_spill] sm:$0xff] }
 0x15b   : > { %9558 = vst [vmem:[#allocation53_spill] sm:$0xff] %v6597_v3  ;;  %5136 = vrcp.f32 %v6604_v26  ;;  %v6630_v7 = vmax.f32 %v1155_v19, %v6591_v42  ;;  %v6634_v55 = vmax.f32 %v9562_v8, %v6426_v10  ;;  %v1157_v32 = vmax.f32 %v6316_v52, %v1129_v48  ;;  %v9566_v42 = vld [vmem:[#allocation16_spill] sm:$0xff] }
 0x15c   : > { %9560 = vst [vmem:[#allocation55_spill] sm:$0xff] %v6618_v18  ;;  %v1033_v13 = vand.u32 2147483647, %v6568_v33  ;;  %v1636_v54 = vsel %vm1623_vm11, %v1634_v57, %v9309_v28  ;;  %v6645_v19 = vmax.f32 %v6422_v58, %v6532_v21  ;;  %v1035_v44 = vand.u32 2147483648, %v6568_v33 }
 0x15d   : > { %v5135_v39 = vpop.eup %5134  ;;  %v507_v52 = vsub.f32 0.0, %v6613_v38  ;;  %v1159_v12 = vmax.f32 %v6487_v40, %v1131_v30  ;;  %v1161_v5 = vmax.f32 %v1129_v48, %v9565_v14  ;;  %v1163_v1 = vmax.f32 %v1131_v30, %v9566_v42 }
 0x15e   : > { %v1025_v57 = vmul.f32 %v5135_v39, %v6568_v33  ;;  %v9567_v28 = vrot.slane %v6602_v62, 1  ;;  %vm1029_vm3 = vweird.f32 %v6568_v33  ;;  %v9570_v3 = vrot.slane %v9569_v34, 6 }
 0x15f   : > { %v9572_v22 = vrot.slane %v9571_v46, 6  ;;  %v6670_v42 = vmax.f32 %v1157_v32, %v9561_v2  ;;  %vm6672_vm4 = vcmp.eq.f32.partialorder %v1033_v13, 8.507059e+37  ;;  %vm1030_vm5 = vweird.f32 %v5135_v39  ;;  %v9575_v46 = vld [vmem:[#allocation8_spill] sm:$0xff]  ;;  %v9578_v32 = vld [vmem:[#allocation19_spill] sm:$0xff] }
 0x160   : > { %v6658_v58 = vmax.f32 %v6602_v62, %v9567_v28  ;;  %v1026_v48 = vsub.f32 1.0, %v1025_v57  ;;  %v823_v28 = vand.u32 2147483647, %v6604_v26  ;;  %v1036_v6 = vor.u32 1.1754944e-38, %v1035_v44  ;;  %vm6698_vm9 = vmor %vm1029_vm3, %vm1030_vm5 }
 0x161   : > { %v6667_v40 = vsel %vm1237_vm10, %v9572_v22, %v9570_v3  ;;  %v5137_v14 = vpop.eup %5136  ;;  %vm819_vm7 = vweird.f32 %v6604_v26  ;;  %v6680_v22 = vmax.f32 %v1159_v12, %v9575_v46  ;;  %v9576_v3 = vld [vmem:[#allocation14_spill] sm:$0xff]  ;;  %v6686_v57 = vmax.f32 %v1163_v1, %v9578_v32 }
 0x162   : > { %9568 = vst [vmem:[#allocation26_spill] sm:$0xff] %v6658_v58  ;;  %v815_v34 = vmul.f32 %v5137_v14, %v6604_v26  ;;  %v6683_v58 = vmax.f32 %v1161_v5, %v9576_v3  ;;  %v825_v13 = vand.u32 2147483648, %v6604_v26  ;;  %v9580_v2 = vrot.slane %v6630_v7, 6 }
 0x163   : > { %9579 = vst [vmem:[#allocation11_spill] sm:$0xff] %v6686_v57  ;;  %v1027_v44 = vmul.f32 %v5135_v39, %v1026_v48  ;;  %v1740_v24 = vmax.f32 %v6571_v35, %v1636_v54  ;;  %vm6702_vm8 = vcmp.eq.f32.partialorder %v823_v28, 8.507059e+37  ;;  %v570_v32 = vmul.f32 1.442695, %v507_v52  ;;  %v9587_v28 = vld [vmem:[#allocation38_spill] sm:$0xff] }
 0x164   : > { %9577 = vst [vmem:[#allocation30_spill] sm:$0xff] %v6683_v58  ;;  %v6692_v62 = vsel %vm1237_vm10, -inf, %v9580_v2  ;;  %v816_v18 = vsub.f32 1.0, %v815_v34  ;;  %v1450_v2 = vrot.slane %v6667_v40, 1  ;;  %vm820_vm12 = vweird.f32 %v5137_v14  ;;  %v9585_v34 = vld [vmem:[#allocation27_spill] sm:$0xff] }
 0x165   : > { %v1028_v3 = vadd.f32 %v5135_v39, %v1027_v44  ;;  %v6708_v35 = vmax.f32 %v1740_v24, %v6566_v50  ;;  %v1259_v54 = vrot.slane %v6680_v22, 6  ;;  %v826_v33 = vor.u32 1.1754944e-38, %v825_v13  ;;  %vm821_vm13 = vmor %vm819_vm7, %vm820_vm12 }
 0x166   : > { %v817_v48 = vmul.f32 %v5137_v14, %v816_v18  ;;  %v9586_v12 = vrot.slane %v9585_v34, 1  ;;  %v1637_v45 = vrot.slane %v9587_v28, 2  ;;  %v9588_v50 = vrot.slane %v6283_v63, 1 }
 0x167   : > { %v1032_v52 = vsel %vm6698_vm9, %v5135_v39, %v1028_v3  ;;  %1952 = vrot.lane.b32.xlu0 %v6708_v35, %s5280_s30  ;;  %v6721_v24 = vmax.f32 %v6382_v16, %v6708_v35  ;;  %5138 = vpow2.f32 %v570_v32  ;;  %v9589_v39 = vrot.slane %v6580_v61, 2 }
 0x168   : > { %v1451_v46 = vsel %vm1398_vm6, %v9586_v12, %v1450_v2  ;;  %v818_v15 = vadd.f32 %v5137_v14, %v817_v48  ;;  %v1453_v18 = vsel %vm1398_vm6, %v1450_v2, %v9588_v50  ;;  %v1037_v13 = vsel %vm6672_vm4, %v1036_v6, %v1032_v52 }
 0x169   : > { %v1638_v3 = vsel %vm1623_vm11, %v9589_v39, %v1637_v45  ;;  %v1781_v44 = vrot.slane %v6183_v17, 4  ;;  %v9590_v16 = vrot.slane %v6670_v42, 6  ;;  %v6740_v2 = vmax.f32 %v9585_v34, %v1451_v46 }
 0x16a   : > { %v822_v5 = vsel %vm821_vm13, %v5137_v14, %v818_v15  ;;  %v1741_v6 = vmax.f32 %v6580_v61, %v1638_v3  ;;  %v6746_v26 = vsel %vm1237_vm10, -inf, %v1259_v54  ;;  %v6751_v17 = vmax.f32 %v6667_v40, %v1453_v18 }
 0x16b   : > { %v6737_v12 = vsel %vm1237_vm10, -inf, %v9590_v16  ;;  %v827_v45 = vsel %vm6702_vm8, %v826_v33, %v822_v5  ;;  %v9591_v30 = vrot.slane %v6540_v41, 4  ;;  %v6759_v61 = vmul.f32 %v1037_v13, %v6483_v36 }
 0x16c   : > { %v6762_v32 = vmul.f32 %v827_v45, %v6492_v31  ;;  %v1424_v1 = vrot.slane %v6692_v62, 1  ;;  %v1429_v48 = vrot.slane %v6737_v12, 1  ;;  %v1434_v41 = vrot.slane %v6746_v26, 1  ;;  %v9594_v31 = vld [vmem:[#allocation7_spill] sm:$0xff] }
 0x16d   : > { %v1782_v15 = vsel %vm359_vm0, %v9591_v30, %v1781_v44  ;;  %9592 = vst [vmem:[#allocation16_spill] sm:$0xff] %v6759_v61  ;;  %v1674_v50 = vrot.slane %v6740_v2, 2  ;;  %v9323_v36 = vrot.slane %v6667_v40, 4  ;;  %v5139_v18 = vpop.eup %5138  ;;  %v9595_v39 = vmax.f32 %v9564_v37, %v6588_v9 }
 0x16e   : > { %9593 = vst [vmem:[#allocation29_spill] sm:$0xff] %v6762_v32  ;;  %v6767_v28 = vmax.f32 %v1741_v6, %v1782_v15  ;;  %v1130_v52 = vmax.f32 %v6477_v20, %v6762_v32  ;;  %v6776_v13 = vmax.f32 %v6762_v32, %v9594_v31  ;;  %v1675_v44 = vrot.slane %v6751_v17, 2 }
 0x16f   : > { %v1188_v3 = vmax.f32 %v9595_v39, %v6762_v32  ;;  %v1677_v16 = vrot.slane %v6435_v59, 2  ;;  %v1175_v6 = vmax.f32 %v6584_v29, %v6759_v61  ;;  %v9596_v45 = vmax.f32 %v9563_v0, %v6584_v29 }
 0x170   : > { %v1158_v15 = vmax.f32 %v6343_v56, %v1130_v52  ;;  %1954 = vrot.lane.b32.xlu0 %v6767_v28, %s5280_s30  ;;  %v1145_v59 = vmax.f32 %v6474_v49, %v6759_v61  ;;  %v1160_v39 = vmax.f32 %v6588_v9, %v6776_v13  ;;  %v1818_v46 = vrot.slane %v9585_v34, 4 }
 0x171   : > { %v6791_v30 = vmax.f32 %v9596_v45, %v6759_v61  ;;  %v1254_v29 = vrot.slane %v1188_v3, 6  ;;  %v6803_v0 = vadd.f32 1.0, %v5139_v18  ;;  %v9598_v45 = vld [vmem:[#allocation12_spill] sm:$0xff]  ;;  %v6809_v37 = vsel %vm1623_vm11, %v1674_v50, %v1675_v44 }
 0x172   : > { %v1190_v14 = vmax.f32 %v1158_v15, %v9594_v31  ;;  %v1192_v5 = vmax.f32 %v1160_v39, %v9598_v45  ;;  %v6814_v33 = vsel %vm359_vm0, %v1818_v46, %v9323_v36  ;;  %v6817_v9 = vsel %vm1623_vm11, %v1675_v44, %v1677_v16  ;;  %v9601_v16 = vld [vmem:[#allocation13_spill] sm:$0xff] }
 0x173   : > { %9597 = vst [vmem:[#allocation24_spill] sm:$0xff] %v6791_v30  ;;  %v6820_v18 = vrot.slane %v1175_v6, 6  ;;  %v9599_v3 = vrot.slane %v6630_v7, 6  ;;  %v6828_v50 = vmax.f32 %v6334_v53, %v1145_v59  ;;  %v6831_v46 = vsel %vm1237_vm10, %v1254_v29, -inf }
 0x174   : > { %v1257_v39 = vrot.slane %v1190_v14, 6  ;;  %v1260_v56 = vrot.slane %v1192_v5, 6  ;;  %v1162_v36 = vmax.f32 %v1130_v52, %v9601_v16  ;;  %v9602_v6 = vrot.slane %v6670_v42, 6  ;;  %v9605_v16 = vld [vmem:[#allocation17_spill] sm:$0xff] }
 0x175   : > { %v6825_v15 = vsel %vm1237_vm10, %v9599_v3, %v1254_v29  ;;  %9600 = vst [vmem:[#allocation27_spill] sm:$0xff] %v6828_v50  ;;  %5140 = vrcp.f32 %v6803_v0  ;;  %v1427_v42 = vrot.slane %v6831_v46, 1  ;;  %v9603_v5 = vrot.slane %v6791_v30, 6 }
 0x176   : > { %v1425_v44 = vrot.slane %v6825_v15, 1  ;;  %v6838_v34 = vsel %vm1237_vm10, %v9602_v6, %v1257_v39  ;;  %v6841_v7 = vsel %vm1237_vm10, %v1257_v39, -inf  ;;  %v6847_v53 = vsel %vm1237_vm10, %v1259_v54, %v1260_v56 }
 0x177   : > { %v6850_v14 = vsel %vm1237_vm10, %v1260_v56, -inf  ;;  %v6857_v59 = vsel %vm1237_vm10, -inf, %v9603_v5  ;;  %v6861_v29 = vsel %vm1237_vm10, -inf, %v6820_v18  ;;  %v1430_v22 = vrot.slane %v6838_v34, 1 }
 0x178   : > { %v1426_v52 = vsel %vm1398_vm6, %v1424_v1, %v1425_v44  ;;  %9604 = vst [vmem:[#allocation38_spill] sm:$0xff] %v6857_v59  ;;  %v1432_v54 = vrot.slane %v6841_v7, 1  ;;  %v1164_v56 = vmax.f32 %v6776_v13, %v5991_v51  ;;  %v1428_v1 = vsel %vm1398_vm6, %v1425_v44, %v1427_v42 }
 0x179   : > { %v1435_v3 = vrot.slane %v6847_v53, 1  ;;  %v1437_v39 = vrot.slane %v6850_v14, 1  ;;  %v6871_v6 = vmax.f32 %v1162_v36, %v9605_v16  ;;  %v1431_v5 = vsel %vm1398_vm6, %v1429_v48, %v1430_v22 }
 0x17a   : > { %v1433_v61 = vsel %vm1398_vm6, %v1430_v22, %v1432_v54  ;;  %v1542_v49 = vmax.f32 %v6692_v62, %v1426_v52  ;;  %v1543_v51 = vmax.f32 %v6825_v15, %v1428_v1  ;;  %v1544_v13 = vmax.f32 %v6831_v46, %v1427_v42 }
 0x17b   : > { %v1436_v45 = vsel %vm1398_vm6, %v1434_v41, %v1435_v3  ;;  %v1438_v31 = vsel %vm1398_vm6, %v1435_v3, %v1437_v39  ;;  %v6880_v44 = vpop.eup %5140  ;;  %v6883_v32 = vmax.f32 %v6737_v12, %v1431_v5  ;;  %v6886_v36 = vmax.f32 %v6838_v34, %v1433_v61  ;;  %v9606_v3 = vld [vmem:[#allocation21_spill] sm:$0xff] }
 0x17c   : > { %v1547_v48 = vmax.f32 %v6841_v7, %v1432_v54  ;;  %v6890_v52 = vmax.f32 %v6746_v26, %v1436_v45  ;;  %v6893_v41 = vmax.f32 %v6847_v53, %v1438_v31  ;;  %v1550_v22 = vmax.f32 %v6850_v14, %v1437_v39 }
 0x17d   : > { %v1649_v1 = vrot.slane %v1542_v49, 2  ;;  %v1650_v42 = vrot.slane %v1543_v51, 2  ;;  %v6897_v16 = vmax.f32 %v1164_v56, %v9606_v3  ;;  %v1652_v20 = vrot.slane %v1544_v13, 2 }
 0x17e   : > { %v1794_v61 = vrot.slane %v6825_v15, 4  ;;  %v1654_v45 = vrot.slane %v6883_v32, 2  ;;  %v1655_v30 = vrot.slane %v6886_v36, 2  ;;  %v1657_v31 = vrot.slane %v1547_v48, 2 }
 0x17f   : > { %v1651_v54 = vsel %vm1623_vm11, %v1649_v1, %v1650_v42  ;;  %vm1043_vm14 = vweird.f32 %v6803_v0  ;;  %v1653_v39 = vsel %vm1623_vm11, %v1650_v42, %v1652_v20  ;;  %v1659_v57 = vrot.slane %v6890_v52, 2 }
 0x180   : > { %v1660_v56 = vrot.slane %v6893_v41, 2  ;;  %v1746_v3 = vmax.f32 %v1542_v49, %v1651_v54  ;;  %v1662_v5 = vrot.slane %v1550_v22, 2  ;;  %v1747_v1 = vmax.f32 %v1543_v51, %v1653_v39 }
 0x181   : > { %v1474_v58 = vrot.slane %v6861_v29, 1  ;;  %v1843_v8 = vrot.slane %v6861_v29, 4  ;;  %v9334_v48 = vrot.slane %v6897_v16, 6  ;;  %v9607_v4 = vrot.slane %v6692_v62, 4 }
 0x182   : > { %v9608_v42 = vrot.slane %v6871_v6, 6  ;;  %v6922_v54 = vsel %vm1623_vm11, %v1654_v45, %v1655_v30  ;;  %v1796_v51 = vrot.slane %v6831_v46, 4  ;;  %v1756_v22 = vmax.f32 %v6740_v2, %v6809_v37 }
 0x183   : > { %v1795_v20 = vsel %vm359_vm0, %v9607_v4, %v1794_v61  ;;  %v6928_v39 = vsel %vm1623_vm11, %v1655_v30, %v1657_v31  ;;  %v6931_v62 = vsel %vm1623_vm11, %v1659_v57, %v1660_v56  ;;  %v1663_v13 = vsel %vm1623_vm11, %v1660_v56, %v1662_v5  ;;  %v9646_v57 = vld [vmem:[#allocation55_spill] sm:$0xff] }
 0x184   : > { %v6919_v49 = vsel %vm1237_vm10, %v9608_v42, -inf  ;;  %v6933_v4 = vmax.f32 %v1746_v3, %v1795_v20  ;;  %v1039_v42 = vmul.f32 %v6880_v44, %v6803_v0  ;;  %v1797_v45 = vsel %vm359_vm0, %v1794_v61, %v1796_v51 }
 0x185   : > { %v1047_v46 = vand.u32 2147483647, %v6803_v0  ;;  %v1049_v15 = vand.u32 2147483648, %v6803_v0  ;;  %v6944_v2 = vsel %vm1237_vm10, %v9334_v48, -inf  ;;  %v1748_v30 = vmax.f32 %v6883_v32, %v6922_v54 }
 0x186   : > { %9609 = vst [vmem:[#allocation13_spill] sm:$0xff] %v6933_v4  ;;  %v6949_v37 = vmax.f32 %v1747_v1, %v1797_v45  ;;  %v1749_v3 = vmax.f32 %v6886_v36, %v6928_v39  ;;  %v1750_v5 = vmax.f32 %v6890_v52, %v6931_v62  ;;  %v1040_v61 = vsub.f32 1.0, %v1039_v42  ;;  %v9612_v52 = vld [vmem:[#allocation33_spill] sm:$0xff] }
 0x187   : > { %vm1044_vm15 = vweird.f32 %v6880_v44  ;;  %v1751_v31 = vmax.f32 %v6893_v41, %v1663_v13  ;;  %v1799_v56 = vrot.slane %v6838_v34, 4  ;;  %v1801_v20 = vrot.slane %v6841_v7, 4 }
 0x188   : > { %9610 = vst [vmem:[#allocation56_spill] sm:$0xff] %v6949_v37  ;;  %v6960_v51 = vmax.f32 %v1756_v22, %v6814_v33  ;;  %v1804_v32 = vrot.slane %v6847_v53, 4  ;;  %v1041_v1 = vmul.f32 %v6880_v44, %v1040_v61  ;;  %v1050_v36 = vor.u32 1.1754944e-38, %v1049_v15  ;;  %vm6971_vm2 = vmor %vm1043_vm14, %vm1044_vm15 }
 0x189   : > { %v9611_v54 = vrot.slane %v6319_v27, 6  ;;  %v9613_v39 = vrot.slane %v9612_v52, 6  ;;  %v1821_v33 = vrot.slane %v6283_v63, 4  ;;  %v1783_v53 = vrot.slane %v6330_v43, 4 }
 0x18a   : > { %1984 = vrot.lane.b32.xlu2 %v6960_v51, %s5280_s30  ;;  %v1806_v27 = vrot.slane %v6850_v14, 4  ;;  %v1042_v13 = vadd.f32 %v6880_v44, %v1041_v1  ;;  %vm1048_vm3 = vcmp.eq.f32.partialorder %v1047_v46, 8.507059e+37  ;;  %v2133_v0 = vmax.f32 %v6622_v47, %v6708_v35 }
 0x18b   : > { %v1249_v62 = vsel %vm1237_vm10, %v9613_v39, %v9611_v54  ;;  %v1757_v15 = vmax.f32 %v6751_v17, %v6817_v9  ;;  %v9616_v22 = vrot.slane %v6330_v43, 1  ;;  %v9617_v63 = vrot.slane %v6453_v60, 1 }
 0x18c   : > { %v1415_v7 = vrot.slane %v1249_v62, 1  ;;  %v1784_v41 = vrot.slane %v1249_v62, 4  ;;  %v1046_v14 = vsel %vm6971_vm2, %v6880_v44, %v1042_v13  ;;  %v2134_v17 = vmax.f32 %v6634_v55, %v6767_v28 }
 0x18d   : > { %v1051_v9 = vsel %vm1048_vm3, %v1050_v36, %v1046_v14  ;;  %v9618_v54 = vrot.slane %v6667_v40, 4  ;;  %v2193_v39 = vrot.slane %v2133_v0, 6  ;;  %v9620_v13 = vrot.slane %v6737_v12, 4 }
 0x18e   : > { %v1416_v42 = vsel %vm1398_vm6, %v9616_v22, %v1415_v7  ;;  %v1418_v45 = vsel %vm1398_vm6, %v1415_v7, %v9617_v63  ;;  %v1785_v61 = vsel %vm359_vm0, %v1783_v53, %v1784_v41  ;;  %v1786_v7 = vrot.slane %v6453_v60, 4 }
 0x18f   : > { %v1536_v46 = vmax.f32 %v6330_v43, %v1416_v42  ;;  %v6996_v1 = vmax.f32 %v1249_v62, %v1418_v45  ;;  %v1822_v52 = vsel %vm359_vm0, %v9618_v54, %v1821_v33  ;;  %v7005_v53 = vmul.f32 %v1051_v9, %v6613_v38 }
 0x190   : > { %v2194_v43 = vrot.slane %v2134_v17, 6  ;;  %v1800_v36 = vsel %vm359_vm0, %v9620_v13, %v1799_v56  ;;  %v7012_v22 = vmax.f32 %v1757_v15, %v1822_v52  ;;  %v7015_v40 = vsel %vm359_vm0, %v1784_v41, %v1786_v7 }
 0x191   : > { %9619 = vst [vmem:[#allocation33_spill] sm:$0xff] %v7005_v53  ;;  %v1639_v34 = vrot.slane %v1536_v46, 2  ;;  %v1640_v44 = vrot.slane %v6996_v1, 2  ;;  %v1802_v60 = vsel %vm359_vm0, %v1799_v56, %v1801_v20  ;;  %v9621_v38 = vrot.slane %v6746_v26, 4 }
 0x192   : > { %v1176_v0 = vmax.f32 %v6645_v19, %v7005_v53  ;;  %v1807_v42 = vsel %vm359_vm0, %v1804_v32, %v1806_v27  ;;  %v7027_v15 = vmax.f32 %v1748_v30, %v1800_v36  ;;  %1986 = vrot.lane.b32.xlu2 %v7012_v22, %s5280_s30  ;;  %v7032_v56 = vsel %vm1237_vm10, %v2193_v39, %v2194_v43 }
 0x193   : > { %v1805_v33 = vsel %vm359_vm0, %v9621_v38, %v1804_v32  ;;  %v1641_v12 = vsel %vm1623_vm11, %v1639_v34, %v1640_v44  ;;  %v7034_v26 = vmax.f32 %v1749_v3, %v1802_v60  ;;  %v7038_v63 = vmax.f32 %v1751_v31, %v1807_v42 }
 0x194   : > { %9622 = vst [vmem:[#allocation57_spill] sm:$0xff] %v7027_v15  ;;  %v1742_v41 = vmax.f32 %v1536_v46, %v1641_v12  ;;  %v7036_v20 = vmax.f32 %v1750_v5, %v1805_v33  ;;  %v1284_v45 = vrot.slane %v1176_v0, 6  ;;  %v7042_v14 = vmax.f32 %v6426_v10, %v6767_v28 }
 0x195   : > { %9623 = vst [vmem:[#allocation58_spill] sm:$0xff] %v7034_v26  ;;  %v7048_v32 = vmax.f32 %v6551_v25, %v6933_v4  ;;  %v2305_v27 = vsel %vm1237_vm10, %v2194_v43, -inf  ;;  %v1146_v3 = vmax.f32 %v6532_v21, %v7005_v53  ;;  %v2289_v46 = vsel %vm1237_vm10, -inf, %v2193_v39 }
 0x196   : > { %9624 = vst [vmem:[#allocation59_spill] sm:$0xff] %v7036_v20  ;;  %v7044_v30 = vmax.f32 %v1742_v41, %v1785_v61  ;;  %v1285_v5 = vsel %vm1237_vm10, %v6820_v18, %v1284_v45  ;;  %v1365_v31 = vsel %vm1237_vm10, %v1284_v45, -inf  ;;  %v2354_v9 = vrot.slane %v7032_v56, 1 }
 0x197   : > { %9625 = vst [vmem:[#allocation60_spill] sm:$0xff] %v7038_v63  ;;  %v1475_v10 = vrot.slane %v1285_v5, 1  ;;  %v1477_v17 = vrot.slane %v1365_v31, 1  ;;  %v1844_v61 = vrot.slane %v1285_v5, 4  ;;  %v1846_v54 = vrot.slane %v1365_v31, 4 }
 0x198   : > { %1956 = vrot.lane.b32.xlu0 %v7044_v30, %s5280_s30  ;;  %v7062_v52 = vmax.f32 %v7044_v30, %v6551_v25  ;;  %v7066_v18 = vmax.f32 %v6708_v35, %v7044_v30  ;;  %v2356_v7 = vrot.slane %v2305_v27, 1  ;;  %v2722_v43 = vrot.slane %v7032_v56, 4 }
 0x199   : > { %v1476_v39 = vsel %vm1398_vm6, %v1474_v58, %v1475_v10  ;;  %v1478_v34 = vsel %vm1398_vm6, %v1475_v10, %v1477_v17  ;;  %v2724_v13 = vrot.slane %v2305_v27, 4  ;;  %v1574_v38 = vmax.f32 %v1365_v31, %v1477_v17 }
 0x19a   : > { %v1572_v36 = vmax.f32 %v6861_v29, %v1476_v39  ;;  %v1573_v60 = vmax.f32 %v1285_v5, %v1478_v34  ;;  %v1845_v33 = vsel %vm359_vm0, %v1843_v8, %v1844_v61  ;;  %v9626_v35 = vmax.f32 %v6295_v23, %v6645_v19 }
 0x19b   : > { %v1847_v58 = vsel %vm359_vm0, %v1844_v61, %v1846_v54  ;;  %v1702_v5 = vrot.slane %v1574_v38, 2  ;;  %v2353_v29 = vrot.slane %v2289_v46, 1  ;;  %v7090_v8 = vmax.f32 %v6933_v4, %v7027_v15 }
 0x19c   : > { %v7081_v0 = vmax.f32 %v9626_v35, %v7005_v53  ;;  %v1699_v41 = vrot.slane %v1572_v36, 2  ;;  %v1700_v45 = vrot.slane %v1573_v60, 2  ;;  %v2357_v23 = vsel %vm1398_vm6, %v2354_v9, %v2356_v7  ;;  %v9650_v53 = vld [vmem:[#allocation45_spill] sm:$0xff] }
 0x19d   : > { %v2483_v19 = vmax.f32 %v2305_v27, %v2356_v7  ;;  %v2725_v31 = vsel %vm359_vm0, %v2722_v43, %v2724_v13  ;;  %v7095_v10 = vmax.f32 %v6471_v11, %v1146_v3  ;;  %v2482_v54 = vmax.f32 %v7032_v56, %v2357_v23  ;;  %v9629_v7 = vld [vmem:[#allocation51_spill] sm:$0xff]  ;;  %v9632_v3 = vld [vmem:[#allocation34_spill] sm:$0xff] }
 0x19e   : > { %9627 = vst [vmem:[#allocation61_spill] sm:$0xff] %v7081_v0  ;;  %v1701_v17 = vsel %vm1623_vm11, %v1699_v41, %v1700_v45  ;;  %v1703_v61 = vsel %vm1623_vm11, %v1700_v45, %v1702_v5  ;;  %v9336_v39 = vrot.slane %v7081_v0, 6  ;;  %v2355_v62 = vsel %vm1398_vm6, %v2353_v29, %v2354_v9  ;;  %v9633_v9 = vld [vmem:[#allocation50_spill] sm:$0xff]  ;;  %v9669_v0 = vld [vmem:[#allocation11_spill] sm:$0xff] }
 0x19f   : > { %9628 = vst [vmem:[#allocation62_spill] sm:$0xff] %v7095_v10  ;;  %v1766_v34 = vmax.f32 %v1572_v36, %v1701_v17  ;;  %v1767_v38 = vmax.f32 %v1573_v60, %v1703_v61  ;;  %v2580_v35 = vrot.slane %v2483_v19, 2  ;;  %v2578_v42 = vrot.slane %v2482_v54, 2  ;;  %v9635_v17 = vld [vmem:[#allocation42_spill] sm:$0xff] }
 0x1a0   : > { %v2721_v27 = vrot.slane %v2289_v46, 4  ;;  %v1642_v13 = vrot.slane %v9629_v7, 2  ;;  %v2104_v41 = vmax.f32 %v9632_v3, %v7042_v14  ;;  %v2481_v45 = vmax.f32 %v2289_v46, %v2355_v62 }
 0x1a1   : > { %v7103_v48 = vmax.f32 %v1766_v34, %v1845_v33  ;;  %v7105_v11 = vmax.f32 %v1767_v38, %v1847_v58  ;;  %v9335_v56 = vrot.slane %v7095_v10, 6  ;;  %v2111_v36 = vmax.f32 %v7062_v52, %v7090_v8  ;;  %v9637_v34 = vld [vmem:[#allocation35_spill] sm:$0xff] }
 0x1a2   : > { %v2581_v60 = vsel %vm1623_vm11, %v2578_v42, %v2580_v35  ;;  %v7115_v5 = vmax.f32 %v9633_v9, %v6949_v37  ;;  %v7120_v33 = vsel %vm1237_vm10, %v9336_v39, -inf  ;;  %v2577_v29 = vrot.slane %v2481_v45, 2 }
 0x1a3   : > { %9630 = vst [vmem:[#allocation51_spill] sm:$0xff] %v7103_v48  ;;  %v2690_v58 = vmax.f32 %v2482_v54, %v2581_v60  ;;  %v7124_v62 = vmax.f32 %v6949_v37, %v7034_v26  ;;  %v2109_v46 = vmax.f32 %v7066_v18, %v7048_v32  ;;  %v2723_v23 = vsel %vm359_vm0, %v2721_v27, %v2722_v43 }
 0x1a4   : > { %9631 = vst [vmem:[#allocation63_spill] sm:$0xff] %v7105_v11  ;;  %v1643_v19 = vsel %vm1623_vm11, %v1640_v44, %v1642_v13  ;;  %v9636_v61 = vrot.slane %v9635_v17, 6  ;;  %v9638_v38 = vrot.slane %v9637_v34, 6  ;;  %v2579_v7 = vsel %vm1623_vm11, %v2577_v29, %v2578_v42  ;;  %v9643_v29 = vld [vmem:[#allocation46_spill] sm:$0xff] }
 0x1a5   : > { %9634 = vst [vmem:[#allocation34_spill] sm:$0xff] %v7120_v33  ;;  %v7139_v35 = vmax.f32 %v2690_v58, %v2725_v31  ;;  %v1743_v3 = vmax.f32 %v6996_v1, %v1643_v19  ;;  %v7147_v43 = vsel %vm1237_vm10, %v9335_v56, -inf  ;;  %v7151_v27 = vmax.f32 %v2111_v36, %v7036_v20  ;;  %v9641_v1 = vld [vmem:[#allocation39_spill] sm:$0xff] }
 0x1a6   : > { %v7137_v54 = vsel %vm1237_vm10, %v9638_v38, %v9636_v61  ;;  %9639 = vst [vmem:[#allocation42_spill] sm:$0xff] %v7147_v43  ;;  %v2689_v13 = vmax.f32 %v2481_v45, %v2579_v7  ;;  %v9642_v31 = vrot.slane %v9641_v1, 1  ;;  %v9644_v19 = vrot.slane %v9643_v29, 1  ;;  %v9645_v61 = vld [vmem:[#allocation37_spill] sm:$0xff] }
 0x1a7   : > { %v1455_v60 = vrot.slane %v7137_v54, 1  ;;  %9640 = vst [vmem:[#allocation35_spill] sm:$0xff] %v7151_v27  ;;  %2899 = vrot.lane.b32.xlu1 %v7139_v35, %s5281_s6  ;;  %v1887_v42 = vmax.f32 %v1743_v3, %v7015_v40  ;;  %v2103_v34 = vmax.f32 %v9645_v61, %v6721_v24  ;;  %v2141_v36 = vmax.f32 %v2109_v46, %v7027_v15 }
 0x1a8   : > { %v7165_v45 = vmax.f32 %v2689_v13, %v2723_v23  ;;  %v1823_v39 = vrot.slane %v9641_v1, 4  ;;  %v9651_v50 = vrot.slane %v9650_v53, 6  ;;  %vm1084_vm4 = vcmask 15360  }
 0x1a9   : > { %v1456_v58 = vsel %vm1398_vm6, %v9642_v31, %v1455_v60  ;;  %v1458_v17 = vsel %vm1398_vm6, %v1455_v60, %v9644_v19  ;;  %v7172_v40 = vmax.f32 %v6767_v28, %v1887_v42  ;;  %v7175_v3 = vmax.f32 %v1887_v42, %v9633_v9  ;;  %1958 = vrot.lane.b32.xlu0 %v1887_v42, %s5280_s30 }
 0x1aa   : > { %v1560_v38 = vmax.f32 %v9641_v1, %v1456_v58  ;;  %v7169_v7 = vmax.f32 %v7137_v54, %v1458_v17  ;;  %v2136_v31 = vmax.f32 %v2104_v41, %v1887_v42  ;;  %v2135_v60 = vmax.f32 %v2103_v34, %v7044_v30  ;;  %2897 = vrot.lane.b32.xlu2 %v7165_v45, %s5281_s6 }
 0x1ab   : > { %v2110_v41 = vmax.f32 %v7172_v40, %v7115_v5  ;;  %v2112_v42 = vmax.f32 %v7175_v3, %v7124_v62  ;;  %v1824_v30 = vrot.slane %v7137_v54, 4  ;;  %v2205_v19 = vrot.slane %v2141_v36, 6 }
 0x1ac   : > { %v1679_v13 = vrot.slane %v1560_v38, 2  ;;  %v1680_v58 = vrot.slane %v7169_v7, 2  ;;  %v2197_v17 = vrot.slane %v2136_v31, 6  ;;  %v2196_v34 = vrot.slane %v2135_v60, 6 }
 0x1ad   : > { %v2142_v46 = vmax.f32 %v2110_v41, %v7034_v26  ;;  %v2144_v56 = vmax.f32 %v2112_v42, %v7038_v63  ;;  %v1682_v28 = vrot.slane %v9646_v57, 2  ;;  %v1826_v60 = vrot.slane %v9643_v29, 4 }
 0x1ae   : > { %v1681_v61 = vsel %vm1623_vm11, %v1679_v13, %v1680_v58  ;;  %v2306_v12 = vsel %vm1237_vm10, %v2197_v17, -inf  ;;  %v2198_v23 = vsel %vm1237_vm10, %v2196_v34, %v2197_v17  ;;  %v2290_v54 = vsel %vm1237_vm10, -inf, %v2196_v34 }
 0x1af   : > { %v1758_v44 = vmax.f32 %v1560_v38, %v1681_v61  ;;  %v2206_v36 = vrot.slane %v2142_v46, 6  ;;  %v2209_v31 = vrot.slane %v2144_v56, 6  ;;  %v1825_v13 = vsel %vm359_vm0, %v1823_v39, %v1824_v30 }
 0x1b0   : > { %v2358_v42 = vrot.slane %v2290_v54, 1  ;;  %v2359_v11 = vrot.slane %v2198_v23, 1  ;;  %v2361_v1 = vrot.slane %v2306_v12, 1  ;;  %v9647_v57 = vrot.slane %v7151_v27, 6 }
 0x1b1   : > { %v7201_v41 = vmax.f32 %v1758_v44, %v1825_v13  ;;  %v7209_v38 = vsel %vm1237_vm10, %v2206_v36, -inf  ;;  %v7212_v46 = vsel %vm1237_vm10, %v2209_v31, -inf  ;;  %v7215_v39 = vsel %vm1237_vm10, %v2205_v19, %v2206_v36  ;;  %v9648_v44 = vld [vmem:[#allocation48_spill] sm:$0xff] }
 0x1b2   : > { %v7206_v48 = vsel %vm1237_vm10, %v9647_v57, %v2209_v31  ;;  %v7218_v56 = vsel %vm1237_vm10, -inf, %v2205_v19  ;;  %v2381_v17 = vrot.slane %v7212_v46, 1  ;;  %v2726_v34 = vrot.slane %v2290_v54, 4 }
 0x1b3   : > { %v9345_v29 = vrot.slane %v7206_v48, 1  ;;  %1988 = vrot.lane.b32.xlu2 %v7201_v41, %s5280_s30  ;;  %v2727_v31 = vrot.slane %v2198_v23, 4  ;;  %v1827_v13 = vsel %vm359_vm0, %v1824_v30, %v1826_v60  ;;  %v1683_v57 = vsel %vm1623_vm11, %v1680_v58, %v1682_v28 }
 0x1b4   : > { %v2498_v36 = vmax.f32 %v7212_v46, %v2381_v17  ;;  %v9649_v43 = vrot.slane %v9648_v44, 6  ;;  %v9652_v30 = vrot.slane %v7209_v38, 1  ;;  %v9653_v60 = vrot.slane %v7215_v39, 1 }
 0x1b5   : > { %v2382_v19 = vsel %vm1398_vm6, %v9345_v29, %v2381_v17  ;;  %v2360_v17 = vsel %vm1398_vm6, %v2358_v42, %v2359_v11  ;;  %v2362_v58 = vsel %vm1398_vm6, %v2359_v11, %v2361_v1  ;;  %v2106_v28 = vmax.f32 %v6634_v55, %v7172_v40 }
 0x1b6   : > { %v7237_v10 = vsel %vm1237_vm10, %v9651_v50, %v9649_v43  ;;  %v7240_v61 = vmax.f32 %v7206_v48, %v2382_v19  ;;  %v2377_v29 = vsel %vm1398_vm6, %v9653_v60, %v9652_v30  ;;  %v2605_v53 = vrot.slane %v2498_v36, 2 }
 0x1b7   : > { %v7252_v50 = vmax.f32 %v7215_v39, %v2377_v29  ;;  %v2484_v43 = vmax.f32 %v2290_v54, %v2360_v17  ;;  %v2485_v19 = vmax.f32 %v2198_v23, %v2362_v58  ;;  %v2728_v21 = vsel %vm359_vm0, %v2726_v34, %v2727_v31  ;;  %v9658_v58 = vld [vmem:[#allocation54_spill] sm:$0xff] }
 0x1b8   : > { %v9349_v44 = vrot.slane %v7240_v61, 2  ;;  %v1759_v59 = vmax.f32 %v7169_v7, %v1683_v57  ;;  %v2138_v30 = vmax.f32 %v2106_v28, %v9633_v9  ;;  %v2486_v60 = vmax.f32 %v2306_v12, %v2361_v1 }
 0x1b9   : > { %v2582_v42 = vrot.slane %v2484_v43, 2  ;;  %v2729_v11 = vrot.slane %v2306_v12, 4  ;;  %v2583_v40 = vrot.slane %v2485_v19, 2  ;;  %v1460_v54 = vrot.slane %v7237_v10, 1 }
 0x1ba   : > { %v7261_v55 = vsel %vm1623_vm11, %v9349_v44, %v2605_v53  ;;  %v7263_v29 = vmax.f32 %v1759_v59, %v1827_v13  ;;  %v9654_v23 = vrot.slane %v7120_v33, 1  ;;  %v2585_v1 = vrot.slane %v2486_v60, 2  ;;  %v9656_v59 = vld [vmem:[#allocation53_spill] sm:$0xff] }
 0x1bb   : > { %v2730_v12 = vsel %vm359_vm0, %v2727_v31, %v2729_v11  ;;  %v2584_v57 = vsel %vm1623_vm11, %v2582_v42, %v2583_v40  ;;  %v9657_v13 = vrot.slane %v9656_v59, 1  ;;  %v9659_v28 = vrot.slane %v9658_v58, 1 }
 0x1bc   : > { %v7269_v34 = vmax.f32 %v7120_v33, %v9654_v23  ;;  %1990 = vrot.lane.b32.xlu2 %v7263_v29, %s5280_s30  ;;  %v2691_v23 = vmax.f32 %v2484_v43, %v2584_v57  ;;  %v2586_v60 = vsel %vm1623_vm11, %v2583_v40, %v2585_v1  ;;  %v9351_v44 = vrot.slane %v7237_v10, 4 }
 0x1bd   : > { %v1461_v17 = vsel %vm1398_vm6, %v9657_v13, %v1460_v54  ;;  %v1463_v53 = vsel %vm1398_vm6, %v1460_v54, %v9659_v28  ;;  %v2692_v42 = vmax.f32 %v2485_v19, %v2586_v60  ;;  %v9660_v7 = vmax.f32 %v6622_v47, %v7066_v18  ;;  %v9662_v28 = vld [vmem:[#allocation30_spill] sm:$0xff] }
 0x1be   : > { %9655 = vst [vmem:[#allocation39_spill] sm:$0xff] %v7269_v34  ;;  %v1563_v31 = vmax.f32 %v9656_v59, %v1461_v17  ;;  %v7287_v11 = vmax.f32 %v7237_v10, %v1463_v53  ;;  %v2200_v36 = vrot.slane %v2138_v30, 6  ;;  %v7294_v9 = vmax.f32 %v2691_v23, %v2728_v21 }
 0x1bf   : > { %v2137_v13 = vmax.f32 %v9660_v7, %v6551_v25  ;;  %v1828_v40 = vrot.slane %v9656_v59, 4  ;;  %v7298_v1 = vmax.f32 %v2692_v42, %v2730_v12  ;;  %v9661_v17 = vrot.slane %v6871_v6, 6 }
 0x1c0   : > { %v1684_v54 = vrot.slane %v1563_v31, 2  ;;  %v9352_v43 = vrot.slane %v7287_v11, 2  ;;  %v2307_v19 = vsel %vm1237_vm10, %v2200_v36, -inf  ;;  %v9663_v53 = vrot.slane %v9662_v28, 6  ;;  %2901 = vrot.lane.b32.xlu1 %v7294_v9, %s5281_s6 }
 0x1c1   : > { %v2199_v57 = vrot.slane %v2137_v13, 6  ;;  %v1830_v18 = vsel %vm359_vm0, %v1828_v40, %v9351_v44  ;;  %v2366_v30 = vrot.slane %v2307_v19, 1  ;;  %v7321_v12 = vmax.f32 %v7139_v35, %v7298_v1 }
 0x1c2   : > { %v7306_v47 = vsel %vm1237_vm10, %v9663_v53, %v9661_v17  ;;  %v1686_v21 = vsel %vm1623_vm11, %v1684_v54, %v9352_v43  ;;  %v9664_v7 = vmov %v9663_v53  ;;  %v7347_v34 = vmax.f32 %v7027_v15, %v7036_v20 }
 0x1c3   : > { %v1342_v6 = vsel %vm1237_vm10, -inf, %v9664_v7  ;;  %v1760_v59 = vmax.f32 %v1563_v31, %v1686_v21  ;;  %v2201_v23 = vsel %vm1237_vm10, %v2199_v57, %v2200_v36  ;;  %v2291_v60 = vsel %vm1237_vm10, -inf, %v2199_v57 }
 0x1c4   : > { %v2363_v42 = vrot.slane %v2291_v60, 1  ;;  %v2364_v13 = vrot.slane %v2201_v23, 1  ;;  %v2731_v54 = vrot.slane %v2291_v60, 4  ;;  %v2732_v17 = vrot.slane %v2201_v23, 4 }
 0x1c5   : > { %v7326_v53 = vmax.f32 %v1760_v59, %v1830_v18  ;;  %v1439_v28 = vrot.slane %v1342_v6, 1  ;;  %v1440_v7 = vrot.slane %v7306_v47, 1  ;;  %v1809_v36 = vrot.slane %v7306_v47, 4 }
 0x1c6   : > { %v2365_v44 = vsel %vm1398_vm6, %v2363_v42, %v2364_v13  ;;  %v2367_v43 = vsel %vm1398_vm6, %v2364_v13, %v2366_v30  ;;  %v2733_v31 = vsel %vm359_vm0, %v2731_v54, %v2732_v17  ;;  %v9665_v57 = vmax.f32 %v7042_v14, %v7175_v3 }
 0x1c7   : > { %1992 = vrot.lane.b32.xlu2 %v7326_v53, %s5280_s30  ;;  %v2487_v18 = vmax.f32 %v2291_v60, %v2365_v44  ;;  %v2488_v59 = vmax.f32 %v2201_v23, %v2367_v43  ;;  %v1441_v40 = vsel %vm1398_vm6, %v1439_v28, %v1440_v7  ;;  %v9666_v42 = vrot.slane %v6919_v49, 1 }
 0x1c8   : > { %v7337_v21 = vmax.f32 %v9665_v57, %v6949_v37  ;;  %v1551_v54 = vmax.f32 %v1342_v6, %v1441_v40  ;;  %v1808_v25 = vrot.slane %v1342_v6, 4  ;;  %2903 = vrot.lane.b32.xlu1 %v7298_v1, %s5281_s6  ;;  %v7359_v60 = vmax.f32 %v7034_v26, %v7038_v63 }
 0x1c9   : > { %v1443_v13 = vsel %vm1398_vm6, %v1440_v7, %v9666_v42  ;;  %v2587_v14 = vrot.slane %v2487_v18, 2  ;;  %v2588_v3 = vrot.slane %v2488_v59, 2  ;;  %v9667_v37 = vmov %v9666_v42 }
 0x1ca   : > { %v1552_v57 = vmax.f32 %v7306_v47, %v1443_v13  ;;  %v1553_v44 = vmax.f32 %v6919_v49, %v9667_v37  ;;  %v1664_v23 = vrot.slane %v1551_v54, 2  ;;  %v1810_v6 = vsel %vm359_vm0, %v1808_v25, %v1809_v36 }
 0x1cb   : > { %v2589_v40 = vsel %vm1623_vm11, %v2587_v14, %v2588_v3  ;;  %v2489_v7 = vmax.f32 %v2307_v19, %v2366_v30  ;;  %v2113_v37 = vmax.f32 %v7048_v32, %v7347_v34  ;;  %v1811_v13 = vrot.slane %v6919_v49, 4 }
 0x1cc   : > { %v1665_v28 = vrot.slane %v1552_v57, 2  ;;  %v1667_v47 = vrot.slane %v1553_v44, 2  ;;  %v2693_v42 = vmax.f32 %v2487_v18, %v2589_v40  ;;  %v2734_v43 = vrot.slane %v2307_v19, 4 }
 0x1cd   : > { %v2590_v33 = vrot.slane %v2489_v7, 2  ;;  %v9668_v26 = vrot.slane %v6897_v16, 6  ;;  %v9670_v27 = vrot.slane %v9669_v0, 6  ;;  %v2114_v49 = vmax.f32 %v7115_v5, %v7359_v60 }
 0x1ce   : > { %v1666_v15 = vsel %vm1623_vm11, %v1664_v23, %v1665_v28  ;;  %v1668_v25 = vsel %vm1623_vm11, %v1665_v28, %v1667_v47  ;;  %v7374_v30 = vmax.f32 %v2693_v42, %v2733_v31  ;;  %v2735_v32 = vsel %vm359_vm0, %v2732_v17, %v2734_v43 }
 0x1cf   : > { %v7372_v14 = vsel %vm1237_vm10, %v9670_v27, %v9668_v26  ;;  %v1752_v18 = vmax.f32 %v1551_v54, %v1666_v15  ;;  %v1753_v44 = vmax.f32 %v1552_v57, %v1668_v25  ;;  %v2591_v19 = vsel %vm1623_vm11, %v2588_v3, %v2590_v33 }
 0x1d0   : > { %v9671_v23 = vmov %v9670_v27  ;;  %v1445_v40 = vrot.slane %v7372_v14, 1  ;;  %v7386_v26 = vmax.f32 %v7294_v9, %v7374_v30  ;;  %v1812_v15 = vsel %vm359_vm0, %v1809_v36, %v1811_v13  ;;  %2905 = vrot.lane.b32.xlu1 %v7374_v30, %s5281_s6 }
 0x1d1   : > { %v1343_v16 = vsel %vm1237_vm10, -inf, %v9671_v23  ;;  %v7388_v27 = vmax.f32 %v1752_v18, %v1810_v6  ;;  %v2694_v17 = vmax.f32 %v2488_v59, %v2591_v19  ;;  %v9672_v31 = vrot.slane %v7209_v38, 1 }
 0x1d2   : > { %v7396_v33 = vmax.f32 %v1753_v44, %v1812_v15  ;;  %v1444_v0 = vrot.slane %v1343_v16, 1  ;;  %v9673_v54 = vrot.slane %v6944_v2, 1  ;;  %v1813_v36 = vrot.slane %v1343_v16, 4 }
 0x1d3   : > { %v7394_v5 = vmax.f32 %v7209_v38, %v9672_v31  ;;  %v2145_v57 = vmax.f32 %v2113_v37, %v7388_v27  ;;  %1976 = vrot.lane.b32.xlu0 %v7388_v27, %s5280_s30  ;;  %v9362_v59 = vrot.slane %v7372_v14, 4  ;;  %v9674_v43 = vmax.f32 %v6721_v24, %v7062_v52 }
 0x1d4   : > { %v1448_v3 = vsel %vm1398_vm6, %v1445_v40, %v9673_v54  ;;  %v2146_v28 = vmax.f32 %v2114_v49, %v7396_v33  ;;  %1978 = vrot.lane.b32.xlu2 %v7396_v33, %s5280_s30  ;;  %v7414_v47 = vmax.f32 %v2694_v17, %v2735_v32  ;;  %v1446_v7 = vsel %vm1398_vm6, %v1444_v0, %v1445_v40 }
 0x1d5   : > { %v2139_v6 = vmax.f32 %v9674_v43, %v6933_v4  ;;  %v7418_v42 = vmax.f32 %v7372_v14, %v1448_v3  ;;  %v7422_v37 = vmax.f32 %v7036_v20, %v7388_v27  ;;  %v2211_v13 = vrot.slane %v2145_v57, 6 }
 0x1d6   : > { %v1554_v25 = vmax.f32 %v1343_v16, %v1446_v7  ;;  %v2203_v24 = vrot.slane %v7337_v21, 6  ;;  %v2212_v52 = vrot.slane %v2146_v28, 6  ;;  %v7427_v18 = vmax.f32 %v7298_v1, %v7414_v47 }
 0x1d7   : > { %v3087_v44 = vmax.f32 %v7321_v12, %v7414_v47  ;;  %v9361_v32 = vrot.slane %v7418_v42, 2  ;;  %v2295_v49 = vsel %vm1237_vm10, -inf, %v2211_v13  ;;  %v1815_v23 = vsel %vm359_vm0, %v1813_v36, %v9362_v59 }
 0x1d8   : > { %v1669_v19 = vrot.slane %v1554_v25, 2  ;;  %v2202_v16 = vrot.slane %v2139_v6, 6  ;;  %v2383_v40 = vrot.slane %v2295_v49, 1  ;;  %v2751_v21 = vrot.slane %v2295_v49, 4  ;;  %2907 = vrot.lane.b32.xlu1 %v7414_v47, %s5281_s6 }
 0x1d9   : > { %v2213_v15 = vsel %vm1237_vm10, %v2211_v13, %v2212_v52  ;;  %v2311_v1 = vsel %vm1237_vm10, %v2212_v52, -inf  ;;  %v7447_v43 = vsel %vm1237_vm10, %v2203_v24, -inf  ;;  %v3147_v4 = vrot.slane %v3087_v44, 6 }
 0x1da   : > { %v2384_v17 = vrot.slane %v2213_v15, 1  ;;  %v2386_v31 = vrot.slane %v2311_v1, 1  ;;  %v2752_v0 = vrot.slane %v2213_v15, 4  ;;  %v2754_v54 = vrot.slane %v2311_v1, 4 }
 0x1db   : > { %v1671_v57 = vsel %vm1623_vm11, %v1669_v19, %v9361_v32  ;;  %v7444_v36 = vsel %vm1237_vm10, %v2202_v16, %v2203_v24  ;;  %v2115_v24 = vmax.f32 %v7090_v8, %v7422_v37  ;;  %v2371_v20 = vrot.slane %v7447_v43, 1 }
 0x1dc   : > { %v2385_v6 = vsel %vm1398_vm6, %v2383_v40, %v2384_v17  ;;  %v2387_v28 = vsel %vm1398_vm6, %v2384_v17, %v2386_v31  ;;  %v2501_v7 = vmax.f32 %v2311_v1, %v2386_v31  ;;  %v7452_v13 = vsel %vm359_vm0, %v2751_v21, %v2752_v0 }
 0x1dd   : > { %9675 = vst [vmem:[#allocation46_spill] sm:$0xff] %v7452_v13  ;;  %v7456_v52 = vmax.f32 %v2295_v49, %v2385_v6  ;;  %v2500_v19 = vmax.f32 %v2213_v15, %v2387_v28  ;;  %v2755_v3 = vsel %vm359_vm0, %v2752_v0, %v2754_v54  ;;  %v1754_v59 = vmax.f32 %v1554_v25, %v1671_v57 }
 0x1de   : > { %v2610_v32 = vrot.slane %v2501_v7, 2  ;;  %v2292_v40 = vsel %vm1237_vm10, -inf, %v2202_v16  ;;  %v2369_v1 = vrot.slane %v7444_v36, 1  ;;  %v9677_v15 = vrot.slane %v7215_v39, 1 }
 0x1df   : > { %9676 = vst [vmem:[#allocation37_spill] sm:$0xff] %v7456_v52  ;;  %v2607_v21 = vrot.slane %v7456_v52, 2  ;;  %v2608_v17 = vrot.slane %v2500_v19, 2  ;;  %v2368_v31 = vrot.slane %v2292_v40, 1  ;;  %v7465_v49 = vmax.f32 %v1754_v59, %v1815_v23 }
 0x1e0   : > { %v9678_v0 = vrot.slane %v7218_v56, 1  ;;  %v2736_v54 = vrot.slane %v2292_v40, 4  ;;  %v9365_v25 = vrot.slane %v7444_v36, 4  ;;  %v2372_v28 = vsel %vm1398_vm6, %v2369_v1, %v2371_v20 }
 0x1e1   : > { %v7474_v16 = vsel %vm1623_vm11, %v2607_v21, %v2608_v17  ;;  %v2611_v57 = vsel %vm1623_vm11, %v2608_v17, %v2610_v32  ;;  %v2370_v6 = vsel %vm1398_vm6, %v2368_v31, %v2369_v1  ;;  %v2598_v59 = vrot.slane %v7252_v50, 2  ;;  %1980 = vrot.lane.b32.xlu2 %v7465_v49, %s5280_s30 }
 0x1e2   : > { %v2375_v8 = vsel %vm1398_vm6, %v9678_v0, %v9677_v15  ;;  %9679 = vst [vmem:[#allocation55_spill] sm:$0xff] %v7474_v16  ;;  %v2742_v23 = vrot.slane %v7215_v39, 4  ;;  %v2702_v7 = vmax.f32 %v2500_v19, %v2611_v57  ;;  %v2490_v15 = vmax.f32 %v2292_v40, %v2370_v6 }
 0x1e3   : > { %v7484_v0 = vmax.f32 %v7444_v36, %v2372_v28  ;;  %v2493_v21 = vmax.f32 %v7218_v56, %v2375_v8  ;;  %v2738_v32 = vsel %vm359_vm0, %v2736_v54, %v9365_v25  ;;  %v7493_v39 = vmax.f32 %v7165_v45, %v7294_v9 }
 0x1e4   : > { %v7495_v44 = vmax.f32 %v2702_v7, %v2755_v3  ;;  %v7498_v19 = vmax.f32 %v2115_v24, %v7465_v49  ;;  %v2600_v40 = vrot.slane %v7394_v5, 2  ;;  %v2592_v17 = vrot.slane %v2490_v15, 2 }
 0x1e5   : > { %9680 = vst [vmem:[#allocation48_spill] sm:$0xff] %v7493_v39  ;;  %v2593_v31 = vrot.slane %v7484_v0, 2  ;;  %v2597_v8 = vrot.slane %v2493_v21, 2  ;;  %v7503_v57 = vsel %vm1237_vm10, %v3147_v4, -inf  ;;  %v9682_v54 = vrot.slane %v7218_v56, 4 }
 0x1e6   : > { %9681 = vst [vmem:[#allocation45_spill] sm:$0xff] %v7495_v44  ;;  %v3086_v9 = vmax.f32 %v7493_v39, %v7374_v30  ;;  %v9683_v3 = vrot.slane %v6944_v2, 1  ;;  %v2749_v5 = vrot.slane %v7212_v46, 4  ;;  %v1816_v1 = vrot.slane %v6944_v2, 4 }
 0x1e7   : > { %v2743_v6 = vsel %vm359_vm0, %v9682_v54, %v2742_v23  ;;  %v2594_v28 = vsel %vm1623_vm11, %v2592_v17, %v2593_v31  ;;  %v2599_v7 = vsel %vm1623_vm11, %v2597_v8, %v2598_v59  ;;  %v7519_v56 = vmax.f32 %v7038_v63, %v7396_v33 }
 0x1e8   : > { %v1556_v24 = vmax.f32 %v6944_v2, %v9683_v3  ;;  %v2214_v54 = vrot.slane %v7498_v19, 6  ;;  %v2695_v25 = vmax.f32 %v2490_v15, %v2594_v28  ;;  %v2697_v13 = vmax.f32 %v2493_v21, %v2599_v7 }
 0x1e9   : > { %v3146_v52 = vrot.slane %v3086_v9, 6  ;;  %v3309_v16 = vrot.slane %v7503_v57, 1  ;;  %v9684_v46 = vrot.slane %v7372_v14, 4  ;;  %v2492_v2 = vmax.f32 %v7447_v43, %v2371_v20 }
 0x1ea   : > { %v1672_v3 = vrot.slane %v1556_v24, 2  ;;  %v7526_v39 = vmax.f32 %v2695_v25, %v2738_v32  ;;  %v7528_v8 = vmax.f32 %v2697_v13, %v2743_v6  ;;  %v2601_v63 = vsel %vm1623_vm11, %v2598_v59, %v2600_v40 }
 0x1eb   : > { %v1817_v17 = vsel %vm359_vm0, %v9684_v46, %v1816_v1  ;;  %v3148_v19 = vsel %vm1237_vm10, %v3146_v52, %v3147_v4  ;;  %v3242_v15 = vsel %vm1237_vm10, -inf, %v3146_v52  ;;  %v9685_v21 = vrot.slane %v7418_v42, 2 }
 0x1ec   : > { %v2698_v14 = vmax.f32 %v7252_v50, %v2601_v63  ;;  %v7540_v25 = vmax.f32 %v7374_v30, %v7526_v39  ;;  %2909 = vrot.lane.b32.xlu1 %v7526_v39, %s5281_s6  ;;  %v3306_v20 = vrot.slane %v3242_v15, 1  ;;  %v3307_v13 = vrot.slane %v3148_v19, 1 }
 0x1ed   : > { %v1673_v9 = vsel %vm1623_vm11, %v9685_v21, %v1672_v3  ;;  %v2116_v4 = vmax.f32 %v7124_v62, %v7519_v56  ;;  %v3674_v59 = vrot.slane %v3242_v15, 4  ;;  %v3675_v52 = vrot.slane %v3148_v19, 4 }
 0x1ee   : > { %9686 = vst [vmem:[#allocation53_spill] sm:$0xff] %v7540_v25  ;;  %v1755_v32 = vmax.f32 %v7418_v42, %v1673_v9  ;;  %v2595_v1 = vrot.slane %v2492_v2, 2  ;;  %v3308_v40 = vsel %vm1398_vm6, %v3306_v20, %v3307_v13  ;;  %v3310_v63 = vsel %vm1398_vm6, %v3307_v13, %v3309_v16 }
 0x1ef   : > { %v2739_v50 = vrot.slane %v7447_v43, 4  ;;  %v9687_v30 = vrot.slane %v7209_v38, 4  ;;  %v3434_v24 = vmax.f32 %v3242_v15, %v3308_v40  ;;  %v3435_v28 = vmax.f32 %v3148_v19, %v3310_v63 }
 0x1f0   : > { %v3676_v7 = vsel %vm359_vm0, %v3674_v59, %v3675_v52  ;;  %v1899_v62 = vmax.f32 %v1755_v32, %v1817_v17  ;;  %v2596_v3 = vsel %vm1623_vm11, %v2593_v31, %v2595_v1  ;;  %v9688_v42 = vrot.slane %v7444_v36, 4 }
 0x1f1   : > { %v2745_v6 = vsel %vm359_vm0, %v2742_v23, %v9687_v30  ;;  %v9689_v2 = vrot.slane %v7206_v48, 4  ;;  %v7565_v38 = vmax.f32 %v6960_v51, %v7201_v41  ;;  %v7568_v23 = vsel %vm1237_vm10, -inf, %v2214_v54 }
 0x1f2   : > { %v2740_v46 = vsel %vm359_vm0, %v9688_v42, %v2739_v50  ;;  %v7561_v43 = vmax.f32 %v2698_v14, %v2745_v6  ;;  %v3530_v17 = vrot.slane %v3434_v24, 2  ;;  %v3531_v19 = vrot.slane %v3435_v28, 2  ;;  %1982 = vrot.lane.b32.xlu2 %v1899_v62, %s5280_s30 }
 0x1f3   : > { %v2750_v21 = vsel %vm359_vm0, %v9689_v2, %v2749_v5  ;;  %v2148_v36 = vmax.f32 %v2116_v4, %v1899_v62  ;;  %v2696_v31 = vmax.f32 %v7484_v0, %v2596_v3  ;;  %v9691_v15 = vmax.f32 %v7240_v61, %v7261_v55 }
 0x1f4   : > { %9690 = vst [vmem:[#allocation54_spill] sm:$0xff] %v7561_v43  ;;  %v3436_v9 = vmax.f32 %v7503_v57, %v3309_v16  ;;  %v7580_v14 = vmax.f32 %v7012_v22, %v7263_v29  ;;  %v7584_v20 = vmax.f32 %v7388_v27, %v7465_v49  ;;  %v3532_v13 = vsel %vm1623_vm11, %v3530_v17, %v3531_v19 }
 0x1f5   : > { %v7575_v5 = vmax.f32 %v9691_v15, %v2750_v21  ;;  %v3677_v4 = vrot.slane %v7503_v57, 4  ;;  %v3642_v0 = vmax.f32 %v3434_v24, %v3532_v13  ;;  %v7589_v59 = vmax.f32 %v7396_v33, %v1899_v62  ;;  %v9693_v15 = vld [vmem:[#allocation26_spill] sm:$0xff] }
 0x1f6   : > { %v2215_v55 = vrot.slane %v2148_v36, 6  ;;  %v2840_v32 = vmax.f32 %v2696_v31, %v2740_v46  ;;  %v7593_v16 = vmax.f32 %v7201_v41, %v7326_v53  ;;  %v2388_v1 = vrot.slane %v7568_v23, 1  ;;  %v9734_v36 = vld [vmem:[#allocation19_spill] sm:$0xff] }
 0x1f7   : > { %v3533_v40 = vrot.slane %v3436_v9, 2  ;;  %v3678_v27 = vsel %vm359_vm0, %v3675_v52, %v3677_v4  ;;  %v3786_v63 = vmax.f32 %v3642_v0, %v3676_v7  ;;  %v2117_v30 = vmax.f32 %v7347_v34, %v7584_v20  ;;  %1107 = vst.msk [vmem:[#allocation2 + $0xb0] sm:$0xff] %vm1084_vm4, %v9734_v36 }
 0x1f8   : > { %v7598_v50 = vsel %vm1237_vm10, %v2214_v54, %v2215_v55  ;;  %v2312_v57 = vsel %vm1237_vm10, %v2215_v55, -inf  ;;  %v7602_v33 = vmax.f32 %v7414_v47, %v2840_v32  ;;  %2911 = vrot.lane.b32.xlu1 %v2840_v32, %s5281_s6  ;;  %v7608_v6 = vmax.f32 %v1899_v62, %v7012_v22 }
 0x1f9   : > { %v2389_v24 = vrot.slane %v7598_v50, 1  ;;  %v2391_v52 = vrot.slane %v2312_v57, 1  ;;  %3850 = vrot.lane.b32.xlu0 %v3786_v63, %s5282_s7  ;;  %v2118_v54 = vmax.f32 %v7359_v60, %v7589_v59  ;;  %v7615_v47 = vmax.f32 %v2840_v32, %v7561_v43 }
 0x1fa   : > { %v9692_v34 = vmax.f32 %v7139_v35, %v7427_v18  ;;  %v3534_v2 = vsel %vm1623_vm11, %v3531_v19, %v3533_v40  ;;  %v2757_v21 = vrot.slane %v7598_v50, 4  ;;  %v2759_v17 = vrot.slane %v2312_v57, 4 }
 0x1fb   : > { %v2390_v3 = vsel %vm1398_vm6, %v2388_v1, %v2389_v24  ;;  %v2392_v42 = vsel %vm1398_vm6, %v2389_v24, %v2391_v52  ;;  %v2504_v46 = vmax.f32 %v2312_v57, %v2391_v52  ;;  %v3643_v35 = vmax.f32 %v3435_v28, %v3534_v2 }
 0x1fc   : > { %v7622_v62 = vmax.f32 %v9692_v34, %v2840_v32  ;;  %v7628_v60 = vmax.f32 %v7598_v50, %v2392_v42  ;;  %v1687_v9 = vrot.slane %v9693_v15, 2  ;;  %v1831_v13 = vrot.slane %v9658_v58, 4  ;;  %v9698_v42 = vld [vmem:[#allocation6_spill] sm:$0xff] }
 0x1fd   : > { %v2615_v31 = vrot.slane %v2504_v46, 2  ;;  %v7637_v4 = vmax.f32 %v7465_v49, %v6960_v51  ;;  %v2120_v19 = vmax.f32 %v7519_v56, %v7608_v6  ;;  %v2149_v55 = vmax.f32 %v2117_v30, %v6960_v51  ;;  %1086 = vst.msk [vmem:[#allocation2 + $0x8] sm:$0xff] %vm1084_vm4, %v9698_v42 }
 0x1fe   : > { %v2613_v0 = vrot.slane %v7628_v60, 2  ;;  %v3787_v32 = vmax.f32 %v3643_v35, %v3678_v27  ;;  %v9694_v1 = vrot.slane %v7287_v11, 2  ;;  %v9695_v40 = vrot.slane %v7237_v10, 4  ;;  %v1947_v27 = vpop.permute.xlu0 %1946  ;;  %v9696_v10 = vld [vmem:[#allocation35_spill] sm:$0xff] }
 0x1ff   : > { %v2150_v63 = vmax.f32 %v2118_v54, %v7012_v22  ;;  %v2217_v56 = vrot.slane %v2149_v55, 6  ;;  %v2760_v51 = vsel %vm359_vm0, %v2757_v21, %v2759_v17  ;;  %vm2040_vm5 = vcmask 31760  }
 0x200   : > { %v1688_v28 = vsel %vm1623_vm11, %v9694_v1, %v1687_v9  ;;  %v1832_v58 = vsel %vm359_vm0, %v9695_v40, %v1831_v13  ;;  %v2616_v49 = vsel %vm1623_vm11, %v2613_v0, %v2615_v31  ;;  %v9697_v52 = vrot.slane %v9696_v10, 6  ;;  %2042 = vst.msk [vmem:[#allocation2 + $0x8] sm:$0xff] %vm2040_vm5, %v1947_v27  ;;  %v9701_v13 = vld [vmem:[#allocation4_spill] sm:$0xff] }
 0x201   : > { %v1761_v57 = vmax.f32 %v7287_v11, %v1688_v28  ;;  %v2704_v30 = vmax.f32 %v7628_v60, %v2616_v49  ;;  %v2218_v24 = vrot.slane %v2150_v63, 6  ;;  %v2119_v22 = vmax.f32 %v7422_v37, %v7637_v4  ;;  %3852 = vrot.lane.b32.xlu0 %v3787_v32, %s5282_s7  ;;  %1085 = vst.msk [vmem:[#allocation2] sm:$0xff] %vm1084_vm4, %v9701_v13  ;;  %v9703_v28 = vld [vmem:[#allocation3_spill] sm:$0xff]  ;;  %v9708_v13 = vld [vmem:[#allocation20_spill] sm:$0xff]  ;;  %v1985_v11 = vpop.permute.xlu2 %1984 }
 0x202   : > { %v7659_v34 = vsel %vm1237_vm10, -inf, %v9697_v52  ;;  %v2297_v17 = vsel %vm1237_vm10, -inf, %v2217_v56  ;;  %v2756_v31 = vrot.slane %v7568_v23, 4  ;;  %v7679_v35 = vmax.f32 %v7561_v43, %v7575_v5  ;;  %1087 = vst.msk [vmem:[#allocation2 + $0x10] sm:$0xff] %vm1084_vm4, %v9703_v28  ;;  %v9706_v52 = vld [vmem:[#allocation15_spill] sm:$0xff] }
 0x203   : > { %v7666_v54 = vmax.f32 %v1761_v57, %v1832_v58  ;;  %v2219_v46 = vsel %vm1237_vm10, %v2217_v56, %v2218_v24  ;;  %v2313_v2 = vsel %vm1237_vm10, %v2218_v24, -inf  ;;  %v7672_v60 = vmax.f32 %v2704_v30, %v2760_v51  ;;  %v9704_v57 = vld [vmem:[#allocation9_spill] sm:$0xff]  ;;  %v9705_v30 = vld [vmem:[#allocation10_spill] sm:$0xff]  ;;  %1090 = vst.msk [vmem:[#allocation2 + $0x28] sm:$0xff] %vm1084_vm4, %v9706_v52 }
 0x204   : > { %9700 = vst [vmem:[#allocation11_spill] sm:$0xff] %v7679_v35  ;;  %v2394_v15 = vrot.slane %v2219_v46, 1  ;;  %v2396_v9 = vrot.slane %v2313_v2, 1  ;;  %v7686_v55 = vmax.f32 %v2120_v19, %v7263_v29  ;;  %v7690_v32 = vmax.f32 %v7575_v5, %v7495_v44 }
 0x205   : > { %9699 = vst [vmem:[#allocation30_spill] sm:$0xff] %v7672_v60  ;;  %1994 = vrot.lane.b32.xlu2 %v7666_v54, %s5280_s30  ;;  %v3150_v1 = vrot.slane %v7622_v62, 6  ;;  %v2393_v40 = vrot.slane %v2297_v17, 1  ;;  %v2122_v58 = vmax.f32 %v7589_v59, %v7580_v14  ;;  %v2502_v19 = vmax.f32 %v7568_v23, %v2390_v3 }
 0x206   : > { %9702 = vst [vmem:[#allocation26_spill] sm:$0xff] %v7690_v32  ;;  %v2397_v63 = vsel %vm1398_vm6, %v2394_v15, %v2396_v9  ;;  %v2507_v49 = vmax.f32 %v2313_v2, %v2396_v9  ;;  %v2762_v51 = vrot.slane %v2219_v46, 4  ;;  %v2764_v27 = vrot.slane %v2313_v2, 4  ;;  %v9707_v2 = vld [vmem:[#allocation18_spill] sm:$0xff]  ;;  %v1949_v36 = vpop.permute.xlu0 %1948 }
 0x207   : > { %1088 = vst.msk [vmem:[#allocation2 + $0x18] sm:$0xff] %vm1084_vm4, %v9704_v57  ;;  %v2506_v56 = vmax.f32 %v2219_v46, %v2397_v63  ;;  %v2395_v24 = vsel %vm1398_vm6, %v2393_v40, %v2394_v15  ;;  %v7706_v59 = vmax.f32 %v7495_v44, %v7672_v60  ;;  %v2612_v9 = vrot.slane %v2502_v19, 2 }
 0x208   : > { %1089 = vst.msk [vmem:[#allocation2 + $0x20] sm:$0xff] %vm1084_vm4, %v9705_v30  ;;  %v2620_v10 = vrot.slane %v2507_v49, 2  ;;  %v2505_v42 = vmax.f32 %v2297_v17, %v2395_v24  ;;  %v7713_v23 = vsel %vm1237_vm10, %v3150_v1, -inf  ;;  %v7717_v3 = vmax.f32 %v7263_v29, %v7666_v54  ;;  %v9709_v49 = vld [vmem:[#allocation61_spill] sm:$0xff]  ;;  %v9711_v30 = vld [vmem:[#allocation24_spill] sm:$0xff] }
 0x209   : > { %v2618_v46 = vrot.slane %v2506_v56, 2  ;;  %1091 = vst.msk [vmem:[#allocation2 + $0x30] sm:$0xff] %vm1084_vm4, %v9707_v2  ;;  %v2758_v15 = vsel %vm359_vm0, %v2756_v31, %v2757_v21  ;;  %v2614_v28 = vsel %vm1623_vm11, %v2612_v9, %v2613_v0  ;;  %v2761_v63 = vrot.slane %v2297_v17, 4  ;;  %v9713_v21 = vld [vmem:[#allocation22_spill] sm:$0xff] }
 0x20a   : > { %1092 = vst.msk [vmem:[#allocation2 + $0x38] sm:$0xff] %vm1084_vm4, %v9708_v13  ;;  %v2617_v40 = vrot.slane %v2505_v42, 2  ;;  %v9710_v57 = vrot.slane %v9709_v49, 6  ;;  %v9712_v29 = vrot.slane %v9711_v30, 6  ;;  %v7735_v52 = vmax.f32 %v2122_v58, %v7666_v54  ;;  %v9714_v13 = vld [vmem:[#allocation25_spill] sm:$0xff]  ;;  %v9715_v49 = vld [vmem:[#allocation31_spill] sm:$0xff] }
 0x20b   : > { %v2621_v50 = vsel %vm1623_vm11, %v2618_v46, %v2620_v10  ;;  %1093 = vst.msk [vmem:[#allocation2 + $0x40] sm:$0xff] %vm1084_vm4, %v9713_v21  ;;  %v2703_v31 = vmax.f32 %v2502_v19, %v2614_v28  ;;  %v2765_v17 = vsel %vm359_vm0, %v2762_v51, %v2764_v27  ;;  %v3067_v2 = vmax.f32 %v7679_v35, %v7706_v59  ;;  %v9717_v19 = vld [vmem:[#allocation38_spill] sm:$0xff]  ;;  %v9721_v21 = vld [vmem:[#allocation36_spill] sm:$0xff] }
 0x20c   : > { %v7732_v24 = vsel %vm1237_vm10, %v9712_v29, %v9710_v57  ;;  %v2706_v9 = vmax.f32 %v2506_v56, %v2621_v50  ;;  %1094 = vst.msk [vmem:[#allocation2 + $0x48] sm:$0xff] %vm1084_vm4, %v9714_v13  ;;  %v2619_v58 = vsel %vm1623_vm11, %v2617_v40, %v2618_v46  ;;  %v9718_v28 = vrot.slane %v9717_v19, 1  ;;  %v9719_v30 = vld [vmem:[#allocation34_spill] sm:$0xff] }
 0x20d   : > { %v1465_v0 = vrot.slane %v7732_v24, 1  ;;  %1095 = vst.msk [vmem:[#allocation2 + $0x50] sm:$0xff] %vm1084_vm4, %v9715_v49  ;;  %v2705_v10 = vmax.f32 %v2505_v42, %v2619_v58  ;;  %v7749_v57 = vmax.f32 %v2703_v31, %v2758_v15  ;;  %v9720_v27 = vrot.slane %v9719_v30, 1  ;;  %v9722_v15 = vld [vmem:[#allocation41_spill] sm:$0xff] }
 0x20e   : > { %v7757_v50 = vmax.f32 %v2706_v9, %v2765_v17  ;;  %1096 = vst.msk [vmem:[#allocation2 + $0x58] sm:$0xff] %vm1084_vm4, %v9721_v21  ;;  %v2763_v46 = vsel %vm359_vm0, %v2761_v63, %v2762_v51  ;;  %v2221_v9 = vrot.slane %v7686_v55, 6  ;;  %v3056_v51 = vmax.f32 %v7165_v45, %v7386_v26  ;;  %v9725_v17 = vld [vmem:[#allocation44_spill] sm:$0xff]  ;;  %v9727_v49 = vld [vmem:[#allocation29_spill] sm:$0xff] }
 0x20f   : > { %9716 = vst [vmem:[#allocation35_spill] sm:$0xff] %v7749_v57  ;;  %v1466_v56 = vsel %vm1398_vm6, %v9718_v28, %v1465_v0  ;;  %v1468_v29 = vsel %vm1398_vm6, %v1465_v0, %v9720_v27  ;;  %v7768_v31 = vmax.f32 %v2705_v10, %v2763_v46  ;;  %v2151_v0 = vmax.f32 %v2119_v22, %v7201_v41  ;;  %v9726_v22 = vld [vmem:[#allocation52_spill] sm:$0xff] }
 0x210   : > { %v1566_v40 = vmax.f32 %v9717_v19, %v1466_v56  ;;  %v7764_v42 = vmax.f32 %v7732_v24, %v1468_v29  ;;  %1097 = vst.msk [vmem:[#allocation2 + $0x60] sm:$0xff] %vm1084_vm4, %v9722_v15  ;;  %v7778_v63 = vmax.f32 %v3067_v2, %v7757_v50  ;;  %2931 = vrot.lane.b32.xlu1 %v7757_v50, %s5281_s6  ;;  %v9369_v37 = vrot.slane %v7732_v24, 4  ;;  %v9728_v29 = vld [vmem:[#allocation5_spill] sm:$0xff] }
 0x211   : > { %9723 = vst [vmem:[#allocation6_spill] sm:$0xff] %v7768_v31  ;;  %2929 = vrot.lane.b32.xlu0 %v7768_v31, %s5281_s6  ;;  %v2220_v45 = vrot.slane %v2151_v0, 6  ;;  %v7792_v55 = vsel %vm1237_vm10, %v2221_v9, -inf  ;;  %v3088_v2 = vmax.f32 %v3056_v51, %v7526_v39  ;;  %v1833_v28 = vrot.slane %v9717_v19, 4  ;;  %v9729_v51 = vld [vmem:[#allocation7_spill] sm:$0xff] }
 0x212   : > { %9724 = vst [vmem:[#allocation4_spill] sm:$0xff] %v7778_v63  ;;  %v1689_v13 = vrot.slane %v1566_v40, 2  ;;  %v1690_v58 = vrot.slane %v7764_v42, 2  ;;  %v2123_v56 = vmax.f32 %v7637_v4, %v7593_v16  ;;  %v2401_v27 = vrot.slane %v7792_v55, 1  ;;  %v9739_v63 = vld [vmem:[#allocation32_spill] sm:$0xff] }
 0x213   : > { %1098 = vst.msk [vmem:[#allocation2 + $0x68] sm:$0xff] %vm1084_vm4, %v9725_v17  ;;  %v7807_v46 = vsel %vm1237_vm10, %v2220_v45, %v2221_v9  ;;  %v2298_v15 = vsel %vm1237_vm10, -inf, %v2220_v45  ;;  %v3149_v0 = vrot.slane %v3088_v2, 6  ;;  %v1835_v19 = vsel %vm359_vm0, %v1833_v28, %v9369_v37  ;;  %v9730_v9 = vld [vmem:[#allocation8_spill] sm:$0xff]  ;;  %v9737_v37 = vld [vmem:[#allocation23_spill] sm:$0xff] }
 0x214   : > { %1099 = vst.msk [vmem:[#allocation2 + $0x70] sm:$0xff] %vm1084_vm4, %v9726_v22  ;;  %v1691_v10 = vsel %vm1623_vm11, %v1689_v13, %v1690_v58  ;;  %v2398_v4 = vrot.slane %v2298_v15, 1  ;;  %v2399_v17 = vrot.slane %v7807_v46, 1  ;;  %v3314_v13 = vrot.slane %v7713_v23, 1 }
 0x215   : > { %1100 = vst.msk [vmem:[#allocation2 + $0x78] sm:$0xff] %vm1084_vm4, %v9727_v49  ;;  %v1762_v21 = vmax.f32 %v1566_v40, %v1691_v10  ;;  %v7819_v40 = vmax.f32 %v7672_v60, %v7757_v50  ;;  %v7828_v45 = vsel %vm1237_vm10, %v3149_v0, %v3150_v1  ;;  %v3243_v2 = vsel %vm1237_vm10, -inf, %v3149_v0  ;;  %v9731_v49 = vld [vmem:[#allocation12_spill] sm:$0xff] }
 0x216   : > { %1101 = vst.msk [vmem:[#allocation2 + $0x80] sm:$0xff] %vm1084_vm4, %v9728_v29  ;;  %v2400_v10 = vsel %vm1398_vm6, %v2398_v4, %v2399_v17  ;;  %v2402_v28 = vsel %vm1398_vm6, %v2399_v17, %v2401_v27  ;;  %v3311_v29 = vrot.slane %v3243_v2, 1  ;;  %v3679_v0 = vrot.slane %v3243_v2, 4 }
 0x217   : > { %1102 = vst.msk [vmem:[#allocation2 + $0x88] sm:$0xff] %vm1084_vm4, %v9729_v51  ;;  %v7823_v22 = vmax.f32 %v1762_v21, %v1835_v19  ;;  %v3312_v51 = vrot.slane %v7828_v45, 1  ;;  %v2508_v1 = vmax.f32 %v2298_v15, %v2400_v10  ;;  %v2766_v21 = vrot.slane %v2298_v15, 4  ;;  %v9733_v19 = vld [vmem:[#allocation17_spill] sm:$0xff] }
 0x218   : > { %1103 = vst.msk [vmem:[#allocation2 + $0x90] sm:$0xff] %vm1084_vm4, %v9730_v9  ;;  %v9732_v9 = vld [vmem:[#allocation14_spill] sm:$0xff]  ;;  %v2509_v4 = vmax.f32 %v7807_v46, %v2402_v28  ;;  %v2767_v17 = vrot.slane %v7807_v46, 4  ;;  %v3680_v15 = vrot.slane %v7828_v45, 4  ;;  %v9736_v46 = vld [vmem:[#allocation39_spill] sm:$0xff]  ;;  %vm2993_vm7 = vcmask 48160  }
 0x219   : > { %1104 = vst.msk [vmem:[#allocation2 + $0x98] sm:$0xff] %vm1084_vm4, %v9731_v49  ;;  %v7839_v62 = vmax.f32 %v2123_v56, %v7823_v22  ;;  %1996 = vrot.lane.b32.xlu2 %v7823_v22, %s5280_s30  ;;  %v3313_v49 = vsel %vm1398_vm6, %v3311_v29, %v3312_v51  ;;  %v2622_v56 = vrot.slane %v2508_v1, 2  ;;  %v1692_v41 = vrot.slane %v9736_v46, 2 }
 0x21a   : > { %1105 = vst.msk [vmem:[#allocation2 + $0xa0] sm:$0xff] %vm1084_vm4, %v9732_v9  ;;  %v3315_v9 = vsel %vm1398_vm6, %v3312_v51, %v3314_v13  ;;  %v3437_v7 = vmax.f32 %v3243_v2, %v3313_v49  ;;  %v2623_v28 = vrot.slane %v2509_v4, 2  ;;  %v1836_v29 = vrot.slane %v9719_v30, 4 }
 0x21b   : > { %1106 = vst.msk [vmem:[#allocation2 + $0xa8] sm:$0xff] %vm1084_vm4, %v9733_v19  ;;  %v7852_v10 = vmax.f32 %v7828_v45, %v3315_v9  ;;  %v9735_v19 = vld [vmem:[#allocation21_spill] sm:$0xff]  ;;  %v2124_v51 = vmax.f32 %v7608_v6, %v7717_v3  ;;  %v3681_v45 = vsel %vm359_vm0, %v3679_v0, %v3680_v15  ;;  %v2510_v9 = vmax.f32 %v7792_v55, %v2401_v27 }
 0x21c   : > { %1108 = vst.msk [vmem:[#allocation2 + $0xb8] sm:$0xff] %vm1084_vm4, %v9735_v19  ;;  %v3535_v2 = vrot.slane %v3437_v7, 2  ;;  %v9738_v19 = vld [vmem:[#allocation28_spill] sm:$0xff]  ;;  %v2624_v46 = vsel %vm1623_vm11, %v2622_v56, %v2623_v28  ;;  %v2768_v30 = vsel %vm359_vm0, %v2766_v21, %v2767_v17  ;;  %v1693_v6 = vsel %vm1623_vm11, %v1690_v58, %v1692_v41 }
 0x21d   : > { %1109 = vst.msk [vmem:[#allocation2 + $0xc0] sm:$0xff] %vm1084_vm4, %v9737_v37  ;;  %v3536_v49 = vrot.slane %v7852_v10, 2  ;;  %v2769_v37 = vrot.slane %v7792_v55, 4  ;;  %v2707_v60 = vmax.f32 %v2508_v1, %v2624_v46  ;;  %v1763_v27 = vmax.f32 %v7764_v42, %v1693_v6  ;;  %v9745_v6 = vld [vmem:[#allocation62_spill] sm:$0xff] }
 0x21e   : > { %1110 = vst.msk [vmem:[#allocation2 + $0xc8] sm:$0xff] %vm1084_vm4, %v9738_v19  ;;  %v2625_v44 = vrot.slane %v2510_v9, 2  ;;  %v9740_v19 = vld [vmem:[#allocation40_spill] sm:$0xff]  ;;  %v9741_v21 = vrot.slane %v7732_v24, 4  ;;  %v3069_v58 = vmax.f32 %v7690_v32, %v7819_v40  ;;  %v3439_v41 = vmax.f32 %v7713_v23, %v3314_v13  ;;  %v1945_v24 = vpop.permute.xlu1 %1944 }
 0x21f   : > { %1111 = vst.msk [vmem:[#allocation2 + $0xd0] sm:$0xff] %vm1084_vm4, %v9739_v63  ;;  %v3537_v0 = vsel %vm1623_vm11, %v3535_v2, %v3536_v49  ;;  %v9742_v63 = vld [vmem:[#allocation43_spill] sm:$0xff]  ;;  %v7888_v55 = vmax.f32 %v2707_v60, %v2768_v30  ;;  %v9746_v13 = vrot.slane %v9745_v6, 6  ;;  %v7949_v6 = vmax.f32 %v7526_v39, %v7528_v8 }
 0x220   : > { %1112 = vst.msk [vmem:[#allocation2 + $0xd8] sm:$0xff] %vm1084_vm4, %v9740_v19  ;;  %v3644_v56 = vmax.f32 %v3437_v7, %v3537_v0  ;;  %v1837_v35 = vsel %vm359_vm0, %v9741_v21, %v1836_v29  ;;  %v2626_v1 = vsel %vm1623_vm11, %v2623_v28, %v2625_v44  ;;  %v3682_v7 = vrot.slane %v7713_v23, 4  ;;  %v9744_v2 = vld [vmem:[#allocation47_spill] sm:$0xff]  ;;  %v9750_v28 = vld [vmem:[#allocation33_spill] sm:$0xff] }
 0x221   : > { %1113 = vst.msk [vmem:[#allocation2 + $0xe0] sm:$0xff] %vm1084_vm4, %v9742_v63  ;;  %v7890_v42 = vmax.f32 %v1763_v27, %v1837_v35  ;;  %v2708_v9 = vmax.f32 %v2509_v4, %v2626_v1  ;;  %v3538_v46 = vrot.slane %v3439_v41, 2  ;;  %v9747_v0 = vld [vmem:[#allocation27_spill] sm:$0xff]  ;;  %v9749_v35 = vld [vmem:[#allocation16_spill] sm:$0xff]  ;;  %2933 = vrot.lane.b32.xlu1 %v7888_v55, %s5281_s6  ;;  %v2770_v4 = vsel %vm359_vm0, %v2767_v17, %v2769_v37  ;;  %v1987_v41 = vpop.permute.xlu2 %1986 }
 0x222   : > { %9743 = vst [vmem:[#allocation3_spill] sm:$0xff] %v7888_v55  ;;  %v3788_v29 = vmax.f32 %v3644_v56, %v3681_v45  ;;  %v9748_v19 = vrot.slane %v9747_v0, 6  ;;  %v7961_v0 = vmax.f32 %v7749_v57, %v7768_v31  ;;  %v9756_v39 = vmax.f32 %v7584_v20, %v7565_v38 }
 0x223   : > { %1114 = vst.msk [vmem:[#allocation2 + $0xe8] sm:$0xff] %vm1084_vm4, %v9744_v2  ;;  %v7909_v44 = vmax.f32 %v7666_v54, %v7890_v42  ;;  %v7912_v23 = vmax.f32 %v2124_v51, %v7890_v42  ;;  %1998 = vrot.lane.b32.xlu2 %v7890_v42, %s5280_s30  ;;  %v7920_v45 = vmax.f32 %v2708_v9, %v2770_v4  ;;  %vm3946_vm9 = vcmask 64560  }
 0x224   : > { %v7901_v60 = vsel %vm1237_vm10, %v9748_v19, %v9746_v13  ;;  %1115 = vst.msk [vmem:[#allocation2 + $0xf0] sm:$0xff] %vm1084_vm4, %v9749_v35  ;;  %3854 = vrot.lane.b32.xlu0 %v3788_v29, %s5282_s7  ;;  %v3539_v30 = vsel %vm1623_vm11, %v3536_v49, %v3538_v46  ;;  %v3683_v54 = vsel %vm359_vm0, %v3680_v15, %v3682_v7  ;;  %v9752_v49 = vrot.slane %v7735_v52, 6  ;;  %v1951_v7 = vpop.permute.xlu0 %1950  ;;  %v9754_v29 = vld [vmem:[#allocation42_spill] sm:$0xff] }
 0x225   : > { %1116 = vst.msk [vmem:[#allocation2 + $0xf8] sm:$0xff] %vm1084_vm4, %v9750_v28  ;;  %v9751_v27 = vmov %v9748_v19  ;;  %v9377_v56 = vrot.slane %v7912_v23, 6  ;;  %v3645_v17 = vmax.f32 %v7852_v10, %v3539_v30  ;;  %v1470_v21 = vrot.slane %v7901_v60, 1 }
 0x226   : > { %v1348_v51 = vsel %vm1237_vm10, -inf, %v9751_v27  ;;  %2041 = vst.msk [vmem:[#allocation2] sm:$0xff] %vm2040_vm5, %v1945_v24  ;;  %v7935_v15 = vsel %vm1237_vm10, %v9752_v49, -inf  ;;  %v7939_v1 = vmax.f32 %v3069_v58, %v7920_v45  ;;  %v9755_v9 = vrot.slane %v9754_v29, 1 }
 0x227   : > { %v1469_v37 = vrot.slane %v1348_v51, 1  ;;  %2061 = vst.msk [vmem:[#allocation2 + $0xa0] sm:$0xff] %vm2040_vm5, %v1985_v11  ;;  %v3789_v10 = vmax.f32 %v3645_v17, %v3683_v54  ;;  %v7954_v11 = vsel %vm1237_vm10, %v9377_v56, -inf  ;;  %v9379_v13 = vrot.slane %v7901_v60, 4  ;;  %v9757_v54 = vld [vmem:[#allocation48_spill] sm:$0xff] }
 0x228   : > { %9753 = vst [vmem:[#allocation9_spill] sm:$0xff] %v7939_v1  ;;  %v1473_v46 = vsel %vm1398_vm6, %v1470_v21, %v9755_v9  ;;  %v2153_v35 = vmax.f32 %v9756_v39, %v7326_v53  ;;  %v2097_v4 = vmax.f32 %v7326_v53, %v7823_v22  ;;  %v1838_v30 = vrot.slane %v1348_v51, 4 }
 0x229   : > { %2043 = vst.msk [vmem:[#allocation2 + $0x10] sm:$0xff] %vm2040_vm5, %v1949_v36  ;;  %v1471_v24 = vsel %vm1398_vm6, %v1469_v37, %v1470_v21  ;;  %v9378_v36 = vrot.slane %v7935_v15, 1  ;;  %v7964_v19 = vmax.f32 %v7901_v60, %v1473_v46  ;;  %v3058_v27 = vmax.f32 %v9757_v54, %v7540_v25  ;;  %2935 = vrot.lane.b32.xlu1 %v7920_v45, %s5281_s6 }
 0x22a   : > { %v1569_v58 = vmax.f32 %v1348_v51, %v1471_v24  ;;  %2062 = vst.msk [vmem:[#allocation2 + $0xa8] sm:$0xff] %vm2040_vm5, %v1987_v41  ;;  %v9376_v17 = vrot.slane %v7954_v11, 1  ;;  %v2223_v21 = vrot.slane %v2153_v35, 6  ;;  %v9758_v20 = vmax.f32 %v7321_v12, %v7602_v33 }
 0x22b   : > { %2044 = vst.msk [vmem:[#allocation2 + $0x18] sm:$0xff] %vm2040_vm5, %v1951_v7  ;;  %v9381_v37 = vrot.slane %v7964_v19, 2  ;;  %v7985_v53 = vmax.f32 %v7768_v31, %v7888_v55  ;;  %v7989_v51 = vmax.f32 %v7757_v50, %v7920_v45  ;;  %v1840_v49 = vsel %vm359_vm0, %v1838_v30, %v9379_v13 }
 0x22c   : > { %v1694_v28 = vrot.slane %v1569_v58, 2  ;;  %v3091_v41 = vmax.f32 %v9758_v20, %v7561_v43  ;;  %3856 = vrot.lane.b32.xlu0 %v3789_v10, %s5282_s7  ;;  %v3090_v7 = vmax.f32 %v3058_v27, %v7528_v8  ;;  %v9759_v24 = vrot.slane %v7735_v52, 6  ;;  %v9767_v43 = vld [vmem:[#allocation63_spill] sm:$0xff] }
 0x22d   : > { %v2299_v50 = vsel %vm1237_vm10, -inf, %v2223_v21  ;;  %v2125_v10 = vmax.f32 %v7565_v38, %v2097_v4  ;;  %v8010_v54 = vmax.f32 %v7954_v11, %v9376_v17  ;;  %v9760_v27 = vrot.slane %v9754_v29, 1 }
 0x22e   : > { %v1696_v12 = vsel %vm1623_vm11, %v1694_v28, %v9381_v37  ;;  %v8002_v9 = vsel %vm1237_vm10, %v2223_v21, %v9759_v24  ;;  %v3153_v46 = vrot.slane %v3091_v41, 6  ;;  %v2403_v35 = vrot.slane %v2299_v50, 1 }
 0x22f   : > { %v1764_v39 = vmax.f32 %v1569_v58, %v1696_v12  ;;  %v2404_v30 = vrot.slane %v8002_v9, 1  ;;  %v3152_v28 = vrot.slane %v3090_v7, 6  ;;  %v1571_v21 = vmax.f32 %v9754_v29, %v9760_v27  ;;  %v9761_v27 = vld [vmem:[#allocation51_spill] sm:$0xff] }
 0x230   : > { %v8013_v52 = vsel %vm1237_vm10, %v3153_v46, -inf  ;;  %v2771_v41 = vrot.slane %v2299_v50, 4  ;;  %vm4016_vm8 = vcmask 64512  }
 0x231   : > { %v1908_v20 = vmax.f32 %v1764_v39, %v1840_v49  ;;  %v2405_v58 = vsel %vm1398_vm6, %v2403_v35, %v2404_v30  ;;  %v2407_v38 = vsel %vm1398_vm6, %v2404_v30, %v9378_v36  ;;  %v8026_v7 = vsel %vm1237_vm10, %v3152_v28, %v3153_v46 }
 0x232   : > { %v2511_v12 = vmax.f32 %v2299_v50, %v2405_v58  ;;  %v8023_v24 = vmax.f32 %v8002_v9, %v2407_v38  ;;  %v3319_v2 = vrot.slane %v8013_v52, 1  ;;  %v3244_v35 = vsel %vm1237_vm10, -inf, %v3152_v28 }
 0x233   : > { %v2099_v17 = vmax.f32 %v7823_v22, %v1908_v20  ;;  %v2101_v49 = vmax.f32 %v1908_v20, %v9761_v27  ;;  %v8031_v39 = vmax.f32 %v2125_v10, %v1908_v20  ;;  %2000 = vrot.lane.b32.xlu2 %v1908_v20, %s5280_s30  ;;  %v3316_v58 = vrot.slane %v3244_v35, 1  ;;  %v1953_v10 = vpop.permute.xlu0 %1952 }
 0x234   : > { %v2627_v30 = vrot.slane %v2511_v12, 2  ;;  %v9380_v50 = vrot.slane %v8023_v24, 2  ;;  %v3317_v38 = vrot.slane %v8026_v7, 1  ;;  %v9386_v28 = vrot.slane %v8002_v9, 4  ;;  %2045 = vst.msk [vmem:[#allocation2 + $0x20] sm:$0xff] %vm2040_vm5, %v1953_v10 }
 0x235   : > { %v2127_v46 = vmax.f32 %v7593_v16, %v2099_v17  ;;  %v8038_v63 = vmax.f32 %v2097_v4, %v2101_v49  ;;  %v2131_v22 = vmax.f32 %v2099_v17, %v9761_v27  ;;  %v9382_v56 = vrot.slane %v8031_v39, 6 }
 0x236   : > { %v2629_v20 = vsel %vm1623_vm11, %v2627_v30, %v9380_v50  ;;  %v3318_v36 = vsel %vm1398_vm6, %v3316_v58, %v3317_v38  ;;  %v3320_v13 = vsel %vm1398_vm6, %v3317_v38, %v3319_v2  ;;  %v1697_v37 = vrot.slane %v1571_v21, 2 }
 0x237   : > { %v8052_v17 = vmax.f32 %v2127_v46, %v9761_v27  ;;  %v8057_v49 = vsel %vm1237_vm10, -inf, %v9382_v56  ;;  %v9385_v30 = vrot.slane %v8038_v63, 6  ;;  %v2709_v50 = vmax.f32 %v2511_v12, %v2629_v20 }
 0x238   : > { %v3440_v58 = vmax.f32 %v3244_v35, %v3318_v36  ;;  %v8061_v10 = vrot.slane %v2131_v22, 6  ;;  %v8064_v16 = vmax.f32 %v8026_v7, %v3320_v13  ;;  %v1841_v46 = vrot.slane %v9754_v29, 4 }
 0x239   : > { %v9384_v38 = vrot.slane %v8052_v17, 6  ;;  %v2773_v56 = vsel %vm359_vm0, %v2771_v41, %v9386_v28  ;;  %v3684_v27 = vrot.slane %v3244_v35, 4  ;;  %v2126_v36 = vmax.f32 %v7580_v14, %v7909_v44 }
 0x23a   : > { %v8074_v12 = vmax.f32 %v2709_v50, %v2773_v56  ;;  %v3540_v22 = vrot.slane %v3440_v58, 2  ;;  %v3541_v13 = vrot.slane %v8064_v16, 2  ;;  %v8085_v41 = vsel %vm1237_vm10, -inf, %v9385_v30  ;;  %v2898_v50 = vpop.permute.xlu2 %2897 }
 0x23b   : > { %v8080_v29 = vsel %vm1237_vm10, -inf, %v9384_v38  ;;  %v3685_v35 = vrot.slane %v8026_v7, 4  ;;  %v9762_v14 = vrot.slane %v7964_v19, 2  ;;  %v8093_v20 = vsel %vm1237_vm10, -inf, %v8061_v10  ;;  %2994 = vst.msk [vmem:[#allocation2] sm:$0xff] %vm2993_vm7, %v2898_v50 }
 0x23c   : > { %2937 = vrot.lane.b32.xlu1 %v8074_v12, %s5281_s6  ;;  %v3542_v21 = vsel %vm1623_vm11, %v3540_v22, %v3541_v13  ;;  %v9763_v4 = vrot.slane %v7901_v60, 4  ;;  %v3442_v22 = vmax.f32 %v8013_v52, %v3319_v2  ;;  %v9768_v2 = vrot.slane %v8023_v24, 2 }
 0x23d   : > { %v1698_v56 = vsel %vm1623_vm11, %v9762_v14, %v1697_v37  ;;  %v3646_v30 = vmax.f32 %v3440_v58, %v3542_v21  ;;  %v3686_v28 = vsel %vm359_vm0, %v3684_v27, %v3685_v35  ;;  %v9764_v37 = vrot.slane %v7935_v15, 1  ;;  %v9765_v58 = vld [vmem:[#allocation55_spill] sm:$0xff]  ;;  %v9766_v27 = vld [vmem:[#allocation37_spill] sm:$0xff] }
 0x23e   : > { %v1765_v38 = vmax.f32 %v7964_v19, %v1698_v56  ;;  %v1842_v7 = vsel %vm359_vm0, %v9763_v4, %v1841_v46  ;;  %v3687_v19 = vrot.slane %v8013_v52, 4  ;;  %v2774_v4 = vrot.slane %v7935_v15, 4 }
 0x23f   : > { %v2513_v14 = vmax.f32 %v7935_v15, %v9764_v37  ;;  %v3790_v60 = vmax.f32 %v3646_v30, %v3686_v28  ;;  %v2701_v46 = vmax.f32 %v9766_v27, %v9765_v58  ;;  %v3543_v28 = vrot.slane %v3442_v22, 2  ;;  %v9769_v30 = vld [vmem:[#allocation46_spill] sm:$0xff] }
 0x240   : > { %v1909_v31 = vmax.f32 %v1765_v38, %v1842_v7  ;;  %v8122_v15 = vsel %vm359_vm0, %v3685_v35, %v3687_v19  ;;  %v9771_v22 = vrot.slane %v8002_v9, 4  ;;  %v3071_v9 = vmax.f32 %v7706_v59, %v7989_v51 }
 0x241   : > { %v2630_v56 = vrot.slane %v2513_v14, 2  ;;  %3858 = vrot.lane.b32.xlu0 %v3790_v60, %s5282_s7  ;;  %v8125_v50 = vmax.f32 %v2701_v46, %v9769_v30  ;;  %v8132_v14 = vmax.f32 %v7888_v55, %v8074_v12  ;;  %v8139_v19 = vsel %vm1623_vm11, %v3541_v13, %v3543_v28 }
 0x242   : > { %v2100_v37 = vmax.f32 %v7890_v42, %v1909_v31  ;;  %v2102_v1 = vmax.f32 %v1909_v31, %v9767_v43  ;;  %v2158_v38 = vmax.f32 %v2126_v36, %v1909_v31  ;;  %2002 = vrot.lane.b32.xlu2 %v1909_v31, %s5280_s30  ;;  %v2775_v35 = vsel %vm359_vm0, %v9771_v22, %v2774_v4  ;;  %v1989_v13 = vpop.permute.xlu2 %1988  ;;  %v1955_v4 = vpop.permute.xlu0 %1954 }
 0x243   : > { %v2631_v52 = vsel %vm1623_vm11, %v9768_v2, %v2630_v56  ;;  %9770 = vst [vmem:[#allocation10_spill] sm:$0xff] %v8125_v50  ;;  %v9774_v59 = vrot.slane %v8057_v49, 1  ;;  %v9780_v55 = vrot.slane %v7912_v23, 6 }
 0x244   : > { %v2128_v42 = vmax.f32 %v7717_v3, %v2100_v37  ;;  %v2130_v7 = vmax.f32 %v7909_v44, %v2102_v1  ;;  %v2132_v36 = vmax.f32 %v2100_v37, %v9767_v43  ;;  %v2230_v31 = vrot.slane %v2158_v38, 6  ;;  %2063 = vst.msk [vmem:[#allocation2 + $0xb0] sm:$0xff] %vm2040_vm5, %v1989_v13 }
 0x245   : > { %v2710_v60 = vmax.f32 %v8023_v24, %v2631_v52  ;;  %v9772_v44 = vrot.slane %v8031_v39, 6  ;;  %v9773_v38 = vrot.slane %v8038_v63, 6  ;;  %2046 = vst.msk [vmem:[#allocation2 + $0x28] sm:$0xff] %vm2040_vm5, %v1955_v4 }
 0x246   : > { %v2160_v3 = vmax.f32 %v2128_v42, %v9767_v43  ;;  %v2236_v56 = vrot.slane %v2130_v7, 6  ;;  %v2239_v58 = vrot.slane %v2132_v36, 6  ;;  %v2317_v27 = vsel %vm1237_vm10, %v2230_v31, -inf }
 0x247   : > { %v8145_v1 = vsel %vm1237_vm10, %v9772_v44, %v2230_v31  ;;  %v8149_v46 = vmax.f32 %v2710_v60, %v2775_v35  ;;  %v2416_v42 = vrot.slane %v2317_v27, 1 }
 0x248   : > { %v2414_v24 = vrot.slane %v8145_v1, 1  ;;  %v2233_v37 = vrot.slane %v2160_v3, 6  ;;  %v8156_v39 = vsel %vm1237_vm10, %v9773_v38, %v2236_v56  ;;  %v8160_v2 = vsel %vm1237_vm10, %v8061_v10, %v2239_v58 }
 0x249   : > { %v2319_v52 = vsel %vm1237_vm10, %v2236_v56, -inf  ;;  %v2320_v28 = vsel %vm1237_vm10, %v2239_v58, -inf  ;;  %v9389_v63 = vrot.slane %v8156_v39, 1  ;;  %2939 = vrot.lane.b32.xlu1 %v8149_v46, %s5281_s6  ;;  %v9775_v10 = vrot.slane %v8052_v17, 6 }
 0x24a   : > { %v2415_v30 = vsel %vm1398_vm6, %v9774_v59, %v2414_v24  ;;  %v8178_v36 = vsel %vm1237_vm10, %v2233_v37, -inf  ;;  %v2426_v31 = vrot.slane %v2319_v52, 1  ;;  %v9390_v60 = vrot.slane %v8160_v2, 1  ;;  %v1957_v23 = vpop.permute.xlu0 %1956 }
 0x24b   : > { %v8175_v7 = vsel %vm1237_vm10, %v9775_v10, %v2233_v37  ;;  %v2417_v22 = vsel %vm1398_vm6, %v2414_v24, %v2416_v42  ;;  %v2421_v3 = vrot.slane %v8178_v36, 1  ;;  %v2431_v44 = vrot.slane %v2320_v28, 1  ;;  %2047 = vst.msk [vmem:[#allocation2 + $0x30] sm:$0xff] %vm2040_vm5, %v1957_v23 }
 0x24c   : > { %v9391_v35 = vrot.slane %v8175_v7, 1  ;;  %v2427_v17 = vsel %vm1398_vm6, %v9389_v63, %v2426_v31  ;;  %v8188_v56 = vmax.f32 %v8145_v1, %v2417_v22  ;;  %v2519_v58 = vmax.f32 %v2317_v27, %v2416_v42 }
 0x24d   : > { %v2525_v13 = vmax.f32 %v2319_v52, %v2426_v31  ;;  %v2432_v24 = vsel %vm1398_vm6, %v9390_v60, %v2431_v44  ;;  %v8197_v37 = vmax.f32 %v8156_v39, %v2427_v17  ;;  %v2782_v38 = vrot.slane %v8145_v1, 4 }
 0x24e   : > { %v2422_v4 = vsel %vm1398_vm6, %v9391_v35, %v2421_v3  ;;  %v8204_v10 = vmax.f32 %v8160_v2, %v2432_v24  ;;  %v2528_v42 = vmax.f32 %v2320_v28, %v2431_v44  ;;  %v2638_v31 = vrot.slane %v8188_v56, 2 }
 0x24f   : > { %v8201_v59 = vmax.f32 %v8175_v7, %v2422_v4  ;;  %v2640_v22 = vrot.slane %v2519_v58, 2  ;;  %v9393_v63 = vrot.slane %v8197_v37, 2  ;;  %v2650_v21 = vrot.slane %v2525_v13, 2 }
 0x250   : > { %9776 = vst [vmem:[#allocation15_spill] sm:$0xff] %v8204_v10  ;;  %v8210_v60 = vmax.f32 %v8125_v50, %v7749_v57  ;;  %v8213_v17 = vmax.f32 %v8178_v36, %v2421_v3  ;;  %v9392_v1 = vrot.slane %v8204_v10, 2  ;;  %v2655_v4 = vrot.slane %v2528_v42, 2 }
 0x251   : > { %v2784_v35 = vrot.slane %v2317_v27, 4  ;;  %v8217_v24 = vsel %vm1623_vm11, %v2638_v31, %v2640_v22  ;;  %v8222_v44 = vsel %vm1623_vm11, %v9393_v63, %v2650_v21  ;;  %v9394_v58 = vrot.slane %v8156_v39, 4 }
 0x252   : > { %9777 = vst [vmem:[#allocation18_spill] sm:$0xff] %v8210_v60  ;;  %v2794_v13 = vrot.slane %v2319_v52, 4  ;;  %v8228_v3 = vsel %vm1623_vm11, %v9392_v1, %v2655_v4  ;;  %v9397_v4 = vrot.slane %v8160_v2, 4  ;;  %v2799_v1 = vrot.slane %v2320_v28, 4 }
 0x253   : > { %9778 = vst [vmem:[#allocation20_spill] sm:$0xff] %v8228_v3  ;;  %v8235_v22 = vsel %vm359_vm0, %v2782_v38, %v2784_v35  ;;  %v8247_v63 = vmax.f32 %v7920_v45, %v8149_v46  ;;  %v3647_v27 = vmax.f32 %v8064_v16, %v8139_v19  ;;  %v3070_v35 = vmax.f32 %v8210_v60, %v7985_v53 }
 0x254   : > { %v8242_v52 = vsel %vm359_vm0, %v9394_v58, %v2794_v13  ;;  %v3103_v21 = vmax.f32 %v3071_v9, %v8149_v46  ;;  %v8257_v13 = vsel %vm359_vm0, %v9397_v4, %v2799_v1  ;;  %v2226_v58 = vrot.slane %v7839_v62, 6 }
 0x255   : > { %v2517_v28 = vmax.f32 %v8057_v49, %v2415_v30  ;;  %v9779_v45 = vrot.slane %v8057_v49, 4  ;;  %v3791_v19 = vmax.f32 %v3647_v27, %v8122_v15  ;;  %v3102_v9 = vmax.f32 %v3070_v35, %v8074_v12  ;;  %v1991_v35 = vpop.permute.xlu2 %1990 }
 0x256   : > { %v3171_v43 = vrot.slane %v3103_v21, 6  ;;  %v2228_v1 = vsel %vm1237_vm10, %v2226_v58, %v9780_v55  ;;  %v2300_v62 = vsel %vm1237_vm10, -inf, %v2226_v58  ;;  %v9781_v30 = vrot.slane %v7206_v48, 1  ;;  %2064 = vst.msk [vmem:[#allocation2 + $0xb8] sm:$0xff] %vm2040_vm5, %v1991_v35 }
 0x257   : > { %v2783_v42 = vsel %vm359_vm0, %v9779_v45, %v2782_v38  ;;  %v2637_v4 = vrot.slane %v2517_v28, 2  ;;  %v9782_v49 = vrot.slane %v7659_v34, 1  ;;  %3860 = vrot.lane.b32.xlu0 %v3791_v19, %s5282_s7  ;;  %v3170_v45 = vrot.slane %v3102_v9, 6 }
 0x258   : > { %v3266_v15 = vsel %vm1237_vm10, %v3171_v43, -inf  ;;  %v2408_v27 = vrot.slane %v2300_v62, 1  ;;  %v2409_v21 = vrot.slane %v2228_v1, 1  ;;  %v2776_v60 = vrot.slane %v2300_v62, 4 }
 0x259   : > { %v2380_v38 = vsel %vm1398_vm6, %v9782_v49, %v9781_v30  ;;  %v3349_v16 = vrot.slane %v3266_v15, 1  ;;  %v3717_v55 = vrot.slane %v3266_v15, 4  ;;  %v2639_v58 = vsel %vm1623_vm11, %v2637_v4, %v2638_v31 }
 0x25a   : > { %v8282_v57 = vsel %vm1237_vm10, %v3170_v45, %v3171_v43  ;;  %v2410_v30 = vsel %vm1398_vm6, %v2408_v27, %v2409_v21  ;;  %v9783_v19 = vrot.slane %v7954_v11, 1  ;;  %v2713_v49 = vmax.f32 %v2517_v28, %v2639_v58 }
 0x25b   : > { %v3347_v32 = vrot.slane %v8282_v57, 1  ;;  %v3460_v50 = vmax.f32 %v3266_v15, %v3349_v16  ;;  %v3715_v31 = vrot.slane %v8282_v57, 4  ;;  %v2514_v4 = vmax.f32 %v2300_v62, %v2410_v30 }
 0x25c   : > { %v2412_v9 = vsel %vm1398_vm6, %v2409_v21, %v9783_v19  ;;  %v2777_v35 = vrot.slane %v2228_v1, 4  ;;  %v8291_v3 = vmax.f32 %v2713_v49, %v2783_v42  ;;  %v2496_v43 = vmax.f32 %v7659_v34, %v2380_v38  ;;  %v2900_v19 = vpop.permute.xlu1 %2899 }
 0x25d   : > { %v2515_v25 = vmax.f32 %v2228_v1, %v2412_v9  ;;  %v3350_v10 = vsel %vm1398_vm6, %v3347_v32, %v3349_v16  ;;  %v3573_v21 = vrot.slane %v3460_v50, 2  ;;  %v2632_v28 = vrot.slane %v2514_v4, 2  ;;  %2995 = vst.msk [vmem:[#allocation2 + $0x8] sm:$0xff] %vm2993_vm7, %v2900_v19 }
 0x25e   : > { %v8297_v23 = vmax.f32 %v8282_v57, %v3350_v10  ;;  %v2778_v15 = vsel %vm359_vm0, %v2776_v60, %v2777_v35  ;;  %v9784_v62 = vrot.slane %v7954_v11, 4  ;;  %v3718_v42 = vsel %vm359_vm0, %v3715_v31, %v3717_v55 }
 0x25f   : > { %v2633_v58 = vrot.slane %v2515_v25, 2  ;;  %v2602_v38 = vrot.slane %v2496_v43, 2  ;;  %v9785_v30 = vrot.slane %v7206_v48, 4  ;;  %v9786_v50 = vrot.slane %v7659_v34, 4  ;;  %v1993_v34 = vpop.permute.xlu2 %1992 }
 0x260   : > { %v2780_v1 = vsel %vm359_vm0, %v2777_v35, %v9784_v62  ;;  %v9787_v10 = vmax.f32 %v7427_v18, %v7615_v47  ;;  %v9408_v11 = vrot.slane %v8297_v23, 2  ;;  %v9788_v49 = vrot.slane %v8010_v54, 2  ;;  %v1959_v35 = vpop.permute.xlu0 %1958  ;;  %2065 = vst.msk [vmem:[#allocation2 + $0xc0] sm:$0xff] %vm2040_vm5, %v1993_v34 }
 0x261   : > { %v2748_v16 = vsel %vm359_vm0, %v9786_v50, %v9785_v30  ;;  %v2634_v9 = vsel %vm1623_vm11, %v2632_v28, %v2633_v58  ;;  %v3072_v48 = vmax.f32 %v7961_v0, %v8132_v14  ;;  %v9789_v18 = vrot.slane %v7240_v61, 2  ;;  %2048 = vst.msk [vmem:[#allocation2 + $0x38] sm:$0xff] %vm2040_vm5, %v1959_v35 }
 0x262   : > { %v3093_v60 = vmax.f32 %v9787_v10, %v7575_v5  ;;  %v2636_v55 = vsel %vm1623_vm11, %v2633_v58, %v9788_v49  ;;  %v2711_v62 = vmax.f32 %v2514_v4, %v2634_v9  ;;  %v3574_v54 = vsel %vm1623_vm11, %v9408_v11, %v3573_v21 }
 0x263   : > { %v2712_v30 = vmax.f32 %v2515_v25, %v2636_v55  ;;  %v2604_v50 = vsel %vm1623_vm11, %v2602_v38, %v9789_v18  ;;  %v3060_v58 = vmax.f32 %v7386_v26, %v7949_v6  ;;  %v3250_v19 = vsel %vm1237_vm10, -inf, %v3170_v45 }
 0x264   : > { %v3156_v10 = vrot.slane %v3093_v60, 6  ;;  %v2699_v28 = vmax.f32 %v2496_v43, %v2604_v50  ;;  %v3659_v25 = vmax.f32 %v8297_v23, %v3574_v54  ;;  %v2855_v61 = vmax.f32 %v2711_v62, %v2778_v15 }
 0x265   : > { %v8335_v4 = vmax.f32 %v2712_v30, %v2780_v1  ;;  %v3346_v21 = vrot.slane %v3250_v19, 1  ;;  %v9790_v1 = vmax.f32 %v7819_v40, %v8247_v63  ;;  %v3714_v62 = vrot.slane %v3250_v19, 4 }
 0x266   : > { %v3261_v38 = vsel %vm1237_vm10, %v3156_v10, -inf  ;;  %v8338_v60 = vmax.f32 %v2699_v28, %v2748_v16  ;;  %v3803_v43 = vmax.f32 %v3659_v25, %v3718_v42  ;;  %v8341_v55 = vmax.f32 %v8074_v12, %v2855_v61  ;;  %2941 = vrot.lane.b32.xlu1 %v2855_v61, %s5281_s6 }
 0x267   : > { %v3324_v9 = vrot.slane %v3261_v38, 1  ;;  %v3692_v49 = vrot.slane %v3261_v38, 4  ;;  %v8344_v26 = vmax.f32 %v2855_v61, %v8291_v3  ;;  %v3104_v45 = vmax.f32 %v3072_v48, %v2855_v61 }
 0x268   : > { %v3092_v15 = vmax.f32 %v3060_v58, %v8338_v60  ;;  %v3105_v16 = vmax.f32 %v9790_v1, %v8335_v4  ;;  %v3348_v35 = vsel %vm1398_vm6, %v3346_v21, %v3347_v32  ;;  %3884 = vrot.lane.b32.xlu2 %v3803_v43, %s5282_s7  ;;  %v9791_v48 = vmax.f32 %v8188_v56, %v8217_v24  ;;  %v1979_v32 = vpop.permute.xlu2 %1978 }
 0x269   : > { %v3445_v34 = vmax.f32 %v3261_v38, %v3324_v9  ;;  %v3173_v12 = vrot.slane %v3104_v45, 6  ;;  %v8354_v42 = vmax.f32 %v3250_v19, %v3348_v35  ;;  %v8364_v40 = vmax.f32 %v8149_v46, %v8335_v4  ;;  %2058 = vst.msk [vmem:[#allocation2 + $0x88] sm:$0xff] %vm2040_vm5, %v1979_v32 }
 0x26a   : > { %v8360_v30 = vmax.f32 %v9791_v48, %v8235_v22  ;;  %v3155_v18 = vrot.slane %v3092_v15, 6  ;;  %v3174_v50 = vrot.slane %v3105_v16, 6  ;;  %v3716_v19 = vsel %vm359_vm0, %v3714_v62, %v3715_v31 }
 0x26b   : > { %v3548_v54 = vrot.slane %v3445_v34, 2  ;;  %v3251_v28 = vsel %vm1237_vm10, -inf, %v3173_v12  ;;  %v3570_v58 = vrot.slane %v8354_v42, 2  ;;  %v3074_v56 = vmax.f32 %v7985_v53, %v8341_v55 }
 0x26c   : > { %v3157_v24 = vsel %vm1237_vm10, %v3155_v18, %v3156_v10  ;;  %v3245_v22 = vsel %vm1237_vm10, -inf, %v3155_v18  ;;  %v3175_v46 = vsel %vm1237_vm10, %v3173_v12, %v3174_v50  ;;  %v3267_v25 = vsel %vm1237_vm10, %v3174_v50, -inf }
 0x26d   : > { %v3321_v61 = vrot.slane %v3245_v22, 1  ;;  %v3322_v38 = vrot.slane %v3157_v24, 1  ;;  %v3689_v21 = vrot.slane %v3245_v22, 4  ;;  %v3690_v43 = vrot.slane %v3157_v24, 4 }
 0x26e   : > { %v3351_v57 = vrot.slane %v3251_v28, 1  ;;  %v3352_v45 = vrot.slane %v3175_v46, 1  ;;  %v3354_v31 = vrot.slane %v3267_v25, 1  ;;  %v3719_v15 = vrot.slane %v3251_v28, 4  ;;  %2943 = vrot.lane.b32.xlu1 %v8335_v4, %s5281_s6 }
 0x26f   : > { %v3323_v53 = vsel %vm1398_vm6, %v3321_v61, %v3322_v38  ;;  %v3325_v1 = vsel %vm1398_vm6, %v3322_v38, %v3324_v9  ;;  %v3691_v10 = vsel %vm359_vm0, %v3689_v21, %v3690_v43  ;;  %v3720_v16 = vrot.slane %v3175_v46, 4  ;;  %v2902_v61 = vpop.permute.xlu1 %2901 }
 0x270   : > { %v3443_v34 = vmax.f32 %v3245_v22, %v3323_v53  ;;  %v3444_v35 = vmax.f32 %v3157_v24, %v3325_v1  ;;  %v3353_v12 = vsel %vm1398_vm6, %v3351_v57, %v3352_v45  ;;  %v3355_v62 = vsel %vm1398_vm6, %v3352_v45, %v3354_v31  ;;  %2996 = vst.msk [vmem:[#allocation2 + $0x10] sm:$0xff] %vm2993_vm7, %v2902_v61  ;;  %v1981_v11 = vpop.permute.xlu2 %1980 }
 0x271   : > { %v3461_v48 = vmax.f32 %v3251_v28, %v3353_v12  ;;  %v3462_v18 = vmax.f32 %v3175_v46, %v3355_v62  ;;  %v3721_v50 = vsel %vm359_vm0, %v3719_v15, %v3720_v16  ;;  %v3693_v32 = vsel %vm359_vm0, %v3690_v43, %v3692_v49  ;;  %2059 = vst.msk [vmem:[#allocation2 + $0x90] sm:$0xff] %vm2040_vm5, %v1981_v11 }
 0x272   : > { %v3545_v9 = vrot.slane %v3443_v34, 2  ;;  %v3546_v38 = vrot.slane %v3444_v35, 2  ;;  %v3463_v21 = vmax.f32 %v3267_v25, %v3354_v31  ;;  %v3722_v27 = vrot.slane %v3267_v25, 4 }
 0x273   : > { %v3575_v22 = vrot.slane %v3461_v48, 2  ;;  %v3576_v24 = vrot.slane %v3462_v18, 2  ;;  %v9792_v57 = vrot.slane %v8297_v23, 2  ;;  %v3075_v28 = vmax.f32 %v7989_v51, %v8364_v40 }
 0x274   : > { %v3547_v49 = vsel %vm1623_vm11, %v3545_v9, %v3546_v38  ;;  %v3549_v46 = vsel %vm1623_vm11, %v3546_v38, %v3548_v54  ;;  %v3578_v43 = vrot.slane %v3463_v21, 2  ;;  %v3723_v25 = vsel %vm359_vm0, %v3720_v16, %v3722_v27 }
 0x275   : > { %v3572_v45 = vsel %vm1623_vm11, %v3570_v58, %v9792_v57  ;;  %v3648_v31 = vmax.f32 %v3443_v34, %v3547_v49  ;;  %v3577_v15 = vsel %vm1623_vm11, %v3575_v22, %v3576_v24  ;;  %v3649_v53 = vmax.f32 %v3444_v35, %v3549_v46 }
 0x276   : > { %v3658_v23 = vmax.f32 %v8354_v42, %v3572_v45  ;;  %v3660_v1 = vmax.f32 %v3461_v48, %v3577_v15  ;;  %v3579_v58 = vsel %vm1623_vm11, %v3576_v24, %v3578_v43  ;;  %v3106_v51 = vmax.f32 %v3074_v56, %v8291_v3 }
 0x277   : > { %v3107_v11 = vmax.f32 %v3075_v28, %v8360_v30  ;;  %v3792_v12 = vmax.f32 %v3648_v31, %v3691_v10  ;;  %v3793_v62 = vmax.f32 %v3649_v53, %v3693_v32  ;;  %v3661_v61 = vmax.f32 %v3462_v18, %v3579_v58  ;;  %v2904_v42 = vpop.permute.xlu1 %2903 }
 0x278   : > { %v3802_v54 = vmax.f32 %v3658_v23, %v3716_v19  ;;  %v2789_v9 = vrot.slane %v8178_v36, 4  ;;  %v3804_v27 = vmax.f32 %v3660_v1, %v3721_v50  ;;  %v3176_v16 = vrot.slane %v3106_v51, 6  ;;  %2997 = vst.msk [vmem:[#allocation2 + $0x18] sm:$0xff] %vm2993_vm7, %v2904_v42  ;;  %v1983_v21 = vpop.permute.xlu2 %1982 }
 0x279   : > { %v3177_v34 = vrot.slane %v3107_v11, 6  ;;  %3862 = vrot.lane.b32.xlu0 %v3792_v12, %s5282_s7  ;;  %v3805_v35 = vmax.f32 %v3661_v61, %v3723_v25  ;;  %v9793_v48 = vrot.slane %v8175_v7, 1  ;;  %v9794_v56 = vrot.slane %v8080_v29, 1  ;;  %2060 = vst.msk [vmem:[#allocation2 + $0x98] sm:$0xff] %vm2040_vm5, %v1983_v21 }
 0x27a   : > { %3882 = vrot.lane.b32.xlu1 %v3802_v54, %s5282_s7  ;;  %v2643_v18 = vrot.slane %v8201_v59, 2  ;;  %v2787_v19 = vrot.slane %v8175_v7, 4  ;;  %3886 = vrot.lane.b32.xlu2 %v3804_v27, %s5282_s7  ;;  %v3252_v50 = vsel %vm1237_vm10, -inf, %v3176_v16  ;;  %v9795_v46 = vrot.slane %v8213_v17, 2 }
 0x27b   : > { %v2420_v10 = vsel %vm1398_vm6, %v9794_v56, %v9793_v48  ;;  %v3178_v36 = vsel %vm1237_vm10, %v3176_v16, %v3177_v34  ;;  %v3268_v32 = vsel %vm1237_vm10, %v3177_v34, -inf  ;;  %v3356_v22 = vrot.slane %v3252_v50, 1  ;;  %v1977_v56 = vpop.permute.xlu0 %1976 }
 0x27c   : > { %v2520_v38 = vmax.f32 %v8080_v29, %v2420_v10  ;;  %v3357_v24 = vrot.slane %v3178_v36, 1  ;;  %v3359_v57 = vrot.slane %v3268_v32, 1  ;;  %v3724_v45 = vrot.slane %v3252_v50, 4  ;;  %2057 = vst.msk [vmem:[#allocation2 + $0x80] sm:$0xff] %vm2040_vm5, %v1977_v56  ;;  %v9805_v56 = vld [vmem:[#allocation20_spill] sm:$0xff] }
 0x27d   : > { %v3725_v7 = vrot.slane %v3178_v36, 4  ;;  %v3727_v28 = vrot.slane %v3268_v32, 4  ;;  %v2646_v43 = vsel %vm1623_vm11, %v2643_v18, %v9795_v46  ;;  %v9796_v17 = vrot.slane %v8080_v29, 4 }
 0x27e   : > { %v2642_v49 = vrot.slane %v2520_v38, 2  ;;  %v3358_v25 = vsel %vm1398_vm6, %v3356_v22, %v3357_v24  ;;  %v3360_v31 = vsel %vm1398_vm6, %v3357_v24, %v3359_v57  ;;  %v3466_v15 = vmax.f32 %v3268_v32, %v3359_v57  ;;  %v9797_v57 = vld [vmem:[#allocation11_spill] sm:$0xff] }
 0x27f   : > { %v2716_v53 = vmax.f32 %v8201_v59, %v2646_v43  ;;  %v3464_v23 = vmax.f32 %v3252_v50, %v3358_v25  ;;  %v3465_v1 = vmax.f32 %v3178_v36, %v3360_v31  ;;  %v3726_v58 = vsel %vm359_vm0, %v3724_v45, %v3725_v7 }
 0x280   : > { %v3728_v51 = vsel %vm359_vm0, %v3725_v7, %v3727_v28  ;;  %v3583_v11 = vrot.slane %v3466_v15, 2  ;;  %v2644_v12 = vsel %vm1623_vm11, %v2642_v49, %v2643_v18  ;;  %v2788_v61 = vsel %vm359_vm0, %v9796_v17, %v2787_v19  ;;  %v1995_v36 = vpop.permute.xlu2 %1994 }
 0x281   : > { %v2790_v54 = vsel %vm359_vm0, %v2787_v19, %v2789_v9  ;;  %v3580_v27 = vrot.slane %v3464_v23, 2  ;;  %v3581_v16 = vrot.slane %v3465_v1, 2  ;;  %v2715_v34 = vmax.f32 %v2520_v38, %v2644_v12  ;;  %3864 = vrot.lane.b32.xlu0 %v3793_v62, %s5282_s7  ;;  %v2906_v9 = vpop.permute.xlu1 %2905  ;;  %2066 = vst.msk [vmem:[#allocation2 + $0xc8] sm:$0xff] %vm2040_vm5, %v1995_v36 }
 0x282   : > { %v8432_v42 = vmax.f32 %v2716_v53, %v2790_v54  ;;  %v2423_v59 = vrot.slane %v8085_v41, 1  ;;  %2945 = vrot.lane.b32.xlu1 %v8291_v3, %s5281_s6  ;;  %v8440_v48 = vmax.f32 %v8335_v4, %v8360_v30  ;;  %v3076_v29 = vmax.f32 %v8132_v14, %v8344_v26  ;;  %3888 = vrot.lane.b32.xlu2 %v3805_v35, %s5282_s7 }
 0x283   : > { %v2428_v10 = vrot.slane %v8093_v20, 1  ;;  %v3582_v18 = vsel %vm1623_vm11, %v3580_v27, %v3581_v16  ;;  %v3584_v62 = vsel %vm1623_vm11, %v3581_v16, %v3583_v11  ;;  %v8448_v19 = vmax.f32 %v2715_v34, %v2788_v61  ;;  %2998 = vst.msk [vmem:[#allocation2 + $0x20] sm:$0xff] %vm2993_vm7, %v2906_v9  ;;  %v9804_v9 = vld [vmem:[#allocation15_spill] sm:$0xff] }
 0x284   : > { %v2791_v4 = vrot.slane %v8085_v41, 4  ;;  %v3662_v50 = vmax.f32 %v3464_v23, %v3582_v18  ;;  %v3663_v32 = vmax.f32 %v3465_v1, %v3584_v62  ;;  %v3077_v14 = vmax.f32 %v8247_v63, %v8440_v48 }
 0x285   : > { %v2796_v35 = vrot.slane %v8093_v20, 4  ;;  %v3108_v38 = vmax.f32 %v3076_v29, %v8448_v19  ;;  %v3063_v45 = vmax.f32 %v7602_v33, %v9797_v57  ;;  %v9798_v49 = vrot.slane %v8156_v39, 1 }
 0x286   : > { %v3806_v21 = vmax.f32 %v3662_v50, %v3726_v58  ;;  %v3807_v22 = vmax.f32 %v3663_v32, %v3728_v51  ;;  %v3109_v24 = vmax.f32 %v3077_v14, %v8432_v42  ;;  %v9799_v46 = vrot.slane %v8160_v2, 1  ;;  %v9802_v51 = vld [vmem:[#allocation49_spill] sm:$0xff] }
 0x287   : > { %v3179_v7 = vrot.slane %v3108_v38, 6  ;;  %v2425_v63 = vsel %vm1398_vm6, %v2423_v59, %v9798_v49  ;;  %v9800_v25 = vrot.slane %v8156_v39, 4  ;;  %v9801_v1 = vrot.slane %v8160_v2, 4 }
 0x288   : > { %v3180_v28 = vrot.slane %v3109_v24, 6  ;;  %v2430_v43 = vsel %vm1398_vm6, %v2428_v10, %v9799_v46  ;;  %v2523_v53 = vmax.f32 %v8085_v41, %v2425_v63  ;;  %v1997_v27 = vpop.permute.xlu2 %1996  ;;  %v9803_v59 = vmax.f32 %v8197_v37, %v8222_v44 }
 0x289   : > { %v2793_v31 = vsel %vm359_vm0, %v2791_v4, %v9800_v25  ;;  %v3253_v15 = vsel %vm1237_vm10, -inf, %v3179_v7  ;;  %v2526_v23 = vmax.f32 %v8093_v20, %v2430_v43  ;;  %v2798_v58 = vsel %vm359_vm0, %v2796_v35, %v9801_v1  ;;  %1960 = vrot.lane.b32.xlu0 %v9802_v51, %s5280_s30  ;;  %v2908_v61 = vpop.permute.xlu1 %2907  ;;  %2067 = vst.msk [vmem:[#allocation2 + $0xd0] sm:$0xff] %vm2040_vm5, %v1997_v27  ;;  %v3851_v1 = vpop.permute.xlu0 %3850 }
 0x28a   : > { %2913 = vrot.lane.b32.xlu1 %v7528_v8, %s5281_s6  ;;  %v3181_v39 = vsel %vm1237_vm10, %v3179_v7, %v3180_v28  ;;  %v3269_v11 = vsel %vm1237_vm10, %v3180_v28, -inf  ;;  %v3361_v12 = vrot.slane %v3253_v15, 1  ;;  %v3729_v17 = vrot.slane %v3253_v15, 4  ;;  %3890 = vrot.lane.b32.xlu2 %v3806_v21, %s5282_s7  ;;  %2999 = vst.msk [vmem:[#allocation2 + $0x28] sm:$0xff] %vm2993_vm7, %v2908_v61 }
 0x28b   : > { %v3362_v41 = vrot.slane %v3181_v39, 1  ;;  %v3364_v20 = vrot.slane %v3269_v11, 1  ;;  %v3730_v2 = vrot.slane %v3181_v39, 4  ;;  %v3732_v54 = vrot.slane %v3269_v11, 4  ;;  %3947 = vst.msk [vmem:[#allocation2] sm:$0xff] %vm3946_vm9, %v3851_v1 }
 0x28c   : > { %v2647_v16 = vrot.slane %v2523_v53, 2  ;;  %v2652_v34 = vrot.slane %v2526_v23, 2  ;;  %v8488_v29 = vmax.f32 %v9803_v59, %v8242_v52  ;;  %v9806_v10 = vmax.f32 %v9804_v9, %v9805_v56 }
 0x28d   : > { %v3363_v62 = vsel %vm1398_vm6, %v3361_v12, %v3362_v41  ;;  %v3365_v36 = vsel %vm1398_vm6, %v3362_v41, %v3364_v20  ;;  %v3731_v4 = vsel %vm359_vm0, %v3729_v17, %v3730_v2  ;;  %v3469_v50 = vmax.f32 %v3269_v11, %v3364_v20  ;;  %v9811_v17 = vld [vmem:[#allocation45_spill] sm:$0xff] }
 0x28e   : > { %v8494_v18 = vmax.f32 %v9806_v10, %v8257_v13  ;;  %v3467_v32 = vmax.f32 %v3253_v15, %v3363_v62  ;;  %v3468_v14 = vmax.f32 %v3181_v39, %v3365_v36  ;;  %v3733_v44 = vsel %vm359_vm0, %v3730_v2, %v3732_v54  ;;  %v9809_v15 = vld [vmem:[#allocation50_spill] sm:$0xff] }
 0x28f   : > { %v9807_v52 = vrot.slane %v8197_v37, 2  ;;  %v3588_v38 = vrot.slane %v3469_v50, 2  ;;  %v9808_v13 = vrot.slane %v9804_v9, 2  ;;  %v3050_v7 = vmax.f32 %v8291_v3, %v8448_v19  ;;  %v9813_v9 = vld [vmem:[#allocation26_spill] sm:$0xff] }
 0x290   : > { %v3585_v28 = vrot.slane %v3467_v32, 2  ;;  %v3586_v49 = vrot.slane %v3468_v14, 2  ;;  %v3051_v46 = vmax.f32 %v8360_v30, %v8432_v42  ;;  %v3055_v37 = vmax.f32 %v8488_v29, %v8494_v18  ;;  %v1999_v11 = vpop.permute.xlu2 %1998 }
 0x291   : > { %v2649_v35 = vsel %vm1623_vm11, %v2647_v16, %v9807_v52  ;;  %v2654_v21 = vsel %vm1623_vm11, %v2652_v34, %v9808_v13  ;;  %v8517_v25 = vmax.f32 %v7528_v8, %v8338_v60  ;;  %1962 = vrot.lane.b32.xlu0 %v9809_v15, %s5280_s30  ;;  %v3095_v61 = vmax.f32 %v3063_v45, %v9811_v17  ;;  %v3853_v13 = vpop.permute.xlu0 %3852 }
 0x292   : > { %v2717_v24 = vmax.f32 %v2523_v53, %v2649_v35  ;;  %v2719_v63 = vmax.f32 %v2526_v23, %v2654_v21  ;;  %v3587_v3 = vsel %vm1623_vm11, %v3585_v28, %v3586_v49  ;;  %2947 = vrot.lane.b32.xlu1 %v8360_v30, %s5281_s6  ;;  %v3589_v53 = vsel %vm1623_vm11, %v3586_v49, %v3588_v38  ;;  %v9810_v30 = vld [vmem:[#allocation53_spill] sm:$0xff]  ;;  %v4011_v38 = vld [vmem:[%s9246_s3] sm:$0xff] }
 0x293   : > { %3892 = vrot.lane.b32.xlu2 %v3807_v22, %s5282_s7  ;;  %v3664_v51 = vmax.f32 %v3467_v32, %v3587_v3  ;;  %v3665_v8 = vmax.f32 %v3468_v14, %v3589_v53  ;;  %v3083_v39 = vmax.f32 %v3051_v46, %v3055_v37  ;;  %v9812_v22 = vld [vmem:[#allocation10_spill] sm:$0xff]  ;;  %2068 = vst.msk [vmem:[#allocation2 + $0xd8] sm:$0xff] %vm2040_vm5, %v1999_v11  ;;  %v3159_v34 = vrot.slane %v3095_v61, 6 }
 0x294   : > { %v8511_v43 = vmax.f32 %v2717_v24, %v2793_v31  ;;  %v8525_v23 = vmax.f32 %v2719_v63, %v2798_v58  ;;  %v2910_v31 = vpop.permute.xlu1 %2909  ;;  %v3062_v58 = vmax.f32 %v9810_v30, %v8517_v25  ;;  %v8540_v41 = vmax.f32 %v8338_v60, %v9812_v22  ;;  %v9815_v14 = vld [vmem:[#allocation54_spill] sm:$0xff]  ;;  %4128 = vmatpush.msra.mxu1 %v4011_v38 }
 0x295   : > { %3000 = vst.msk [vmem:[#allocation2 + $0x30] sm:$0xff] %vm2993_vm7, %v2910_v31  ;;  %v3808_v20 = vmax.f32 %v3664_v51, %v3731_v4  ;;  %v8542_v2 = vmax.f32 %v3665_v8, %v3733_v44  ;;  %v3189_v54 = vrot.slane %v3083_v39, 6  ;;  %v3078_v59 = vmax.f32 %v8341_v55, %v3050_v7  ;;  %5000 = vmatpush.msra.mxu3 %v4011_v38  ;;  %v3979_v51 = vld [vmem:[#allocation2] sm:$0xff] }
 0x296   : > { %v3054_v12 = vmax.f32 %v8511_v43, %v8525_v23  ;;  %v3094_v16 = vmax.f32 %v3062_v58, %v9812_v22  ;;  %v3065_v33 = vmax.f32 %v7615_v47, %v9813_v9  ;;  %v3079_v45 = vmax.f32 %v8364_v40, %v3051_v46  ;;  %v9814_v47 = vld [vmem:[#allocation13_spill] sm:$0xff]  ;;  %3948 = vst.msk [vmem:[#allocation2 + $0x8] sm:$0xff] %vm3946_vm9, %v3853_v13  ;;  %v9817_v9 = vld [vmem:[#allocation30_spill] sm:$0xff] }
 0x297   : > { %v3272_v57 = vsel %vm1237_vm10, %v3189_v54, -inf  ;;  %v3064_v36 = vmax.f32 %v7949_v6, %v8540_v41  ;;  %v8554_v50 = vsel %vm1237_vm10, %v3159_v34, -inf  ;;  %v3110_v32 = vmax.f32 %v3078_v59, %v8511_v43  ;;  %4963 = vmatmul.msk.f32.vlgmr.msra.gmra.mxu1 %vm4016_vm8, %v3979_v51 }
 0x298   : > { %v3082_v27 = vmax.f32 %v3050_v7, %v3054_v12  ;;  %v3379_v10 = vrot.slane %v3272_v57, 1  ;;  %v3158_v62 = vrot.slane %v3094_v16, 6  ;;  %v3747_v4 = vrot.slane %v3272_v57, 4  ;;  %v2001_v49 = vpop.permute.xlu2 %2000 }
 0x299   : > { %v3111_v55 = vmax.f32 %v3079_v45, %v8488_v29  ;;  %1964 = vrot.lane.b32.xlu0 %v9814_v47, %s5280_s30  ;;  %v3329_v15 = vrot.slane %v8554_v50, 1  ;;  %2069 = vst.msk [vmem:[#allocation2 + $0xe0] sm:$0xff] %vm2040_vm5, %v2001_v49  ;;  %v9818_v45 = vld [vmem:[#allocation56_spill] sm:$0xff] }
 0x29a   : > { %v3188_v56 = vrot.slane %v3082_v27, 6  ;;  %2915 = vrot.lane.b32.xlu1 %v9815_v14, %s5281_s6  ;;  %v3478_v52 = vmax.f32 %v3272_v57, %v3379_v10  ;;  %v8565_v6 = vsel %vm1237_vm10, %v3158_v62, %v3159_v34  ;;  %v8573_v46 = vsel %vm1237_vm10, -inf, %v3158_v62  ;;  %v9816_v34 = vld [vmem:[#allocation35_spill] sm:$0xff] }
 0x29b   : > { %3894 = vrot.lane.b32.xlu2 %v3808_v20, %s5282_s7  ;;  %v3327_v37 = vrot.slane %v8565_v6, 1  ;;  %v3326_v11 = vrot.slane %v8573_v46, 1  ;;  %v3183_v16 = vrot.slane %v3111_v55, 6  ;;  %v3096_v59 = vmax.f32 %v3064_v36, %v9816_v34  ;;  %v2930_v55 = vpop.permute.xlu0 %2929 }
 0x29c   : > { %v3190_v40 = vsel %vm1237_vm10, %v3188_v56, %v3189_v54  ;;  %v3256_v44 = vsel %vm1237_vm10, -inf, %v3188_v56  ;;  %v2912_v35 = vpop.permute.xlu1 %2911  ;;  %v3603_v63 = vrot.slane %v3478_v52, 2  ;;  %v3182_v54 = vrot.slane %v3110_v32, 6  ;;  %3010 = vst.msk [vmem:[#allocation2 + $0x80] sm:$0xff] %vm2993_vm7, %v2930_v55 }
 0x29d   : > { %v3376_v21 = vrot.slane %v3256_v44, 1  ;;  %v3377_v24 = vrot.slane %v3190_v40, 1  ;;  %v3744_v7 = vrot.slane %v3256_v44, 4  ;;  %v3745_v28 = vrot.slane %v3190_v40, 4  ;;  %3001 = vst.msk [vmem:[#allocation2 + $0x38] sm:$0xff] %vm2993_vm7, %v2912_v35 }
 0x29e   : > { %v3330_v12 = vsel %vm1398_vm6, %v3327_v37, %v3329_v15  ;;  %v3328_v20 = vsel %vm1398_vm6, %v3326_v11, %v3327_v37  ;;  %v3097_v57 = vmax.f32 %v3065_v33, %v9817_v9  ;;  %v3184_v14 = vsel %vm1237_vm10, %v3182_v54, %v3183_v16 }
 0x29f   : > { %v3378_v3 = vsel %vm1398_vm6, %v3376_v21, %v3377_v24  ;;  %v3380_v53 = vsel %vm1398_vm6, %v3377_v24, %v3379_v10  ;;  %v3746_v31 = vsel %vm359_vm0, %v3744_v7, %v3745_v28  ;;  %v3748_v1 = vsel %vm359_vm0, %v3745_v28, %v3747_v4  ;;  %v3980_v24 = vld [vmem:[#allocation2 + $0x8] sm:$0xff] }
 0x2a0   : > { %v3476_v8 = vmax.f32 %v3256_v44, %v3378_v3  ;;  %v3477_v39 = vmax.f32 %v3190_v40, %v3380_v53  ;;  %v8588_v30 = vmax.f32 %v8565_v6, %v3330_v12  ;;  %v8593_v27 = vmax.f32 %v8573_v46, %v3328_v20  ;;  %v2003_v40 = vpop.permute.xlu2 %2002  ;;  %4964 = vmatmul.msk.f32.gmra.mxu1 %vm4016_vm8, %v3980_v24 }
 0x2a1   : > { %1966 = vrot.lane.b32.xlu0 %v9818_v45, %s5280_s30  ;;  %v3254_v4 = vsel %vm1237_vm10, -inf, %v3182_v54  ;;  %v3270_v44 = vsel %vm1237_vm10, %v3183_v16, -inf  ;;  %v3367_v35 = vrot.slane %v3184_v14, 1  ;;  %2070 = vst.msk [vmem:[#allocation2 + $0xe8] sm:$0xff] %vm2040_vm5, %v2003_v40  ;;  %v3735_v28 = vrot.slane %v3184_v14, 4 }
 0x2a2   : > { %v3600_v58 = vrot.slane %v3476_v8, 2  ;;  %v3601_v61 = vrot.slane %v3477_v39, 2  ;;  %2949 = vrot.lane.b32.xlu1 %v8448_v19, %s5281_s6  ;;  %v3551_v62 = vrot.slane %v8588_v30, 2  ;;  %v3550_v47 = vrot.slane %v8593_v27, 2 }
 0x2a3   : > { %3896 = vrot.lane.b32.xlu2 %v8542_v2, %s5282_s7  ;;  %v3366_v52 = vrot.slane %v3254_v4, 1  ;;  %v3734_v38 = vrot.slane %v3254_v4, 4  ;;  %v3369_v2 = vrot.slane %v3270_v44, 1  ;;  %v3161_v49 = vrot.slane %v3096_v59, 6 }
 0x2a4   : > { %v3602_v56 = vsel %vm1623_vm11, %v3600_v58, %v3601_v61  ;;  %v3604_v10 = vsel %vm1623_vm11, %v3601_v61, %v3603_v63  ;;  %v2932_v32 = vpop.permute.xlu1 %2931  ;;  %v3162_v63 = vrot.slane %v3097_v57, 6  ;;  %v8620_v51 = vsel %vm1623_vm11, %v3550_v47, %v3551_v62  ;;  %v9819_v61 = vld [vmem:[#allocation57_spill] sm:$0xff]  ;;  %v3855_v57 = vpop.permute.xlu0 %3854 }
 0x2a5   : > { %v3670_v33 = vmax.f32 %v3476_v8, %v3602_v56  ;;  %v3671_v36 = vmax.f32 %v3477_v39, %v3604_v10  ;;  %3011 = vst.msk [vmem:[#allocation2 + $0x88] sm:$0xff] %vm2993_vm7, %v2932_v32  ;;  %v3368_v7 = vsel %vm1398_vm6, %v3366_v52, %v3367_v35  ;;  %v3370_v37 = vsel %vm1398_vm6, %v3367_v35, %v3369_v2 }
 0x2a6   : > { %v3470_v3 = vmax.f32 %v3254_v4, %v3368_v7  ;;  %v3472_v53 = vmax.f32 %v3270_v44, %v3369_v2  ;;  %v3736_v8 = vsel %vm359_vm0, %v3734_v38, %v3735_v28  ;;  %v3695_v39 = vrot.slane %v8565_v6, 4  ;;  %3949 = vst.msk [vmem:[#allocation2 + $0x10] sm:$0xff] %vm3946_vm9, %v3855_v57 }
 0x2a7   : > { %v3814_v13 = vmax.f32 %v3670_v33, %v3746_v31  ;;  %v8612_v21 = vmax.f32 %v3671_v36, %v3748_v1  ;;  %v3694_v31 = vrot.slane %v8573_v46, 4  ;;  %v3471_v1 = vmax.f32 %v3184_v14, %v3370_v37 }
 0x2a8   : > { %v3590_v11 = vrot.slane %v3470_v3, 2  ;;  %v8629_v12 = vmax.f32 %v8554_v50, %v3329_v15  ;;  %v3593_v58 = vrot.slane %v3472_v53, 2  ;;  %v3737_v20 = vrot.slane %v3270_v44, 4  ;;  %v9820_v53 = vld [vmem:[#allocation58_spill] sm:$0xff] }
 0x2a9   : > { %1968 = vrot.lane.b32.xlu0 %v9819_v61, %s5280_s30  ;;  %v3591_v46 = vrot.slane %v3471_v1, 2  ;;  %v3163_v54 = vsel %vm1237_vm10, %v3161_v49, %v3162_v63  ;;  %v3247_v16 = vsel %vm1237_vm10, -inf, %v3161_v49  ;;  %v3650_v15 = vmax.f32 %v8593_v27, %v8620_v51 }
 0x2aa   : > { %2917 = vrot.lane.b32.xlu1 %v8338_v60, %s5281_s6  ;;  %v3263_v45 = vsel %vm1237_vm10, %v3162_v63, -inf  ;;  %v3331_v56 = vrot.slane %v3247_v16, 1  ;;  %v3332_v10 = vrot.slane %v3163_v54, 1  ;;  %v3738_v32 = vsel %vm359_vm0, %v3735_v28, %v3737_v20 }
 0x2ab   : > { %3906 = vrot.lane.b32.xlu2 %v3814_v13, %s5282_s7  ;;  %v3592_v60 = vsel %vm1623_vm11, %v3590_v11, %v3591_v46  ;;  %v3594_v4 = vsel %vm1623_vm11, %v3591_v46, %v3593_v58  ;;  %v3334_v55 = vrot.slane %v3263_v45, 1  ;;  %v3699_v27 = vrot.slane %v3247_v16, 4 }
 0x2ac   : > { %v2934_v59 = vpop.permute.xlu1 %2933  ;;  %v3666_v33 = vmax.f32 %v3470_v3, %v3592_v60  ;;  %v3667_v36 = vmax.f32 %v3471_v1, %v3594_v4  ;;  %v3333_v47 = vsel %vm1398_vm6, %v3331_v56, %v3332_v10  ;;  %v3700_v44 = vrot.slane %v3163_v54, 4  ;;  %v3857_v11 = vpop.permute.xlu0 %3856 }
 0x2ad   : > { %3012 = vst.msk [vmem:[#allocation2 + $0x90] sm:$0xff] %vm2993_vm7, %v2934_v59  ;;  %v3335_v14 = vsel %vm1398_vm6, %v3332_v10, %v3334_v55  ;;  %v3449_v40 = vmax.f32 %v3247_v16, %v3333_v47  ;;  %v8650_v52 = vmax.f32 %v8448_v19, %v8511_v43  ;;  %v8656_v2 = vmax.f32 %v8432_v42, %v8488_v29 }
 0x2ae   : > { %v3810_v35 = vmax.f32 %v3666_v33, %v3736_v8  ;;  %v8652_v38 = vmax.f32 %v3667_v36, %v3738_v32  ;;  %v3450_v13 = vmax.f32 %v3163_v54, %v3335_v14  ;;  %v3701_v7 = vsel %vm359_vm0, %v3699_v27, %v3700_v44  ;;  %3950 = vst.msk [vmem:[#allocation2 + $0x18] sm:$0xff] %vm3946_vm9, %v3857_v11 }
 0x2af   : > { %v3555_v24 = vrot.slane %v3449_v40, 2  ;;  %v3080_v28 = vmax.f32 %v8344_v26, %v8650_v52  ;;  %v3451_v49 = vmax.f32 %v3263_v45, %v3334_v55  ;;  %v3553_v63 = vrot.slane %v8629_v12, 2  ;;  %v9821_v26 = vld [vmem:[#allocation18_spill] sm:$0xff]  ;;  %v9822_v12 = vld [vmem:[#allocation4_spill] sm:$0xff] }
 0x2b0   : > { %v3556_v37 = vrot.slane %v3450_v13, 2  ;;  %v3081_v19 = vmax.f32 %v8440_v48, %v8656_v2  ;;  %v3702_v3 = vrot.slane %v3263_v45, 4  ;;  %v3066_v58 = vmax.f32 %v8517_v25, %v9821_v26 }
 0x2b1   : > { %1970 = vrot.lane.b32.xlu0 %v9820_v53, %s5280_s30  ;;  %v3112_v51 = vmax.f32 %v3080_v28, %v8525_v23  ;;  %v3558_v1 = vrot.slane %v3451_v49, 2  ;;  %v3165_v61 = vrot.slane %v9822_v12, 6  ;;  %v3696_v54 = vsel %vm359_vm0, %v3694_v31, %v3695_v39  ;;  %v9823_v31 = vld [vmem:[#allocation6_spill] sm:$0xff] }
 0x2b2   : > { %2951 = vrot.lane.b32.xlu1 %v8432_v42, %s5281_s6  ;;  %v3557_v48 = vsel %vm1623_vm11, %v3555_v24, %v3556_v37  ;;  %v3113_v46 = vmax.f32 %v3081_v19, %v8494_v18  ;;  %v3703_v20 = vsel %vm359_vm0, %v3700_v44, %v3702_v3  ;;  %v3981_v42 = vld [vmem:[#allocation2 + $0x10] sm:$0xff]  ;;  %v3554_v57 = vsel %vm1623_vm11, %v3551_v62, %v3553_v63 }
 0x2b3   : > { %3908 = vrot.lane.b32.xlu2 %v8612_v21, %s5282_s7  ;;  %v3652_v16 = vmax.f32 %v3449_v40, %v3557_v48  ;;  %v3185_v25 = vrot.slane %v3112_v51, 6  ;;  %v3559_v59 = vsel %vm1623_vm11, %v3556_v37, %v3558_v1  ;;  %4965 = vmatmul.msk.f32.gmra.mxu1 %vm4016_vm8, %v3981_v42  ;;  %v3794_v21 = vmax.f32 %v3650_v15, %v3696_v54 }
 0x2b4   : > { %v2936_v8 = vpop.permute.xlu1 %2935  ;;  %v3186_v45 = vrot.slane %v3113_v46, 6  ;;  %v3653_v56 = vmax.f32 %v3450_v13, %v3559_v59  ;;  %v3098_v4 = vmax.f32 %v3066_v58, %v9823_v31  ;;  %v3084_v32 = vmax.f32 %v8650_v52, %v8525_v23 }
 0x2b5   : > { %3013 = vst.msk [vmem:[#allocation2 + $0x98] sm:$0xff] %vm2993_vm7, %v2936_v8  ;;  %v8687_v10 = vmax.f32 %v3652_v16, %v3701_v7  ;;  %v3255_v60 = vsel %vm1237_vm10, -inf, %v3185_v25  ;;  %v3651_v40 = vmax.f32 %v8588_v30, %v3554_v57  ;;  %v3697_v44 = vrot.slane %v8554_v50, 4  ;;  %v3859_v30 = vpop.permute.xlu0 %3858  ;;  %v3982_v3 = vld [vmem:[#allocation2 + $0x18] sm:$0xff] }
 0x2b6   : > { %v3187_v55 = vsel %vm1237_vm10, %v3185_v25, %v3186_v45  ;;  %v3271_v33 = vsel %vm1237_vm10, %v3186_v45, -inf  ;;  %v3371_v15 = vrot.slane %v3255_v60, 1  ;;  %v3739_v36 = vrot.slane %v3255_v60, 4  ;;  %3951 = vst.msk [vmem:[#allocation2 + $0x20] sm:$0xff] %vm3946_vm9, %v3859_v30 }
 0x2b7   : > { %v3372_v47 = vrot.slane %v3187_v55, 1  ;;  %v3374_v27 = vrot.slane %v3271_v33, 1  ;;  %v3740_v62 = vrot.slane %v3187_v55, 4  ;;  %v8695_v14 = vmax.f32 %v3653_v56, %v3703_v20 }
 0x2b8   : > { %v3742_v13 = vrot.slane %v3271_v33, 4  ;;  %v3085_v24 = vmax.f32 %v8656_v2, %v8494_v18  ;;  %v3164_v49 = vrot.slane %v3098_v4, 6  ;;  %v8710_v53 = vsel %vm1237_vm10, %v3165_v61, -inf }
 0x2b9   : > { %3866 = vrot.lane.b32.xlu0 %v3794_v21, %s5282_s7  ;;  %v3373_v52 = vsel %vm1398_vm6, %v3371_v15, %v3372_v47  ;;  %v3375_v7 = vsel %vm1398_vm6, %v3372_v47, %v3374_v27  ;;  %v3741_v28 = vsel %vm359_vm0, %v3739_v36, %v3740_v62  ;;  %v3475_v19 = vmax.f32 %v3271_v33, %v3374_v27 }
 0x2ba   : > { %2919 = vrot.lane.b32.xlu1 %v7575_v5, %s5281_s6  ;;  %v3473_v50 = vmax.f32 %v3255_v60, %v3373_v52  ;;  %v3474_v37 = vmax.f32 %v3187_v55, %v3375_v7  ;;  %v3743_v2 = vsel %vm359_vm0, %v3740_v62, %v3742_v13  ;;  %v3191_v5 = vrot.slane %v3084_v32, 6 }
 0x2bb   : > { %3898 = vrot.lane.b32.xlu2 %v3810_v35, %s5282_s7  ;;  %4966 = vmatmul.msk.f32.gmra.mxu1 %vm4016_vm8, %v3982_v3  ;;  %v3598_v8 = vrot.slane %v3475_v19, 2  ;;  %v3192_v35 = vrot.slane %v3085_v24, 6  ;;  %v3698_v11 = vsel %vm359_vm0, %v3695_v39, %v3697_v44  ;;  %v8719_v26 = vsel %vm1237_vm10, %v3164_v49, %v3165_v61 }
 0x2bc   : > { %v2938_v63 = vpop.permute.xlu1 %2937  ;;  %v3595_v51 = vrot.slane %v3473_v50, 2  ;;  %v3596_v1 = vrot.slane %v3474_v37, 2  ;;  %v8722_v58 = vsel %vm1237_vm10, -inf, %v3164_v49  ;;  %v3795_v12 = vmax.f32 %v3651_v40, %v3698_v11 }
 0x2bd   : > { %3014 = vst.msk [vmem:[#allocation2 + $0xa0] sm:$0xff] %vm2993_vm7, %v2938_v63  ;;  %v3339_v20 = vrot.slane %v8710_v53, 1  ;;  %v3193_v16 = vsel %vm1237_vm10, %v3191_v5, %v3192_v35  ;;  %v3257_v6 = vsel %vm1237_vm10, -inf, %v3191_v5  ;;  %v3336_v39 = vrot.slane %v8722_v58, 1  ;;  %v3983_v55 = vld [vmem:[#allocation2 + $0x20] sm:$0xff] }
 0x2be   : > { %v3597_v48 = vsel %vm1623_vm11, %v3595_v51, %v3596_v1  ;;  %v3599_v46 = vsel %vm1623_vm11, %v3596_v1, %v3598_v8  ;;  %v3337_v61 = vrot.slane %v8719_v26, 1  ;;  %v3273_v25 = vsel %vm1237_vm10, %v3192_v35, -inf }
 0x2bf   : > { %v3668_v42 = vmax.f32 %v3473_v50, %v3597_v48  ;;  %v3669_v54 = vmax.f32 %v3474_v37, %v3599_v46  ;;  %v3381_v59 = vrot.slane %v3257_v6, 1  ;;  %v3382_v56 = vrot.slane %v3193_v16, 1 }
 0x2c0   : > { %v3384_v60 = vrot.slane %v3273_v25, 1  ;;  %v3749_v31 = vrot.slane %v3257_v6, 4  ;;  %v3750_v4 = vrot.slane %v3193_v16, 4  ;;  %v3752_v27 = vrot.slane %v3273_v25, 4 }
 0x2c1   : > { %3868 = vrot.lane.b32.xlu0 %v3795_v12, %s5282_s7  ;;  %v3812_v21 = vmax.f32 %v3668_v42, %v3741_v28  ;;  %v3813_v57 = vmax.f32 %v3669_v54, %v3743_v2  ;;  %v3383_v33 = vsel %vm1398_vm6, %v3381_v59, %v3382_v56  ;;  %v3340_v62 = vsel %vm1398_vm6, %v3337_v61, %v3339_v20  ;;  %v9826_v59 = vld [vmem:[#allocation51_spill] sm:$0xff] }
 0x2c2   : > { %2953 = vrot.lane.b32.xlu1 %v8511_v43, %s5281_s6  ;;  %v3885_v32 = vpop.permute.xlu2 %3884  ;;  %v3385_v15 = vsel %vm1398_vm6, %v3382_v56, %v3384_v60  ;;  %v3479_v43 = vmax.f32 %v3257_v6, %v3383_v33  ;;  %v3751_v47 = vsel %vm359_vm0, %v3749_v31, %v3750_v4  ;;  %v3481_v40 = vmax.f32 %v3273_v25, %v3384_v60 }
 0x2c3   : > { %3900 = vrot.lane.b32.xlu2 %v8652_v38, %s5282_s7  ;;  %3964 = vst.msk [vmem:[#allocation2 + $0x88] sm:$0xff] %vm3946_vm9, %v3885_v32  ;;  %4967 = vmatmul.msk.f32.gmra.mxu1 %vm4016_vm8, %v3983_v55  ;;  %v3480_v36 = vmax.f32 %v3193_v16, %v3385_v15  ;;  %v3338_v38 = vsel %vm1398_vm6, %v3336_v39, %v3337_v61  ;;  %v3704_v35 = vrot.slane %v8722_v58, 4  ;;  %v3705_v11 = vrot.slane %v8719_v26, 4 }
 0x2c4   : > { %v2940_v45 = vpop.permute.xlu1 %2939  ;;  %v3605_v44 = vrot.slane %v3479_v43, 2  ;;  %v3753_v24 = vsel %vm359_vm0, %v3750_v4, %v3752_v27  ;;  %v3608_v52 = vrot.slane %v3481_v40, 2  ;;  %v3452_v7 = vmax.f32 %v8722_v58, %v3338_v38 }
 0x2c5   : > { %3015 = vst.msk [vmem:[#allocation2 + $0xa8] sm:$0xff] %vm2993_vm7, %v2940_v45  ;;  %v3606_v13 = vrot.slane %v3480_v36, 2  ;;  %v3453_v28 = vmax.f32 %v8719_v26, %v3340_v62  ;;  %v3068_v50 = vmax.f32 %v8540_v41, %v7961_v0  ;;  %v3454_v8 = vmax.f32 %v8710_v53, %v3339_v20  ;;  %v9825_v0 = vld [vmem:[#allocation9_spill] sm:$0xff] }
 0x2c6   : > { %v3560_v2 = vrot.slane %v3452_v7, 2  ;;  %v3168_v41 = vrot.slane %v9825_v0, 6 }
 0x2c7   : > { %v3607_v49 = vsel %vm1623_vm11, %v3605_v44, %v3606_v13  ;;  %v3609_v30 = vsel %vm1623_vm11, %v3606_v13, %v3608_v52  ;;  %v3561_v3 = vrot.slane %v3453_v28, 2  ;;  %v3563_v42 = vrot.slane %v3454_v8, 2 }
 0x2c8   : > { %v3672_v63 = vmax.f32 %v3479_v43, %v3607_v49  ;;  %v3673_v37 = vmax.f32 %v3480_v36, %v3609_v30  ;;  %v9827_v36 = vld [vmem:[#allocation59_spill] sm:$0xff] }
 0x2c9   : > { %3870 = vrot.lane.b32.xlu0 %v8687_v10, %s5282_s7  ;;  %v3861_v5 = vpop.permute.xlu0 %3860  ;;  %v9824_v10 = vld [vmem:[#allocation3_spill] sm:$0xff]  ;;  %v3564_v16 = vsel %vm1623_vm11, %v3561_v3, %v3563_v42 }
 0x2ca   : > { %2921 = vrot.lane.b32.xlu1 %v9812_v22, %s5281_s6  ;;  %v3816_v19 = vmax.f32 %v3672_v63, %v3751_v47  ;;  %3952 = vst.msk [vmem:[#allocation2 + $0x28] sm:$0xff] %vm3946_vm9, %v3861_v5  ;;  %v8758_v51 = vmax.f32 %v3673_v37, %v3753_v24  ;;  %v3100_v1 = vmax.f32 %v3068_v50, %v9824_v10  ;;  %v9828_v47 = vld [vmem:[#allocation63_spill] sm:$0xff] }
 0x2cb   : > { %3902 = vrot.lane.b32.xlu2 %v3812_v21, %s5282_s7  ;;  %v3562_v22 = vsel %vm1623_vm11, %v3560_v2, %v3561_v3  ;;  %v3707_v21 = vrot.slane %v8710_v53, 4  ;;  %v9829_v3 = vld [vmem:[#allocation60_spill] sm:$0xff] }
 0x2cc   : > { %v3167_v12 = vrot.slane %v3100_v1, 6  ;;  %v3654_v48 = vmax.f32 %v3452_v7, %v3562_v22  ;;  %v3996_v22 = vld [vmem:[#allocation2 + $0x88] sm:$0xff] }
 0x2cd   : > { %v3708_v60 = vsel %vm359_vm0, %v3705_v11, %v3707_v21 }
 0x2ce   : > { %v8778_v20 = vsel %vm1237_vm10, %v3167_v12, %v3168_v41  ;;  %v3249_v58 = vsel %vm1237_vm10, -inf, %v3167_v12 }
 0x2cf   : > { %v3341_v39 = vrot.slane %v3249_v58, 1  ;;  %v3342_v61 = vrot.slane %v8778_v20, 1  ;;  %v3709_v27 = vrot.slane %v3249_v58, 4  ;;  %v3710_v38 = vrot.slane %v8778_v20, 4 }
 0x2d1   : > { %3872 = vrot.lane.b32.xlu0 %v8695_v14, %s5282_s7  ;;  %v3984_v54 = vld [vmem:[#allocation2 + $0x28] sm:$0xff]  ;;  %v8774_v14 = vsel %vm1237_vm10, %v3168_v41, -inf  ;;  %v3343_v56 = vsel %vm1398_vm6, %v3341_v39, %v3342_v61  ;;  %v3711_v52 = vsel %vm359_vm0, %v3709_v27, %v3710_v38 }
 0x2d2   : > { %2955 = vrot.lane.b32.xlu1 %v8488_v29, %s5281_s6  ;;  %4968 = vmatmul.msk.f32.gmra.mxu1 %vm4016_vm8, %v3984_v54  ;;  %v3706_v29 = vsel %vm359_vm0, %v3704_v35, %v3705_v11  ;;  %v3344_v25 = vrot.slane %v8774_v14, 1  ;;  %v3455_v4 = vmax.f32 %v3249_v58, %v3343_v56  ;;  %v3712_v63 = vrot.slane %v8774_v14, 4 }
 0x2d3   : > { %3904 = vrot.lane.b32.xlu2 %v3813_v57, %s5282_s7  ;;  %v3798_v26 = vmax.f32 %v3654_v48, %v3706_v29  ;;  %v3655_v57 = vmax.f32 %v3453_v28, %v3564_v16  ;;  %v8855_v29 = vld [vmem:[%s9247_s4] ss:$0 sm:$0xff] }
 0x2d4   : > { %v3887_v46 = vpop.permute.xlu2 %3886  ;;  %v3565_v33 = vrot.slane %v3455_v4, 2 }
 0x2d5   : > { %3965 = vst.msk [vmem:[#allocation2 + $0x90] sm:$0xff] %vm3946_vm9, %v3887_v46  ;;  %v3799_v31 = vmax.f32 %v3655_v57, %v3708_v60 }
 0x2d8   : > { %v2942_v6 = vpop.permute.xlu1 %2941 }
 0x2d9   : > { %3874 = vrot.lane.b32.xlu0 %v3798_v26, %s5282_s7  ;;  %3016 = vst.msk [vmem:[#allocation2 + $0xb0] sm:$0xff] %vm2993_vm7, %v2942_v6 }
 0x2da   : > { %2923 = vrot.lane.b32.xlu1 %v9811_v17, %s5281_s6  ;;  %v3345_v17 = vsel %vm1398_vm6, %v3342_v61, %v3344_v25 }
 0x2db   : > { %2004 = vrot.lane.b32.xlu2 %v9826_v59, %s5280_s30  ;;  %v3456_v32 = vmax.f32 %v8778_v20, %v3345_v17 }
 0x2dc   : > { %v3889_v45 = vpop.permute.xlu2 %3888  ;;  %v3997_v41 = vld [vmem:[#allocation2 + $0x90] sm:$0xff] }
 0x2dd   : > { %3966 = vst.msk [vmem:[#allocation2 + $0x98] sm:$0xff] %vm3946_vm9, %v3889_v45  ;;  %v3566_v15 = vrot.slane %v3456_v32, 2 }
 0x2df   : > { %v3567_v43 = vsel %vm1623_vm11, %v3565_v33, %v3566_v15 }
 0x2e0   : > { %v2944_v53 = vpop.permute.xlu1 %2943  ;;  %v3656_v40 = vmax.f32 %v3455_v4, %v3567_v43 }
 0x2e1   : > { %3876 = vrot.lane.b32.xlu0 %v3799_v31, %s5282_s7  ;;  %3017 = vst.msk [vmem:[#allocation2 + $0xb8] sm:$0xff] %vm2993_vm7, %v2944_v53 }
 0x2e2   : > { %2957 = vrot.lane.b32.xlu1 %v8525_v23, %s5281_s6  ;;  %v3457_v23 = vmax.f32 %v8774_v14, %v3344_v25 }
 0x2e3   : > { %3910 = vrot.lane.b32.xlu2 %v3816_v19, %s5282_s7 }
 0x2e4   : > { %v3891_v55 = vpop.permute.xlu2 %3890  ;;  %v3568_v24 = vrot.slane %v3457_v23, 2  ;;  %v3998_v48 = vld [vmem:[#allocation2 + $0x98] sm:$0xff] }
 0x2e5   : > { %3967 = vst.msk [vmem:[#allocation2 + $0xa0] sm:$0xff] %vm3946_vm9, %v3891_v55 }
 0x2e6   : > { %v3569_v7 = vsel %vm1623_vm11, %v3566_v15, %v3568_v24 }
 0x2e7   : > { %v3657_v37 = vmax.f32 %v3456_v32, %v3569_v7 }
 0x2e9   : > { %1972 = vrot.lane.b32.xlu0 %v9827_v36, %s5280_s30 }
 0x2ea   : > { %2925 = vrot.lane.b32.xlu1 %v9816_v34, %s5281_s6  ;;  %v3800_v34 = vmax.f32 %v3656_v40, %v3711_v52 }
 0x2eb   : > { %2006 = vrot.lane.b32.xlu2 %v9828_v47, %s5280_s30  ;;  %v3863_v62 = vpop.permute.xlu0 %3862 }
 0x2ec   : > { %v3883_v44 = vpop.permute.xlu1 %3882  ;;  %3953 = vst.msk [vmem:[#allocation2 + $0x30] sm:$0xff] %vm3946_vm9, %v3863_v62  ;;  %v3999_v14 = vld [vmem:[#allocation2 + $0xa0] sm:$0xff] }
 0x2ed   : > { %v3893_v13 = vpop.permute.xlu2 %3892  ;;  %3963 = vst.msk [vmem:[#allocation2 + $0x80] sm:$0xff] %vm3946_vm9, %v3883_v44 }
 0x2ee   : > { %3968 = vst.msk [vmem:[#allocation2 + $0xa8] sm:$0xff] %vm3946_vm9, %v3893_v13 }
 0x2f1   : > { %3878 = vrot.lane.b32.xlu0 %v3800_v34, %s5282_s7 }
 0x2f2   : > { %2959 = vrot.lane.b32.xlu1 %v8494_v18, %s5281_s6  ;;  %v3713_v18 = vsel %vm359_vm0, %v3710_v38, %v3712_v63 }
 0x2f3   : > { %3912 = vrot.lane.b32.xlu2 %v8758_v51, %s5282_s7  ;;  %v3865_v28 = vpop.permute.xlu0 %3864  ;;  %v3985_v49 = vld [vmem:[#allocation2 + $0x30] sm:$0xff]  ;;  %v3801_v2 = vmax.f32 %v3657_v37, %v3713_v18 }
 0x2f4   : > { %v2946_v30 = vpop.permute.xlu1 %2945  ;;  %3954 = vst.msk [vmem:[#allocation2 + $0x38] sm:$0xff] %vm3946_vm9, %v3865_v28  ;;  %4969 = vmatmul.msk.f32.gmra.mxu1 %vm4016_vm8, %v3985_v49  ;;  %v3995_v19 = vld [vmem:[#allocation2 + $0x80] sm:$0xff] }
 0x2f5   : > { %v3895_v50 = vpop.permute.xlu2 %3894  ;;  %3018 = vst.msk [vmem:[#allocation2 + $0xc0] sm:$0xff] %vm2993_vm7, %v2946_v30  ;;  %4979 = vmatmul.msk.f32.vlgmr.msra.gmra.mxu3 %vm4016_vm8, %v3995_v19  ;;  %v4000_v6 = vld [vmem:[#allocation2 + $0xa8] sm:$0xff] }
 0x2f6   : > { %3969 = vst.msk [vmem:[#allocation2 + $0xb0] sm:$0xff] %vm3946_vm9, %v3895_v50 }
 0x2f9   : > { %1974 = vrot.lane.b32.xlu0 %v9829_v3, %s5280_s30 }
 0x2fa   : > { %2927 = vrot.lane.b32.xlu1 %v9817_v9, %s5281_s6 }
 0x2fb   : > { %3880 = vrot.lane.b32.xlu2 %v3801_v2, %s5282_s7  ;;  %v1961_v5 = vpop.permute.xlu0 %1960  ;;  %v3986_v51 = vld [vmem:[#allocation2 + $0x38] sm:$0xff] }
 0x2fc   : > { %v2914_v10 = vpop.permute.xlu1 %2913  ;;  %2049 = vst.msk [vmem:[#allocation2 + $0x40] sm:$0xff] %vm2040_vm5, %v1961_v5  ;;  %4970 = vmatmul.msk.f32.gmra.mxu1 %vm4016_vm8, %v3986_v51 }
 0x2fd   : > { %v3897_v1 = vpop.permute.xlu2 %3896  ;;  %3002 = vst.msk [vmem:[#allocation2 + $0x40] sm:$0xff] %vm2993_vm7, %v2914_v10  ;;  %4980 = vmatmul.msk.f32.gmra.mxu3 %vm4016_vm8, %v3996_v22  ;;  %v4001_v56 = vld [vmem:[#allocation2 + $0xb0] sm:$0xff] }
 0x2fe   : > { %3970 = vst.msk [vmem:[#allocation2 + $0xb8] sm:$0xff] %vm3946_vm9, %v3897_v1 }
 0x303   : > { %v1963_v8 = vpop.permute.xlu0 %1962 }
 0x304   : > { %v2948_v0 = vpop.permute.xlu1 %2947  ;;  %2050 = vst.msk [vmem:[#allocation2 + $0x48] sm:$0xff] %vm2040_vm5, %v1963_v8 }
 0x305   : > { %v8839_v9 = vpop.permute.xlu2 %3906  ;;  %3019 = vst.msk [vmem:[#allocation2 + $0xc8] sm:$0xff] %vm2993_vm7, %v2948_v0  ;;  %4981 = vmatmul.msk.f32.gmra.mxu3 %vm4016_vm8, %v3997_v41  ;;  %v4002_v15 = vld [vmem:[#allocation2 + $0xb8] sm:$0xff] }
 0x30b   : > { %v1965_v35 = vpop.permute.xlu0 %1964 }
 0x30c   : > { %v2916_v11 = vpop.permute.xlu1 %2915  ;;  %2051 = vst.msk [vmem:[#allocation2 + $0x50] sm:$0xff] %vm2040_vm5, %v1965_v35 }
 0x30d   : > { %v8844_v12 = vpop.permute.xlu2 %3908  ;;  %3003 = vst.msk [vmem:[#allocation2 + $0x48] sm:$0xff] %vm2993_vm7, %v2916_v11  ;;  %4982 = vmatmul.msk.f32.gmra.mxu3 %vm4016_vm8, %v3998_v48 }
 0x313   : > { %v1967_v46 = vpop.permute.xlu0 %1966 }
 0x314   : > { %v2950_v42 = vpop.permute.xlu1 %2949  ;;  %2052 = vst.msk [vmem:[#allocation2 + $0x58] sm:$0xff] %vm2040_vm5, %v1967_v46  ;;  %v4130_v16 = vpop.f32.mrf.mxu1 }
 0x315   : > { %v3899_v54 = vpop.permute.xlu2 %3898  ;;  %3020 = vst.msk [vmem:[#allocation2 + $0xd0] sm:$0xff] %vm2993_vm7, %v2950_v42  ;;  %4983 = vmatmul.msk.f32.gmra.mxu3 %vm4016_vm8, %v3999_v14  ;;  %v8860_v39 = vadd.f32 %v8855_v29, %v4130_v16 }
 0x316   : > { %3971 = vst.msk [vmem:[#allocation2 + $0xc0] sm:$0xff] %vm3946_vm9, %v3899_v54 }
 0x317   : > { %v4226_v61 = vsub.f32 0.0, %v8860_v39 }
 0x319   : > { %v4258_v25 = vmul.f32 1.442695, %v4226_v61 }
 0x31b   : > { %v1969_v20 = vpop.permute.xlu0 %1968  ;;  %5142 = vpow2.f32 %v4258_v25 }
 0x31c   : > { %v2918_v58 = vpop.permute.xlu1 %2917  ;;  %2053 = vst.msk [vmem:[#allocation2 + $0x60] sm:$0xff] %vm2040_vm5, %v1969_v20 }
 0x31d   : > { %v3901_v26 = vpop.permute.xlu2 %3900  ;;  %3004 = vst.msk [vmem:[#allocation2 + $0x50] sm:$0xff] %vm2993_vm7, %v2918_v58  ;;  %4984 = vmatmul.msk.f32.gmra.mxu3 %vm4016_vm8, %v4000_v6  ;;  %v4133_v45 = vpop.f32.mrf.mxu1  ;;  %v4003_v34 = vld [vmem:[#allocation2 + $0xc0] sm:$0xff] }
 0x31e   : > { %3972 = vst.msk [vmem:[#allocation2 + $0xc8] sm:$0xff] %vm3946_vm9, %v3901_v26  ;;  %v8868_v17 = vadd.f32 %v8855_v29, %v4133_v45 }
 0x320   : > { %v4227_v60 = vsub.f32 0.0, %v8868_v17 }
 0x321   : > { %v5143_v31 = vpop.eup %5142 }
 0x322   : > { %v4260_v4 = vmul.f32 1.442695, %v4227_v60  ;;  %v4322_v32 = vadd.f32 1.0, %v5143_v31 }
 0x323   : > { %v1971_v59 = vpop.permute.xlu0 %1970 }
 0x324   : > { %v2952_v21 = vpop.permute.xlu1 %2951  ;;  %2054 = vst.msk [vmem:[#allocation2 + $0x68] sm:$0xff] %vm2040_vm5, %v1971_v59  ;;  %5144 = vpow2.f32 %v4260_v4  ;;  %v4365_v28 = vand.u32 2147483648, %v4322_v32  ;;  %v4363_v63 = vand.u32 2147483647, %v4322_v32  ;;  %vm4359_vm10 = vweird.f32 %v4322_v32 }
 0x325   : > { %v3903_v57 = vpop.permute.xlu2 %3902  ;;  %3021 = vst.msk [vmem:[#allocation2 + $0xd8] sm:$0xff] %vm2993_vm7, %v2952_v21  ;;  %4985 = vmatmul.msk.f32.gmra.mxu3 %vm4016_vm8, %v4001_v56  ;;  %5146 = vrcp.f32 %v4322_v32  ;;  %v4004_v35 = vld [vmem:[#allocation2 + $0xc8] sm:$0xff] }
 0x326   : > { %3973 = vst.msk [vmem:[#allocation2 + $0xd0] sm:$0xff] %vm3946_vm9, %v3903_v57  ;;  %v4366_v18 = vor.u32 1.1754944e-38, %v4365_v28  ;;  %vm4364_vm11 = vcmp.eq.f32.partialorder %v4363_v63, 8.507059e+37 }
 0x32a   : > { %v5145_v36 = vpop.eup %5144 }
 0x32b   : > { %v3867_v53 = vpop.permute.xlu0 %3866  ;;  %v5147_v47 = vpop.eup %5146  ;;  %v8880_v27 = vadd.f32 1.0, %v5145_v36 }
 0x32c   : > { %v2920_v55 = vpop.permute.xlu1 %2919  ;;  %3955 = vst.msk [vmem:[#allocation2 + $0x40] sm:$0xff] %vm3946_vm9, %v3867_v53  ;;  %v4355_v40 = vmul.f32 %v5147_v47, %v4322_v32  ;;  %vm4360_vm0 = vweird.f32 %v5147_v47 }
 0x32d   : > { %v3905_v33 = vpop.permute.xlu2 %3904  ;;  %3005 = vst.msk [vmem:[#allocation2 + $0x58] sm:$0xff] %vm2993_vm7, %v2920_v55  ;;  %4986 = vmatmul.msk.f32.gmra.mxu3 %vm4016_vm8, %v4002_v15  ;;  %5148 = vrcp.f32 %v8880_v27  ;;  %vm4361_vm6 = vmor %vm4359_vm10, %vm4360_vm0  ;;  %v4379_v48 = vand.u32 2147483648, %v8880_v27  ;;  %v4377_v54 = vand.u32 2147483647, %v8880_v27  ;;  %vm4373_vm13 = vweird.f32 %v8880_v27  ;;  %v4005_v56 = vld [vmem:[#allocation2 + $0xd0] sm:$0xff] }
 0x32e   : > { %3974 = vst.msk [vmem:[#allocation2 + $0xd8] sm:$0xff] %vm3946_vm9, %v3905_v33  ;;  %v4356_v52 = vsub.f32 1.0, %v4355_v40 }
 0x32f   : > { %v4380_v58 = vor.u32 1.1754944e-38, %v4379_v48  ;;  %vm4378_vm15 = vcmp.eq.f32.partialorder %v4377_v54, 8.507059e+37 }
 0x330   : > { %v4136_v43 = vpop.f32.mrf.mxu1  ;;  %v4357_v49 = vmul.f32 %v5147_v47, %v4356_v52 }
 0x331   : > { %v8878_v23 = vadd.f32 %v8855_v29, %v4136_v43 }
 0x332   : > { %v4358_v50 = vadd.f32 %v5147_v47, %v4357_v49 }
 0x333   : > { %v3869_v38 = vpop.permute.xlu0 %3868  ;;  %v3987_v62 = vld [vmem:[#allocation2 + $0x40] sm:$0xff]  ;;  %v4228_v13 = vsub.f32 0.0, %v8878_v23  ;;  %v5149_v19 = vpop.eup %5148 }
 0x334   : > { %v2954_v44 = vpop.permute.xlu1 %2953  ;;  %3956 = vst.msk [vmem:[#allocation2 + $0x48] sm:$0xff] %vm3946_vm9, %v3869_v38  ;;  %4971 = vmatmul.msk.f32.gmra.mxu1 %vm4016_vm8, %v3987_v62  ;;  %v4362_v2 = vsel %vm4361_vm6, %v5147_v47, %v4358_v50  ;;  %v4369_v51 = vmul.f32 %v5149_v19, %v8880_v27  ;;  %vm4374_vm12 = vweird.f32 %v5149_v19 }
 0x335   : > { %v2005_v24 = vpop.permute.xlu2 %2004  ;;  %v4262_v7 = vmul.f32 1.442695, %v4228_v13  ;;  %3022 = vst.msk [vmem:[#allocation2 + $0xe0] sm:$0xff] %vm2993_vm7, %v2954_v44  ;;  %4987 = vmatmul.msk.f32.gmra.mxu3 %vm4016_vm8, %v4003_v34  ;;  %v4367_v22 = vsel %vm4364_vm11, %v4366_v18, %v4362_v2  ;;  %vm4375_vm14 = vmor %vm4373_vm13, %vm4374_vm12  ;;  %v4006_v27 = vld [vmem:[#allocation2 + $0xd8] sm:$0xff] }
 0x336   : > { %2071 = vst.msk [vmem:[#allocation2 + $0xf0] sm:$0xff] %vm2040_vm5, %v2005_v24  ;;  %v4370_v41 = vsub.f32 1.0, %v4369_v51 }
 0x337   : > { %3975 = vst.msk [vmem:[#allocation2 + $0xe0] sm:$0xff] %vm3946_vm9, %v8839_v9  ;;  %5150 = vpow2.f32 %v4262_v7  ;;  %v4802_v9 = vmul.f32 %v4367_v22, %v8860_v39 }
 0x338   : > { %v4139_v30 = vpop.f32.mrf.mxu1  ;;  %v4371_v42 = vmul.f32 %v5149_v19, %v4370_v41 }
 0x339   : > { %v8892_v37 = vadd.f32 %v8855_v29, %v4139_v30  ;;  %4834 = vst.msk [vmem:[%s8901_s14] sm:$0xff] %vm262_vm1, %v4802_v9 }
 0x33a   : > { %v4372_v14 = vadd.f32 %v5149_v19, %v4371_v42 }
 0x33b   : > { %v3871_v3 = vpop.permute.xlu0 %3870  ;;  %v3988_v5 = vld [vmem:[#allocation2 + $0x48] sm:$0xff]  ;;  %v4229_v1 = vsub.f32 0.0, %v8892_v37 }
 0x33c   : > { %v2922_v10 = vpop.permute.xlu1 %2921  ;;  %3957 = vst.msk [vmem:[#allocation2 + $0x50] sm:$0xff] %vm3946_vm9, %v3871_v3  ;;  %4972 = vmatmul.msk.f32.gmra.mxu1 %vm4016_vm8, %v3988_v5  ;;  %v4376_v16 = vsel %vm4375_vm14, %v5149_v19, %v4372_v14 }
 0x33d   : > { %v8905_v8 = vpop.permute.xlu2 %3910  ;;  %v5151_v0 = vpop.eup %5150  ;;  %3006 = vst.msk [vmem:[#allocation2 + $0x60] sm:$0xff] %vm2993_vm7, %v2922_v10  ;;  %v4264_v11 = vmul.f32 1.442695, %v4229_v1  ;;  %4988 = vmatmul.msk.f32.gmra.mxu3 %vm4016_vm8, %v4004_v35  ;;  %v4381_v25 = vsel %vm4378_vm15, %v4380_v58, %v4376_v16 }
 0x33e   : > { %v4324_v46 = vadd.f32 1.0, %v5151_v0  ;;  %v4803_v45 = vmul.f32 %v4381_v25, %v8868_v17  ;;  %v4007_v2 = vld [vmem:[#allocation2 + $0xe0] sm:$0xff] }
 0x33f   : > { %5152 = vpow2.f32 %v4264_v11 }
 0x340   : > { %5154 = vrcp.f32 %v4324_v46  ;;  %v4142_v20 = vpop.f32.mrf.mxu1  ;;  %4835 = vst.msk [vmem:[%s8901_s14 + $0x8] sm:$0xff] %vm262_vm1, %v4803_v45  ;;  %v4393_v17 = vand.u32 2147483648, %v4324_v46  ;;  %v4391_v43 = vand.u32 2147483647, %v4324_v46  ;;  %vm4387_vm3 = vweird.f32 %v4324_v46 }
 0x341   : > { %v8916_v26 = vadd.f32 %v8855_v29, %v4142_v20 }
 0x342   : > { %v4394_v38 = vor.u32 1.1754944e-38, %v4393_v17  ;;  %vm4392_vm0 = vcmp.eq.f32.partialorder %v4391_v43, 8.507059e+37 }
 0x343   : > { %v3873_v6 = vpop.permute.xlu0 %3872  ;;  %v3989_v39 = vld [vmem:[#allocation2 + $0x50] sm:$0xff]  ;;  %v4230_v21 = vsub.f32 0.0, %v8916_v26 }
 0x344   : > { %v2956_v61 = vpop.permute.xlu1 %2955  ;;  %3958 = vst.msk [vmem:[#allocation2 + $0x58] sm:$0xff] %vm3946_vm9, %v3873_v6  ;;  %4973 = vmatmul.msk.f32.gmra.mxu1 %vm4016_vm8, %v3989_v39 }
 0x345   : > { %v2007_v59 = vpop.permute.xlu2 %2006  ;;  %v5153_v57 = vpop.eup %5152  ;;  %3023 = vst.msk [vmem:[#allocation2 + $0xe8] sm:$0xff] %vm2993_vm7, %v2956_v61  ;;  %4989 = vmatmul.msk.f32.gmra.mxu3 %vm4016_vm8, %v4005_v56  ;;  %v4266_v4 = vmul.f32 1.442695, %v4230_v21 }
 0x346   : > { %2072 = vst.msk [vmem:[#allocation2 + $0xf8] sm:$0xff] %vm2040_vm5, %v2007_v59  ;;  %v5155_v60 = vpop.eup %5154  ;;  %v4325_v31 = vadd.f32 1.0, %v5153_v57 }
 0x347   : > { %v4383_v32 = vmul.f32 %v5155_v60, %v4324_v46  ;;  %3976 = vst.msk [vmem:[#allocation2 + $0xe8] sm:$0xff] %vm3946_vm9, %v8844_v12  ;;  %vm4388_vm2 = vweird.f32 %v5155_v60 }
 0x348   : > { %5156 = vrcp.f32 %v4325_v31  ;;  %vm4389_vm4 = vmor %vm4387_vm3, %vm4388_vm2  ;;  %v4407_v7 = vand.u32 2147483648, %v4325_v31  ;;  %v4405_v50 = vand.u32 2147483647, %v4325_v31  ;;  %vm4401_vm6 = vweird.f32 %v4325_v31 }
 0x349   : > { %v4384_v53 = vsub.f32 1.0, %v4383_v32  ;;  %5158 = vpow2.f32 %v4266_v4 }
 0x34a   : > { %v4408_v5 = vor.u32 1.1754944e-38, %v4407_v7  ;;  %vm4406_vm12 = vcmp.eq.f32.partialorder %v4405_v50, 8.507059e+37 }
 0x34b   : > { %v3875_v55 = vpop.permute.xlu0 %3874  ;;  %v3990_v33 = vld [vmem:[#allocation2 + $0x58] sm:$0xff]  ;;  %v4385_v15 = vmul.f32 %v5155_v60, %v4384_v53 }
 0x34c   : > { %v2924_v36 = vpop.permute.xlu1 %2923  ;;  %3959 = vst.msk [vmem:[#allocation2 + $0x60] sm:$0xff] %vm3946_vm9, %v3875_v55  ;;  %4974 = vmatmul.msk.f32.gmra.mxu1 %vm4016_vm8, %v3990_v33 }
 0x34d   : > { %v4386_v47 = vadd.f32 %v5155_v60, %v4385_v15  ;;  %3007 = vst.msk [vmem:[#allocation2 + $0x68] sm:$0xff] %vm2993_vm7, %v2924_v36  ;;  %4990 = vmatmul.msk.f32.gmra.mxu3 %vm4016_vm8, %v4006_v27  ;;  %v3913_v55 = vpop.permute.xlu2 %3912 }
 0x34e   : > { %v5157_v12 = vpop.eup %5156 }
 0x34f   : > { %v5159_v62 = vpop.eup %5158  ;;  %v4390_v40 = vsel %vm4389_vm4, %v5155_v60, %v4386_v47  ;;  %v4397_v44 = vmul.f32 %v5157_v12, %v4325_v31  ;;  %v4145_v28 = vpop.f32.mrf.mxu1  ;;  %vm4402_vm10 = vweird.f32 %v5157_v12 }
 0x350   : > { %v4395_v13 = vsel %vm4392_vm0, %v4394_v38, %v4390_v40  ;;  %v4326_v24 = vadd.f32 1.0, %v5159_v62  ;;  %v8937_v18 = vadd.f32 %v8855_v29, %v4145_v28  ;;  %vm4403_vm11 = vmor %vm4401_vm6, %vm4402_vm10 }
 0x351   : > { %v4804_v52 = vmul.f32 %v4395_v13, %v8878_v23  ;;  %v4398_v34 = vsub.f32 1.0, %v4397_v44 }
 0x352   : > { %5160 = vrcp.f32 %v4326_v24  ;;  %v4231_v3 = vsub.f32 0.0, %v8937_v18  ;;  %v4419_v42 = vand.u32 2147483647, %v4326_v24  ;;  %vm4415_vm14 = vweird.f32 %v4326_v24 }
 0x353   : > { %4836 = vst.msk [vmem:[%s8901_s14 + $0x10] sm:$0xff] %vm262_vm1, %v4804_v52  ;;  %v3877_v49 = vpop.permute.xlu0 %3876  ;;  %v3991_v63 = vld [vmem:[#allocation2 + $0x60] sm:$0xff]  ;;  %v4399_v30 = vmul.f32 %v5157_v12, %v4398_v34 }
 0x354   : > { %v2958_v19 = vpop.permute.xlu1 %2957  ;;  %4975 = vmatmul.msk.f32.gmra.mxu1 %vm4016_vm8, %v3991_v63  ;;  %3960 = vst.msk [vmem:[#allocation2 + $0x68] sm:$0xff] %vm3946_vm9, %v3877_v49  ;;  %v4268_v10 = vmul.f32 1.442695, %v4231_v3  ;;  %vm4420_vm2 = vcmp.eq.f32.partialorder %v4419_v42, 8.507059e+37 }
 0x355   : > { %v4400_v23 = vadd.f32 %v5157_v12, %v4399_v30  ;;  %3024 = vst.msk [vmem:[#allocation2 + $0xf0] sm:$0xff] %vm2993_vm7, %v2958_v19  ;;  %4991 = vmatmul.msk.f32.gmra.mxu3 %vm4016_vm8, %v4007_v2  ;;  %v3881_v13 = vpop.permute.xlu2 %3880 }
 0x356   : > { %3977 = vst.msk [vmem:[#allocation2 + $0xf0] sm:$0xff] %vm3946_vm9, %v8905_v8  ;;  %5162 = vpow2.f32 %v4268_v10  ;;  %v4421_v8 = vand.u32 2147483648, %v4326_v24 }
 0x357   : > { %v4404_v51 = vsel %vm4403_vm11, %v5157_v12, %v4400_v23 }
 0x358   : > { %v5161_v1 = vpop.eup %5160  ;;  %v4409_v22 = vsel %vm4406_vm12, %v4408_v5, %v4404_v51  ;;  %v4422_v20 = vor.u32 1.1754944e-38, %v4421_v8 }
 0x359   : > { %v4805_v0 = vmul.f32 %v4409_v22, %v8892_v37  ;;  %v4411_v9 = vmul.f32 %v5161_v1, %v4326_v24  ;;  %vm4416_vm13 = vweird.f32 %v5161_v1  ;;  %v4008_v37 = vld [vmem:[#allocation2 + $0xe8] sm:$0xff] }
 0x35a   : > { %vm4417_vm15 = vmor %vm4415_vm14, %vm4416_vm13 }
 0x35b   : > { %4837 = vst.msk [vmem:[%s8901_s14 + $0x18] sm:$0xff] %vm262_vm1, %v4805_v0  ;;  %v1973_v41 = vpop.permute.xlu0 %1972  ;;  %v4412_v35 = vsub.f32 1.0, %v4411_v9  ;;  %v3992_v11 = vld [vmem:[#allocation2 + $0x68] sm:$0xff] }
 0x35c   : > { %v2926_v48 = vpop.permute.xlu1 %2925  ;;  %2055 = vst.msk [vmem:[#allocation2 + $0x70] sm:$0xff] %vm2040_vm5, %v1973_v41  ;;  %4976 = vmatmul.msk.f32.gmra.mxu1 %vm4016_vm8, %v3992_v11  ;;  %v5163_v54 = vpop.eup %5162 }
 0x35d   : > { %v4413_v46 = vmul.f32 %v5161_v1, %v4412_v35  ;;  %3008 = vst.msk [vmem:[#allocation2 + $0x70] sm:$0xff] %vm2993_vm7, %v2926_v48  ;;  %4992 = vmatmul.msk.f32.gmra.mxu3 %vm4016_vm8, %v4008_v37  ;;  %v4327_v58 = vadd.f32 1.0, %v5163_v54  ;;  %v4009_v36 = vld [vmem:[#allocation2 + $0xf0] sm:$0xff] }
 0x35f   : > { %v4414_v14 = vadd.f32 %v5161_v1, %v4413_v46  ;;  %5164 = vrcp.f32 %v4327_v58  ;;  %v4435_v45 = vand.u32 2147483648, %v4327_v58  ;;  %v4433_v60 = vand.u32 2147483647, %v4327_v58 }
 0x360   : > { %vm4429_vm4 = vweird.f32 %v4327_v58 }
 0x361   : > { %v4418_v16 = vsel %vm4417_vm15, %v5161_v1, %v4414_v14  ;;  %vm4434_vm10 = vcmp.eq.f32.partialorder %v4433_v60, 8.507059e+37 }
 0x362   : > { %v4423_v6 = vsel %vm4420_vm2, %v4422_v20, %v4418_v16 }
 0x363   : > { %v4806_v39 = vmul.f32 %v4423_v6, %v8916_v26  ;;  %v3879_v61 = vpop.permute.xlu0 %3878  ;;  %v4436_v26 = vor.u32 1.1754944e-38, %v4435_v45 }
 0x364   : > { %3961 = vst.msk [vmem:[#allocation2 + $0x70] sm:$0xff] %vm3946_vm9, %v3879_v61  ;;  %v2960_v43 = vpop.permute.xlu1 %2959 }
 0x365   : > { %4838 = vst.msk [vmem:[%s8901_s14 + $0x20] sm:$0xff] %vm262_vm1, %v4806_v39  ;;  %v5165_v25 = vpop.eup %5164  ;;  %4993 = vmatmul.msk.f32.gmra.mxu3 %vm4016_vm8, %v4009_v36 }
 0x366   : > { %v4425_v59 = vmul.f32 %v5165_v25, %v4327_v58  ;;  %vm4430_vm3 = vweird.f32 %v5165_v25  ;;  %3025 = vst.msk [vmem:[#allocation2 + $0xf8] sm:$0xff] %vm2993_vm7, %v2960_v43 }
 0x367   : > { %vm4431_vm0 = vmor %vm4429_vm4, %vm4430_vm3  ;;  %3978 = vst.msk [vmem:[#allocation2 + $0xf8] sm:$0xff] %vm3946_vm9, %v3913_v55 }
 0x368   : > { %v4426_v21 = vsub.f32 1.0, %v4425_v59 }
 0x36a   : > { %v4427_v56 = vmul.f32 %v5165_v25, %v4426_v21 }
 0x36b   : > { %v1975_v57 = vpop.permute.xlu0 %1974  ;;  %v3993_v47 = vld [vmem:[#allocation2 + $0x70] sm:$0xff] }
 0x36c   : > { %2056 = vst.msk [vmem:[#allocation2 + $0x78] sm:$0xff] %vm2040_vm5, %v1975_v57  ;;  %v4428_v31 = vadd.f32 %v5165_v25, %v4427_v56  ;;  %4977 = vmatmul.msk.f32.gmra.mxu1 %vm4016_vm8, %v3993_v47  ;;  %v2928_v40 = vpop.permute.xlu1 %2927 }
 0x36d   : > { %3009 = vst.msk [vmem:[#allocation2 + $0x78] sm:$0xff] %vm2993_vm7, %v2928_v40 }
 0x36e   : > { %v4432_v4 = vsel %vm4431_vm0, %v5165_v25, %v4428_v31  ;;  %3962 = vst.msk [vmem:[#allocation2 + $0x78] sm:$0xff] %vm3946_vm9, %v3881_v13  ;;  %v4010_v7 = vld [vmem:[#allocation2 + $0xf8] sm:$0xff] }
 0x36f   : > { %v4437_v53 = vsel %vm4434_vm10, %v4436_v26, %v4432_v4  ;;  %4994 = vmatmul.msk.f32.gmra.mxu3 %vm4016_vm8, %v4010_v7 }
 0x370   : > { %v4807_v33 = vmul.f32 %v4437_v53, %v8937_v18 }
 0x371   : > { %v4148_v32 = vpop.f32.mrf.mxu1 }
 0x372   : > { %v8959_v17 = vadd.f32 %v8855_v29, %v4148_v32  ;;  %4839 = vst.msk [vmem:[%s8901_s14 + $0x28] sm:$0xff] %vm262_vm1, %v4807_v33 }
 0x374   : > { %v4232_v15 = vsub.f32 0.0, %v8959_v17 }
 0x375   : > { %v3994_v50 = vld [vmem:[#allocation2 + $0x78] sm:$0xff] }
 0x376   : > { %v4270_v27 = vmul.f32 1.442695, %v4232_v15  ;;  %4978 = vmatmul.msk.f32.gmra.mxu1 %vm4016_vm8, %v3994_v50 }
 0x378   : > { %5166 = vpow2.f32 %v4270_v27  ;;  %v4178_v44 = vpop.f32.mrf.mxu3 }
 0x379   : > { %v4151_v12 = vpop.f32.mrf.mxu1  ;;  %v8975_v24 = vadd.f32 %v8855_v29, %v4178_v44 }
 0x37a   : > { %v8970_v38 = vadd.f32 %v8855_v29, %v4151_v12 }
 0x37b   : > { %v4242_v49 = vsub.f32 0.0, %v8975_v24 }
 0x37c   : > { %v4233_v62 = vsub.f32 0.0, %v8970_v38 }
 0x37d   : > { %v4290_v63 = vmul.f32 1.442695, %v4242_v49 }
 0x37e   : > { %v5167_v52 = vpop.eup %5166  ;;  %v4272_v34 = vmul.f32 1.442695, %v4233_v62 }
 0x37f   : > { %v4328_v28 = vadd.f32 1.0, %v5167_v52 }
 0x380   : > { %5168 = vpow2.f32 %v4272_v34  ;;  %v4181_v30 = vpop.f32.mrf.mxu3 }
 0x381   : > { %5170 = vrcp.f32 %v4328_v28  ;;  %v8981_v19 = vadd.f32 %v8855_v29, %v4181_v30  ;;  %v4449_v22 = vand.u32 2147483648, %v4328_v28  ;;  %v4447_v41 = vand.u32 2147483647, %v4328_v28 }
 0x382   : > { %5172 = vpow2.f32 %v4290_v63  ;;  %vm4443_vm7 = vweird.f32 %v4328_v28 }
 0x383   : > { %v4243_v3 = vsub.f32 0.0, %v8981_v19  ;;  %v4450_v46 = vor.u32 1.1754944e-38, %v4449_v22  ;;  %vm4448_vm8 = vcmp.eq.f32.partialorder %v4447_v41, 8.507059e+37 }
 0x385   : > { %v4292_v1 = vmul.f32 1.442695, %v4243_v3 }
 0x386   : > { %v5169_v18 = vpop.eup %5168 }
 0x387   : > { %v5171_v23 = vpop.eup %5170  ;;  %v4329_v2 = vadd.f32 1.0, %v5169_v18 }
 0x388   : > { %v4439_v5 = vmul.f32 %v5171_v23, %v4328_v28  ;;  %v5173_v51 = vpop.eup %5172  ;;  %vm4444_vm5 = vweird.f32 %v5171_v23  ;;  %v4184_v35 = vpop.f32.mrf.mxu3 }
 0x389   : > { %5174 = vrcp.f32 %v4329_v2  ;;  %v4338_v0 = vadd.f32 1.0, %v5173_v51  ;;  %v8986_v48 = vadd.f32 %v8855_v29, %v4184_v35  ;;  %vm4445_vm9 = vmor %vm4443_vm7, %vm4444_vm5  ;;  %v4461_v61 = vand.u32 2147483647, %v4329_v2 }
 0x38a   : > { %v4440_v10 = vsub.f32 1.0, %v4439_v5  ;;  %5176 = vpow2.f32 %v4292_v1  ;;  %v4463_v25 = vand.u32 2147483648, %v4329_v2  ;;  %vm4457_vm11 = vweird.f32 %v4329_v2 }
 0x38b   : > { %5178 = vrcp.f32 %v4338_v0  ;;  %v4244_v54 = vsub.f32 0.0, %v8986_v48  ;;  %vm4462_vm13 = vcmp.eq.f32.partialorder %v4461_v61, 8.507059e+37  ;;  %v4587_v4 = vand.u32 2147483647, %v4338_v0 }
 0x38c   : > { %v4441_v9 = vmul.f32 %v5171_v23, %v4440_v10  ;;  %v4464_v26 = vor.u32 1.1754944e-38, %v4463_v25  ;;  %v4589_v32 = vand.u32 2147483648, %v4338_v0  ;;  %vm4583_vm15 = vweird.f32 %v4338_v0 }
 0x38d   : > { %v4294_v6 = vmul.f32 1.442695, %v4244_v54  ;;  %vm4588_vm3 = vcmp.eq.f32.partialorder %v4587_v4, 8.507059e+37 }
 0x38e   : > { %v4442_v11 = vadd.f32 %v5171_v23, %v4441_v9  ;;  %v4590_v12 = vor.u32 1.1754944e-38, %v4589_v32 }
 0x38f   : > { %v5175_v8 = vpop.eup %5174  ;;  %5180 = vpow2.f32 %v4294_v6 }
 0x390   : > { %v4446_v42 = vsel %vm4445_vm9, %v5171_v23, %v4442_v11  ;;  %v4453_v37 = vmul.f32 %v5175_v8, %v4329_v2  ;;  %v5177_v20 = vpop.eup %5176  ;;  %vm4458_vm6 = vweird.f32 %v5175_v8  ;;  %v4187_v45 = vpop.f32.mrf.mxu3 }
 0x391   : > { %v4451_v14 = vsel %vm4448_vm8, %v4450_v46, %v4446_v42  ;;  %v5179_v39 = vpop.eup %5178  ;;  %v4339_v59 = vadd.f32 1.0, %v5177_v20  ;;  %v8993_v31 = vadd.f32 %v8855_v29, %v4187_v45  ;;  %vm4459_vm12 = vmor %vm4457_vm11, %vm4458_vm6 }
 0x392   : > { %v4808_v58 = vmul.f32 %v4451_v14, %v8959_v17  ;;  %v4454_v16 = vsub.f32 1.0, %v4453_v37  ;;  %v4579_v57 = vmul.f32 %v5179_v39, %v4338_v0  ;;  %vm4584_vm14 = vweird.f32 %v5179_v39 }
 0x393   : > { %5182 = vrcp.f32 %v4339_v59  ;;  %v4245_v55 = vsub.f32 0.0, %v8993_v31  ;;  %vm4585_vm2 = vmor %vm4583_vm15, %vm4584_vm14  ;;  %v4603_v28 = vand.u32 2147483648, %v4339_v59  ;;  %v4601_v63 = vand.u32 2147483647, %v4339_v59 }
 0x394   : > { %4840 = vst.msk [vmem:[%s8901_s14 + $0x30] sm:$0xff] %vm262_vm1, %v4808_v58  ;;  %v4455_v21 = vmul.f32 %v5175_v8, %v4454_v16  ;;  %v4580_v60 = vsub.f32 1.0, %v4579_v57  ;;  %vm4597_vm0 = vweird.f32 %v4339_v59 }
 0x395   : > { %v5181_v15 = vpop.eup %5180  ;;  %v4296_v47 = vmul.f32 1.442695, %v4245_v55  ;;  %vm4602_vm5 = vcmp.eq.f32.partialorder %v4601_v63, 8.507059e+37 }
 0x396   : > { %v4456_v56 = vadd.f32 %v5175_v8, %v4455_v21  ;;  %v4581_v17 = vmul.f32 %v5179_v39, %v4580_v60  ;;  %v4340_v62 = vadd.f32 1.0, %v5181_v15 }
 0x397   : > { %5184 = vpow2.f32 %v4296_v47 }
 0x398   : > { %v4460_v53 = vsel %vm4459_vm12, %v5175_v8, %v4456_v56  ;;  %v4582_v36 = vadd.f32 %v5179_v39, %v4581_v17  ;;  %v4190_v13 = vpop.f32.mrf.mxu3  ;;  %5186 = vrcp.f32 %v4340_v62  ;;  %v4617_v41 = vand.u32 2147483648, %v4340_v62 }
 0x399   : > { %v4465_v33 = vsel %vm4462_vm13, %v4464_v26, %v4460_v53  ;;  %v5183_v27 = vpop.eup %5182  ;;  %v9001_v7 = vadd.f32 %v8855_v29, %v4190_v13  ;;  %v4615_v11 = vand.u32 2147483647, %v4340_v62  ;;  %vm4611_vm9 = vweird.f32 %v4340_v62 }
 0x39a   : > { %v4809_v43 = vmul.f32 %v4465_v33, %v8970_v38  ;;  %v4586_v40 = vsel %vm4585_vm2, %v5179_v39, %v4582_v36  ;;  %v4593_v44 = vmul.f32 %v5183_v27, %v4339_v59  ;;  %vm4598_vm4 = vweird.f32 %v5183_v27 }
 0x39b   : > { %v4591_v52 = vsel %vm4588_vm3, %v4590_v12, %v4586_v40  ;;  %v4246_v30 = vsub.f32 0.0, %v9001_v7  ;;  %vm4599_vm10 = vmor %vm4597_vm0, %vm4598_vm4  ;;  %vm4616_vm6 = vcmp.eq.f32.partialorder %v4615_v11, 8.507059e+37 }
 0x39c   : > { %4841 = vst.msk [vmem:[%s8901_s14 + $0x38] sm:$0xff] %vm262_vm1, %v4809_v43  ;;  %v4818_v34 = vmul.f32 %v4591_v52, %v8975_v24  ;;  %v4594_v38 = vsub.f32 1.0, %v4593_v44  ;;  %v4604_v24 = vor.u32 1.1754944e-38, %v4603_v28 }
 0x39d   : > { %v5185_v50 = vpop.eup %5184  ;;  %v4298_v23 = vmul.f32 1.442695, %v4246_v30 }
 0x39e   : > { %4850 = vst.msk [vmem:[%s8901_s14 + $0x80] sm:$0xff] %vm262_vm1, %v4818_v34  ;;  %v4595_v49 = vmul.f32 %v5183_v27, %v4594_v38  ;;  %v5187_v2 = vpop.eup %5186  ;;  %v4341_v3 = vadd.f32 1.0, %v5185_v50 }
 0x39f   : > { %v4607_v51 = vmul.f32 %v5187_v2, %v4340_v62  ;;  %5188 = vpow2.f32 %v4298_v23  ;;  %vm4612_vm7 = vweird.f32 %v5187_v2 }
 0x3a0   : > { %v4596_v18 = vadd.f32 %v5183_v27, %v4595_v49  ;;  %v4193_v10 = vpop.f32.mrf.mxu3  ;;  %5190 = vrcp.f32 %v4341_v3  ;;  %vm4613_vm8 = vmor %vm4611_vm9, %vm4612_vm7  ;;  %v4631_v61 = vand.u32 2147483648, %v4341_v3  ;;  %v4629_v59 = vand.u32 2147483647, %v4341_v3 }
 0x3a1   : > { %v4608_v0 = vsub.f32 1.0, %v4607_v51  ;;  %v9008_v9 = vadd.f32 %v8855_v29, %v4193_v10  ;;  %vm4625_vm12 = vweird.f32 %v4341_v3 }
 0x3a2   : > { %v4600_v5 = vsel %vm4599_vm10, %v5183_v27, %v4596_v18  ;;  %v4632_v26 = vor.u32 1.1754944e-38, %v4631_v61  ;;  %vm4630_vm14 = vcmp.eq.f32.partialorder %v4629_v59, 8.507059e+37 }
 0x3a3   : > { %v4605_v1 = vsel %vm4602_vm5, %v4604_v24, %v4600_v5  ;;  %v4609_v35 = vmul.f32 %v5187_v2, %v4608_v0  ;;  %v4247_v8 = vsub.f32 0.0, %v9008_v9 }
 0x3a4   : > { %v4819_v22 = vmul.f32 %v4605_v1, %v8981_v19  ;;  %v4618_v19 = vor.u32 1.1754944e-38, %v4617_v41 }
 0x3a5   : > { %v5189_v46 = vpop.eup %5188  ;;  %v4610_v42 = vadd.f32 %v5187_v2, %v4609_v35  ;;  %v4300_v37 = vmul.f32 1.442695, %v4247_v8 }
 0x3a6   : > { %4851 = vst.msk [vmem:[%s8901_s14 + $0x88] sm:$0xff] %vm262_vm1, %v4819_v22  ;;  %v5191_v54 = vpop.eup %5190  ;;  %v4342_v14 = vadd.f32 1.0, %v5189_v46 }
 0x3a7   : > { %v4614_v20 = vsel %vm4613_vm8, %v5187_v2, %v4610_v42  ;;  %v4621_v58 = vmul.f32 %v5191_v54, %v4341_v3  ;;  %5192 = vpow2.f32 %v4300_v37  ;;  %vm4626_vm11 = vweird.f32 %v5191_v54 }
 0x3a8   : > { %v4619_v16 = vsel %vm4616_vm6, %v4618_v19, %v4614_v20  ;;  %5194 = vrcp.f32 %v4342_v14  ;;  %vm4627_vm13 = vmor %vm4625_vm12, %vm4626_vm11  ;;  %v4196_v17 = vpop.f32.mrf.mxu3  ;;  %v4645_v36 = vand.u32 2147483648, %v4342_v14  ;;  %v4643_v12 = vand.u32 2147483647, %v4342_v14 }
 0x3a9   : > { %v4820_v6 = vmul.f32 %v4619_v16, %v8986_v48  ;;  %v4622_v39 = vsub.f32 1.0, %v4621_v58  ;;  %v9022_v47 = vadd.f32 %v8855_v29, %v4196_v17  ;;  %vm4639_vm2 = vweird.f32 %v4342_v14 }
 0x3aa   : > { %v4646_v52 = vor.u32 1.1754944e-38, %v4645_v36  ;;  %vm4644_vm4 = vcmp.eq.f32.partialorder %v4643_v12, 8.507059e+37 }
 0x3ab   : > { %4852 = vst.msk [vmem:[%s8901_s14 + $0x90] sm:$0xff] %vm262_vm1, %v4820_v6  ;;  %v4623_v25 = vmul.f32 %v5191_v54, %v4622_v39  ;;  %v4248_v62 = vsub.f32 0.0, %v9022_v47 }
 0x3ad   : > { %v5193_v57 = vpop.eup %5192  ;;  %v4624_v45 = vadd.f32 %v5191_v54, %v4623_v25  ;;  %v4302_v34 = vmul.f32 1.442695, %v4248_v62 }
 0x3ae   : > { %v5195_v60 = vpop.eup %5194  ;;  %v4343_v4 = vadd.f32 1.0, %v5193_v57 }
 0x3af   : > { %v4628_v48 = vsel %vm4627_vm13, %v5191_v54, %v4624_v45  ;;  %v4635_v32 = vmul.f32 %v5195_v60, %v4342_v14  ;;  %vm4640_vm15 = vweird.f32 %v5195_v60 }
 0x3b0   : > { %v4633_v55 = vsel %vm4630_vm14, %v4632_v26, %v4628_v48  ;;  %5196 = vrcp.f32 %v4343_v4  ;;  %vm4641_vm3 = vmor %vm4639_vm2, %vm4640_vm15  ;;  %v4199_v63 = vpop.f32.mrf.mxu3  ;;  %v4657_v3 = vand.u32 2147483647, %v4343_v4  ;;  %v4659_v5 = vand.u32 2147483648, %v4343_v4 }
 0x3b1   : > { %v4154_v21 = vpop.f32.mrf.mxu1  ;;  %v4821_v33 = vmul.f32 %v4633_v55, %v8993_v31  ;;  %v4636_v15 = vsub.f32 1.0, %v4635_v32  ;;  %v9032_v50 = vadd.f32 %v8855_v29, %v4199_v63  ;;  %vm4653_vm10 = vweird.f32 %v4343_v4 }
 0x3b2   : > { %v9017_v56 = vadd.f32 %v8855_v29, %v4154_v21  ;;  %vm4658_vm7 = vcmp.eq.f32.partialorder %v4657_v3, 8.507059e+37  ;;  %v4660_v11 = vor.u32 1.1754944e-38, %v4659_v5 }
 0x3b3   : > { %4853 = vst.msk [vmem:[%s8901_s14 + $0x98] sm:$0xff] %vm262_vm1, %v4821_v33  ;;  %v4637_v27 = vmul.f32 %v5195_v60, %v4636_v15  ;;  %v4249_v10 = vsub.f32 0.0, %v9032_v50 }
 0x3b4   : > { %v4234_v53 = vsub.f32 0.0, %v9017_v56 }
 0x3b5   : > { %v4638_v44 = vadd.f32 %v5195_v60, %v4637_v27  ;;  %v4304_v41 = vmul.f32 1.442695, %v4249_v10 }
 0x3b6   : > { %v4274_v43 = vmul.f32 1.442695, %v4234_v53  ;;  %v5197_v31 = vpop.eup %5196 }
 0x3b7   : > { %v4642_v38 = vsel %vm4641_vm3, %v5195_v60, %v4638_v44  ;;  %v4649_v28 = vmul.f32 %v5197_v31, %v4343_v4  ;;  %vm4654_vm0 = vweird.f32 %v5197_v31 }
 0x3b8   : > { %5198 = vpow2.f32 %v4274_v43  ;;  %v4647_v30 = vsel %vm4644_vm4, %v4646_v52, %v4642_v38  ;;  %vm4655_vm5 = vmor %vm4653_vm10, %vm4654_vm0  ;;  %v4202_v14 = vpop.f32.mrf.mxu3 }
 0x3b9   : > { %v4157_v40 = vpop.f32.mrf.mxu1  ;;  %5200 = vpow2.f32 %v4302_v34  ;;  %v4822_v23 = vmul.f32 %v4647_v30, %v9001_v7  ;;  %v4650_v2 = vsub.f32 1.0, %v4649_v28  ;;  %v9046_v6 = vadd.f32 %v8855_v29, %v4202_v14 }
 0x3ba   : > { %v9028_v13 = vadd.f32 %v8855_v29, %v4157_v40 }
 0x3bb   : > { %4854 = vst.msk [vmem:[%s8901_s14 + $0xa0] sm:$0xff] %vm262_vm1, %v4822_v23  ;;  %v4651_v1 = vmul.f32 %v5197_v31, %v4650_v2 }
 0x3bc   : > { %v4235_v49 = vsub.f32 0.0, %v9028_v13 }
 0x3bd   : > { %v4652_v0 = vadd.f32 %v5197_v31, %v4651_v1 }
 0x3be   : > { %v5199_v18 = vpop.eup %5198  ;;  %v4276_v24 = vmul.f32 1.442695, %v4235_v49 }
 0x3bf   : > { %v4330_v51 = vadd.f32 1.0, %v5199_v18  ;;  %v5201_v7 = vpop.eup %5200  ;;  %v4656_v8 = vsel %vm4655_vm5, %v5197_v31, %v4652_v0 }
 0x3c0   : > { %5202 = vpow2.f32 %v4276_v24  ;;  %v4344_v46 = vadd.f32 1.0, %v5201_v7  ;;  %v4661_v37 = vsel %vm4658_vm7, %v4660_v11, %v4656_v8  ;;  %v4205_v5 = vpop.f32.mrf.mxu3 }
 0x3c1   : > { %5204 = vrcp.f32 %v4330_v51  ;;  %v4160_v22 = vpop.f32.mrf.mxu1  ;;  %v4823_v19 = vmul.f32 %v4661_v37, %v9008_v9  ;;  %v4475_v61 = vand.u32 2147483647, %v4330_v51  ;;  %v4477_v21 = vand.u32 2147483648, %v4330_v51 }
 0x3c2   : > { %v9039_v35 = vadd.f32 %v8855_v29, %v4160_v22  ;;  %5206 = vpow2.f32 %v4304_v41  ;;  %v4250_v9 = vsub.f32 0.0, %v9046_v6  ;;  %vm4471_vm8 = vweird.f32 %v4330_v51 }
 0x3c3   : > { %5208 = vrcp.f32 %v4344_v46  ;;  %4855 = vst.msk [vmem:[%s8901_s14 + $0xa8] sm:$0xff] %vm262_vm1, %v4823_v19  ;;  %vm4476_vm6 = vcmp.eq.f32.partialorder %v4475_v61, 8.507059e+37  ;;  %v4478_v17 = vor.u32 1.1754944e-38, %v4477_v21  ;;  %v4671_v15 = vand.u32 2147483647, %v4344_v46 }
 0x3c4   : > { %v4236_v42 = vsub.f32 0.0, %v9039_v35  ;;  %v4306_v48 = vmul.f32 1.442695, %v4250_v9  ;;  %v4673_v43 = vand.u32 2147483648, %v4344_v46  ;;  %vm4667_vm12 = vweird.f32 %v4344_v46 }
 0x3c5   : > { %vm4672_vm14 = vcmp.eq.f32.partialorder %v4671_v15, 8.507059e+37 }
 0x3c6   : > { %v5203_v54 = vpop.eup %5202  ;;  %v4278_v16 = vmul.f32 1.442695, %v4236_v42  ;;  %v4674_v30 = vor.u32 1.1754944e-38, %v4673_v43 }
 0x3c7   : > { %v5205_v20 = vpop.eup %5204  ;;  %v9043_v58 = vadd.f32 1.0, %v5203_v54 }
 0x3c8   : > { %v4467_v39 = vmul.f32 %v5205_v20, %v4330_v51  ;;  %v5207_v25 = vpop.eup %5206  ;;  %vm4472_vm9 = vweird.f32 %v5205_v20 }
 0x3c9   : > { %5210 = vrcp.f32 %v9043_v58  ;;  %v4163_v57 = vpop.f32.mrf.mxu1  ;;  %v9052_v45 = vadd.f32 1.0, %v5207_v25  ;;  %v5209_v26 = vpop.eup %5208  ;;  %vm4473_vm11 = vmor %vm4471_vm8, %vm4472_vm9  ;;  %v4489_v62 = vand.u32 2147483647, %v9043_v58  ;;  %v4491_v38 = vand.u32 2147483648, %v9043_v58 }
 0x3ca   : > { %v4468_v59 = vsub.f32 1.0, %v4467_v39  ;;  %5212 = vpow2.f32 %v4278_v16  ;;  %v9055_v60 = vadd.f32 %v8855_v29, %v4163_v57  ;;  %v4663_v32 = vmul.f32 %v5209_v26, %v4344_v46  ;;  %v9084_v46 = vld [vmem:[%s9247_s4] ss:$0 sm:$0xff] }
 0x3cb   : > { %5214 = vrcp.f32 %v9052_v45  ;;  %vm4668_vm13 = vweird.f32 %v5209_v26  ;;  %vm4485_vm2 = vweird.f32 %v9043_v58  ;;  %vm9071_vm4 = vcmp.eq.f32.partialorder %v4489_v62, 8.507059e+37 }
 0x3cc   : > { %v4469_v4 = vmul.f32 %v5205_v20, %v4468_v59  ;;  %5216 = vpow2.f32 %v4306_v48  ;;  %v4664_v33 = vsub.f32 1.0, %v4663_v32  ;;  %v4237_v29 = vsub.f32 0.0, %v9055_v60  ;;  %vm4669_vm15 = vmor %vm4667_vm12, %vm4668_vm13 }
 0x3cd   : > { %v4492_v1 = vor.u32 1.1754944e-38, %v4491_v38  ;;  %v4685_v41 = vand.u32 2147483647, %v9052_v45  ;;  %v4687_v7 = vand.u32 2147483648, %v9052_v45  ;;  %v9087_v42 = vadd.f32 %v9084_v46, %v4205_v5 }
 0x3ce   : > { %v4470_v53 = vadd.f32 %v5205_v20, %v4469_v4  ;;  %v4665_v44 = vmul.f32 %v5209_v26, %v4664_v33  ;;  %v4280_v28 = vmul.f32 1.442695, %v4237_v29  ;;  %vm4681_vm5 = vweird.f32 %v9052_v45 }
 0x3cf   : > { %v5211_v55 = vpop.eup %5210  ;;  %v4251_v39 = vsub.f32 0.0, %v9087_v42  ;;  %vm4686_vm9 = vcmp.eq.f32.partialorder %v4685_v41, 8.507059e+37 }
 0x3d0   : > { %v5213_v36 = vpop.eup %5212  ;;  %v4474_v27 = vsel %vm4473_vm11, %v5205_v20, %v4470_v53  ;;  %v4481_v12 = vmul.f32 %v5211_v55, %v9043_v58  ;;  %v4666_v63 = vadd.f32 %v5209_v26, %v4665_v44  ;;  %vm4486_vm3 = vweird.f32 %v5211_v55 }
 0x3d1   : > { %v4479_v40 = vsel %vm4476_vm6, %v4478_v17, %v4474_v27  ;;  %v9061_v31 = vadd.f32 1.0, %v5213_v36  ;;  %v5215_v49 = vpop.eup %5214  ;;  %vm4487_vm0 = vmor %vm4485_vm2, %vm4486_vm3  ;;  %v4688_v58 = vor.u32 1.1754944e-38, %v4687_v7 }
 0x3d2   : > { %v4810_v52 = vmul.f32 %v4479_v40, %v9017_v56  ;;  %v4482_v34 = vsub.f32 1.0, %v4481_v12  ;;  %v5217_v18 = vpop.eup %5216  ;;  %v4677_v56 = vmul.f32 %v5215_v49, %v9052_v45  ;;  %v4670_v2 = vsel %vm4669_vm15, %v5209_v26, %v4666_v63 }
 0x3d3   : > { %5218 = vrcp.f32 %v9061_v31  ;;  %v9075_v3 = vadd.f32 1.0, %v5217_v18  ;;  %v4675_v51 = vsel %vm4672_vm14, %v4674_v30, %v4670_v2  ;;  %vm4682_vm10 = vweird.f32 %v5215_v49 }
 0x3d4   : > { %4842 = vst.msk [vmem:[%s8901_s14 + $0x40] sm:$0xff] %vm262_vm1, %v4810_v52  ;;  %v4483_v23 = vmul.f32 %v5211_v55, %v4482_v34  ;;  %5220 = vpow2.f32 %v4280_v28  ;;  %v4678_v22 = vsub.f32 1.0, %v4677_v56  ;;  %v4824_v0 = vmul.f32 %v4675_v51, %v9022_v47  ;;  %vm4683_vm7 = vmor %vm4681_vm5, %vm4682_vm10 }
 0x3d5   : > { %5222 = vrcp.f32 %v9075_v3  ;;  %v4503_v16 = vand.u32 2147483647, %v9061_v31  ;;  %v4505_v57 = vand.u32 2147483648, %v9061_v31  ;;  %v4308_v45 = vmul.f32 1.442695, %v4251_v39 }
 0x3d6   : > { %v4484_v10 = vadd.f32 %v5211_v55, %v4483_v23  ;;  %v4679_v8 = vmul.f32 %v5215_v49, %v4678_v22  ;;  %4856 = vst.msk [vmem:[%s8901_s14 + $0xb0] sm:$0xff] %vm262_vm1, %v4824_v0  ;;  %vm4499_vm6 = vweird.f32 %v9061_v31  ;;  %v4699_v43 = vand.u32 2147483647, %v9075_v3 }
 0x3d7   : > { %vm9109_vm11 = vcmp.eq.f32.partialorder %v4503_v16, 8.507059e+37  ;;  %v4506_v15 = vor.u32 1.1754944e-38, %v4505_v57  ;;  %v4701_v29 = vand.u32 2147483648, %v9075_v3  ;;  %vm4695_vm14 = vweird.f32 %v9075_v3 }
 0x3d8   : > { %v4488_v11 = vsel %vm4487_vm0, %v5211_v55, %v4484_v10  ;;  %v4680_v19 = vadd.f32 %v5215_v49, %v4679_v8  ;;  %vm4700_vm2 = vcmp.eq.f32.partialorder %v4699_v43, 8.507059e+37 }
 0x3d9   : > { %v5219_v47 = vpop.eup %5218  ;;  %v4493_v37 = vsel %vm9071_vm4, %v4492_v1, %v4488_v11  ;;  %v4702_v38 = vor.u32 1.1754944e-38, %v4701_v29 }
 0x3da   : > { %v4811_v54 = vmul.f32 %v4493_v37, %v9028_v13  ;;  %v4495_v14 = vmul.f32 %v5219_v47, %v9061_v31  ;;  %v5221_v20 = vpop.eup %5220  ;;  %v4684_v61 = vsel %vm4683_vm7, %v5215_v49, %v4680_v19  ;;  %v4166_v13 = vpop.f32.mrf.mxu1  ;;  %vm4500_vm8 = vweird.f32 %v5219_v47 }
 0x3db   : > { %v9100_v59 = vadd.f32 1.0, %v5221_v20  ;;  %v5223_v21 = vpop.eup %5222  ;;  %v4689_v9 = vsel %vm4686_vm9, %v4688_v58, %v4684_v61  ;;  %v9104_v26 = vadd.f32 %v9084_v46, %v4166_v13  ;;  %vm4501_vm12 = vmor %vm4499_vm6, %vm4500_vm8 }
 0x3dc   : > { %4843 = vst.msk [vmem:[%s8901_s14 + $0x48] sm:$0xff] %vm262_vm1, %v4811_v54  ;;  %v4496_v25 = vsub.f32 1.0, %v4495_v14  ;;  %v4825_v4 = vmul.f32 %v4689_v9, %v9032_v50  ;;  %v4691_v32 = vmul.f32 %v5223_v21, %v9075_v3  ;;  %v4208_v50 = vpop.f32.mrf.mxu3  ;;  %vm4696_vm13 = vweird.f32 %v5223_v21 }
 0x3dd   : > { %5224 = vrcp.f32 %v9100_v59  ;;  %v4238_v33 = vsub.f32 0.0, %v9104_v26  ;;  %v9120_v36 = vadd.f32 %v9084_v46, %v4208_v50  ;;  %vm4697_vm15 = vmor %vm4695_vm14, %vm4696_vm13  ;;  %v4517_v24 = vand.u32 2147483647, %v9100_v59 }
 0x3de   : > { %v4497_v48 = vmul.f32 %v5219_v47, %v4496_v25  ;;  %4857 = vst.msk [vmem:[%s8901_s14 + $0xb8] sm:$0xff] %vm262_vm1, %v4825_v4  ;;  %v4692_v55 = vsub.f32 1.0, %v4691_v32  ;;  %5226 = vpow2.f32 %v4308_v45  ;;  %v4519_v3 = vand.u32 2147483648, %v9100_v59 }
 0x3df   : > { %v4282_v62 = vmul.f32 1.442695, %v4238_v33  ;;  %v4252_v44 = vsub.f32 0.0, %v9120_v36  ;;  %vm4513_vm4 = vweird.f32 %v9100_v59  ;;  %vm4518_vm10 = vcmp.eq.f32.partialorder %v4517_v24, 8.507059e+37 }
 0x3e0   : > { %v4498_v17 = vadd.f32 %v5219_v47, %v4497_v48  ;;  %v4693_v12 = vmul.f32 %v5223_v21, %v4692_v55  ;;  %v4520_v41 = vor.u32 1.1754944e-38, %v4519_v3 }
 0x3e1   : > { %5228 = vpow2.f32 %v4282_v62  ;;  %v4310_v28 = vmul.f32 1.442695, %v4252_v44 }
 0x3e2   : > { %v4502_v27 = vsel %vm4501_vm12, %v5219_v47, %v4498_v17  ;;  %v4694_v52 = vadd.f32 %v5223_v21, %v4693_v12  ;;  %v4169_v7 = vpop.f32.mrf.mxu1 }
 0x3e3   : > { %v4507_v40 = vsel %vm9109_vm11, %v4506_v15, %v4502_v27  ;;  %v5225_v34 = vpop.eup %5224  ;;  %5230 = vpow2.f32 %v4310_v28  ;;  %v9146_v37 = vadd.f32 %v9084_v46, %v4169_v7 }
 0x3e4   : > { %v4812_v31 = vmul.f32 %v4507_v40, %v9039_v35  ;;  %v5227_v49 = vpop.eup %5226  ;;  %v4698_v63 = vsel %vm4697_vm15, %v5223_v21, %v4694_v52  ;;  %v4509_v30 = vmul.f32 %v5225_v34, %v9100_v59  ;;  %v4211_v2 = vpop.f32.mrf.mxu3  ;;  %vm4514_vm3 = vweird.f32 %v5225_v34 }
 0x3e5   : > { %v4703_v18 = vsel %vm4700_vm2, %v4702_v38, %v4698_v63  ;;  %v4347_v23 = vadd.f32 1.0, %v5227_v49  ;;  %v9136_v10 = vadd.f32 %v9084_v46, %v4211_v2  ;;  %vm4515_vm0 = vmor %vm4513_vm4, %vm4514_vm3  ;;  %v4239_v61 = vsub.f32 0.0, %v9146_v37 }
 0x3e6   : > { %4844 = vst.msk [vmem:[%s8901_s14 + $0x50] sm:$0xff] %vm262_vm1, %v4812_v31  ;;  %v4826_v35 = vmul.f32 %v4703_v18, %v9046_v6  ;;  %v4510_v56 = vsub.f32 1.0, %v4509_v30 }
 0x3e7   : > { %5232 = vrcp.f32 %v4347_v23  ;;  %v5229_v5 = vpop.eup %5228  ;;  %v4253_v6 = vsub.f32 0.0, %v9136_v10  ;;  %v4713_v58 = vand.u32 2147483647, %v4347_v23  ;;  %v4715_v39 = vand.u32 2147483648, %v4347_v23 }
 0x3e8   : > { %4858 = vst.msk [vmem:[%s8901_s14 + $0xc0] sm:$0xff] %vm262_vm1, %v4826_v35  ;;  %v4511_v51 = vmul.f32 %v5225_v34, %v4510_v56  ;;  %v9138_v1 = vadd.f32 1.0, %v5229_v5  ;;  %v4284_v9 = vmul.f32 1.442695, %v4239_v61  ;;  %vm4709_vm7 = vweird.f32 %v4347_v23 }
 0x3e9   : > { %v5231_v0 = vpop.eup %5230  ;;  %v4312_v47 = vmul.f32 1.442695, %v4253_v6  ;;  %vm9154_vm9 = vcmp.eq.f32.partialorder %v4713_v58, 8.507059e+37  ;;  %v4716_v32 = vor.u32 1.1754944e-38, %v4715_v39 }
 0x3ea   : > { %v4512_v22 = vadd.f32 %v5225_v34, %v4511_v51  ;;  %5234 = vrcp.f32 %v9138_v1  ;;  %v9143_v8 = vadd.f32 1.0, %v5231_v0  ;;  %v4533_v57 = vand.u32 2147483648, %v9138_v1  ;;  %v4172_v6 = vpop.f32.mrf.mxu1 }
 0x3eb   : > { %vm4527_vm6 = vweird.f32 %v9138_v1  ;;  %v4531_v55 = vand.u32 2147483647, %v9138_v1 }
 0x3ec   : > { %v4516_v11 = vsel %vm4515_vm0, %v5225_v34, %v4512_v22  ;;  %5236 = vrcp.f32 %v9143_v8  ;;  %v4214_v59 = vpop.f32.mrf.mxu3  ;;  %v4534_v12 = vor.u32 1.1754944e-38, %v4533_v57  ;;  %v4729_v52 = vand.u32 2147483648, %v9143_v8 }
 0x3ed   : > { %v5233_v54 = vpop.eup %5232  ;;  %v4521_v19 = vsel %vm4518_vm10, %v4520_v41, %v4516_v11  ;;  %5238 = vpow2.f32 %v4312_v47  ;;  %v9160_v45 = vadd.f32 %v9084_v46, %v4214_v59  ;;  %v4727_v38 = vand.u32 2147483647, %v9143_v8 }
 0x3ee   : > { %v4813_v14 = vmul.f32 %v4521_v19, %v9055_v60  ;;  %v4705_v20 = vmul.f32 %v5233_v54, %v4347_v23  ;;  %vm4710_vm5 = vweird.f32 %v5233_v54  ;;  %5240 = vpow2.f32 %v4284_v9 }
 0x3ef   : > { %vm4711_vm8 = vmor %vm4709_vm7, %vm4710_vm5  ;;  %v4254_v50 = vsub.f32 0.0, %v9160_v45  ;;  %vm4532_vm14 = vcmp.eq.f32.partialorder %v4531_v55, 8.507059e+37  ;;  %vm4723_vm15 = vweird.f32 %v9143_v8  ;;  %v4730_v35 = vor.u32 1.1754944e-38, %v4729_v52 }
 0x3f0   : > { %4845 = vst.msk [vmem:[%s8901_s14 + $0x58] sm:$0xff] %vm262_vm1, %v4813_v14  ;;  %v4706_v16 = vsub.f32 1.0, %v4705_v20  ;;  %v5235_v25 = vpop.eup %5234  ;;  %vm4728_vm3 = vcmp.eq.f32.partialorder %v4727_v38, 8.507059e+37  ;;  %v9187_v41 = vadd.f32 %v9084_v46, %v4172_v6 }
 0x3f1   : > { %v4523_v21 = vmul.f32 %v5235_v25, %v9138_v1  ;;  %vm4528_vm11 = vweird.f32 %v5235_v25  ;;  %v4314_v40 = vmul.f32 1.442695, %v4254_v50 }
 0x3f2   : > { %v4707_v13 = vmul.f32 %v5233_v54, %v4706_v16  ;;  %v5237_v4 = vpop.eup %5236  ;;  %vm4529_vm12 = vmor %vm4527_vm6, %vm4528_vm11 }
 0x3f3   : > { %v4524_v53 = vsub.f32 1.0, %v4523_v21  ;;  %v5239_v17 = vpop.eup %5238  ;;  %v4719_v33 = vmul.f32 %v5237_v4, %v9143_v8  ;;  %vm4724_vm13 = vweird.f32 %v5237_v4 }
 0x3f4   : > { %v4708_v48 = vadd.f32 %v5233_v54, %v4707_v13  ;;  %v4349_v29 = vadd.f32 1.0, %v5239_v17  ;;  %v4217_v28 = vpop.f32.mrf.mxu3  ;;  %v5241_v49 = vpop.eup %5240  ;;  %vm4725_vm2 = vmor %vm4723_vm15, %vm4724_vm13 }
 0x3f5   : > { %v4525_v43 = vmul.f32 %v5235_v25, %v4524_v53  ;;  %v4720_v62 = vsub.f32 1.0, %v4719_v33  ;;  %v4335_v56 = vadd.f32 1.0, %v5241_v49  ;;  %v4175_v49 = vpop.f32.mrf.mxu1 }
 0x3f6   : > { %v4712_v15 = vsel %vm4711_vm8, %v5233_v54, %v4708_v48  ;;  %5242 = vrcp.f32 %v4349_v29  ;;  %v4741_v11 = vand.u32 2147483647, %v4349_v29  ;;  %v4743_v8 = vand.u32 2147483648, %v4349_v29 }
 0x3f7   : > { %v4717_v27 = vsel %vm9154_vm9, %v4716_v32, %v4712_v15  ;;  %v4526_v31 = vadd.f32 %v5235_v25, %v4525_v43  ;;  %v4721_v34 = vmul.f32 %v5237_v4, %v4720_v62  ;;  %5244 = vpow2.f32 %v4314_v40 }
 0x3f8   : > { %v4827_v44 = vmul.f32 %v4717_v27, %v9087_v42  ;;  %v9176_v42 = vadd.f32 %v9084_v46, %v4217_v28  ;;  %5246 = vrcp.f32 %v4335_v56  ;;  %vm4737_vm0 = vweird.f32 %v4349_v29 }
 0x3f9   : > { %v4530_v63 = vsel %vm4529_vm12, %v5235_v25, %v4526_v31  ;;  %v4722_v18 = vadd.f32 %v5237_v4, %v4721_v34  ;;  %vm4742_vm5 = vcmp.eq.f32.partialorder %v4741_v11, 8.507059e+37  ;;  %v4744_v39 = vor.u32 1.1754944e-38, %v4743_v8 }
 0x3fa   : > { %4859 = vst.msk [vmem:[%s8901_s14 + $0xc8] sm:$0xff] %vm262_vm1, %v4827_v44  ;;  %v4535_v30 = vsel %vm4532_vm14, %v4534_v12, %v4530_v63  ;;  %v4255_v2 = vsub.f32 0.0, %v9176_v42  ;;  %v4545_v13 = vand.u32 2147483647, %v4335_v56  ;;  %v4547_v60 = vand.u32 2147483648, %v4335_v56 }
 0x3fb   : > { %v4814_v23 = vmul.f32 %v4535_v30, %v9104_v26  ;;  %v4726_v24 = vsel %vm4725_vm2, %v5237_v4, %v4722_v18  ;;  %vm4541_vm9 = vweird.f32 %v4335_v56 }
 0x3fc   : > { %v5243_v3 = vpop.eup %5242  ;;  %v4731_v5 = vsel %vm4728_vm3, %v4730_v35, %v4726_v24  ;;  %v4316_v26 = vmul.f32 1.442695, %v4255_v2  ;;  %v4220_v54 = vpop.f32.mrf.mxu3  ;;  %vm4546_vm8 = vcmp.eq.f32.partialorder %v4545_v13, 8.507059e+37  ;;  %v4548_v15 = vor.u32 1.1754944e-38, %v4547_v60 }
 0x3fd   : > { %4846 = vst.msk [vmem:[%s8901_s14 + $0x60] sm:$0xff] %vm262_vm1, %v4814_v23  ;;  %v5245_v51 = vpop.eup %5244  ;;  %v4828_v1 = vmul.f32 %v4731_v5, %v9120_v36  ;;  %v4733_v22 = vmul.f32 %v5243_v3, %v4349_v29  ;;  %vm4738_vm4 = vweird.f32 %v5243_v3  ;;  %v4240_v36 = vsub.f32 0.0, %v9187_v41 }
 0x3fe   : > { %v9184_v0 = vadd.f32 1.0, %v5245_v51  ;;  %v5247_v19 = vpop.eup %5246  ;;  %v9194_v14 = vadd.f32 %v9084_v46, %v4220_v54  ;;  %vm4739_vm10 = vmor %vm4737_vm0, %vm4738_vm4 }
 0x3ff   : > { %4860 = vst.msk [vmem:[%s8901_s14 + $0xd0] sm:$0xff] %vm262_vm1, %v4828_v1  ;;  %v4734_v7 = vsub.f32 1.0, %v4733_v22  ;;  %v4537_v58 = vmul.f32 %v5247_v19, %v4335_v56  ;;  %v4286_v16 = vmul.f32 1.442695, %v4240_v36  ;;  %vm4542_vm7 = vweird.f32 %v5247_v19 }
 0x400   : > { %5248 = vrcp.f32 %v9184_v0  ;;  %v4256_v61 = vsub.f32 0.0, %v9194_v14  ;;  %vm4543_vm6 = vmor %vm4541_vm9, %vm4542_vm7  ;;  %v4755_v43 = vand.u32 2147483647, %v9184_v0  ;;  %v4757_v29 = vand.u32 2147483648, %v9184_v0 }
 0x401   : > { %v4735_v47 = vmul.f32 %v5243_v3, %v4734_v7  ;;  %5250 = vpow2.f32 %v4316_v26  ;;  %v4538_v59 = vsub.f32 1.0, %v4537_v58  ;;  %vm4751_vm12 = vweird.f32 %v9184_v0 }
 0x402   : > { %5252 = vpow2.f32 %v4286_v16  ;;  %v4318_v57 = vmul.f32 1.442695, %v4256_v61  ;;  %vm4756_vm14 = vcmp.eq.f32.partialorder %v4755_v43, 8.507059e+37  ;;  %v4758_v28 = vor.u32 1.1754944e-38, %v4757_v29 }
 0x403   : > { %v4736_v20 = vadd.f32 %v5243_v3, %v4735_v47  ;;  %v4539_v32 = vmul.f32 %v5247_v19, %v4538_v59 }
 0x404   : > { %5254 = vpow2.f32 %v4318_v57  ;;  %v4223_v50 = vpop.f32.mrf.mxu3 }
 0x405   : > { %v4740_v25 = vsel %vm4739_vm10, %v5243_v3, %v4736_v20  ;;  %v4540_v55 = vadd.f32 %v5247_v19, %v4539_v32  ;;  %v9204_v62 = vadd.f32 %v9084_v46, %v4223_v50 }
 0x406   : > { %v5249_v21 = vpop.eup %5248  ;;  %v4745_v9 = vsel %vm4742_vm5, %v4744_v39, %v4740_v25 }
 0x407   : > { %v5251_v4 = vpop.eup %5250  ;;  %v4829_v48 = vmul.f32 %v4745_v9, %v9136_v10  ;;  %v4747_v53 = vmul.f32 %v5249_v21, %v9184_v0  ;;  %v4544_v27 = vsel %vm4543_vm6, %v5247_v19, %v4540_v55  ;;  %vm4752_vm11 = vweird.f32 %v5249_v21 }
 0x408   : > { %v4351_v17 = vadd.f32 1.0, %v5251_v4  ;;  %v5253_v10 = vpop.eup %5252  ;;  %v4549_v40 = vsel %vm4546_vm8, %v4548_v15, %v4544_v27  ;;  %v4257_v34 = vsub.f32 0.0, %v9204_v62  ;;  %vm4753_vm13 = vmor %vm4751_vm12, %vm4752_vm11 }
 0x409   : > { %4861 = vst.msk [vmem:[%s8901_s14 + $0xd8] sm:$0xff] %vm262_vm1, %v4829_v48  ;;  %v4748_v33 = vsub.f32 1.0, %v4747_v53  ;;  %v9206_v44 = vadd.f32 1.0, %v5253_v10  ;;  %v4815_v31 = vmul.f32 %v4549_v40, %v9146_v37  ;;  %v9215_v37 = vadd.f32 %v9084_v46, %v4175_v49 }
 0x40a   : > { %5256 = vrcp.f32 %v4351_v17  ;;  %v5255_v38 = vpop.eup %5254  ;;  %v4320_v18 = vmul.f32 1.442695, %v4257_v34  ;;  %v4769_v3 = vand.u32 2147483647, %v4351_v17  ;;  %v4771_v1 = vand.u32 2147483648, %v4351_v17 }
 0x40b   : > { %v4749_v12 = vmul.f32 %v5249_v21, %v4748_v33  ;;  %5258 = vrcp.f32 %v9206_v44  ;;  %4847 = vst.msk [vmem:[%s8901_s14 + $0x68] sm:$0xff] %vm262_vm1, %v4815_v31  ;;  %v4352_v30 = vadd.f32 1.0, %v5255_v38  ;;  %v4241_v5 = vsub.f32 0.0, %v9215_v37 }
 0x40c   : > { %vm4765_vm2 = vweird.f32 %v4351_v17  ;;  %vm4770_vm3 = vcmp.eq.f32.partialorder %v4769_v3, 8.507059e+37  ;;  %v4772_v11 = vor.u32 1.1754944e-38, %v4771_v1  ;;  %v4559_v8 = vand.u32 2147483647, %v9206_v44 }
 0x40d   : > { %v4750_v52 = vadd.f32 %v5249_v21, %v4749_v12  ;;  %5260 = vrcp.f32 %v4352_v30  ;;  %v4288_v6 = vmul.f32 1.442695, %v4241_v5  ;;  %v4561_v47 = vand.u32 2147483648, %v9206_v44 }
 0x40e   : > { %5262 = vpow2.f32 %v4320_v18  ;;  %vm4555_vm10 = vweird.f32 %v9206_v44  ;;  %v4785_v25 = vand.u32 2147483648, %v4352_v30  ;;  %vm4560_vm9 = vcmp.eq.f32.partialorder %v4559_v8, 8.507059e+37 }
 0x40f   : > { %v4754_v63 = vsel %vm4753_vm13, %v5249_v21, %v4750_v52  ;;  %5264 = vpow2.f32 %v4288_v6  ;;  %v4562_v59 = vor.u32 1.1754944e-38, %v4561_v47  ;;  %v4783_v21 = vand.u32 2147483647, %v4352_v30 }
 0x410   : > { %v5257_v23 = vpop.eup %5256  ;;  %v4759_v35 = vsel %vm4756_vm14, %v4758_v28, %v4754_v63  ;;  %vm4779_vm8 = vweird.f32 %v4352_v30  ;;  %v4786_v48 = vor.u32 1.1754944e-38, %v4785_v25 }
 0x411   : > { %v4830_v56 = vmul.f32 %v4759_v35, %v9160_v45  ;;  %v4761_v2 = vmul.f32 %v5257_v23, %v4351_v17  ;;  %v5259_v51 = vpop.eup %5258  ;;  %vm4766_vm15 = vweird.f32 %v5257_v23  ;;  %vm4784_vm11 = vcmp.eq.f32.partialorder %v4783_v21, 8.507059e+37 }
 0x412   : > { %v4551_v46 = vmul.f32 %v5259_v51, %v9206_v44  ;;  %vm4767_vm4 = vmor %vm4765_vm2, %vm4766_vm15  ;;  %vm4556_vm0 = vweird.f32 %v5259_v51 }
 0x413   : > { %4862 = vst.msk [vmem:[%s8901_s14 + $0xe0] sm:$0xff] %vm262_vm1, %v4830_v56  ;;  %v4762_v24 = vsub.f32 1.0, %v4761_v2  ;;  %v5261_v0 = vpop.eup %5260  ;;  %vm4557_vm5 = vmor %vm4555_vm10, %vm4556_vm0 }
 0x414   : > { %v4552_v45 = vsub.f32 1.0, %v4551_v46  ;;  %v5263_v7 = vpop.eup %5262  ;;  %v4775_v36 = vmul.f32 %v5261_v0, %v4352_v30  ;;  %vm4780_vm7 = vweird.f32 %v5261_v0 }
 0x415   : > { %v4763_v22 = vmul.f32 %v5257_v23, %v4762_v24  ;;  %v4353_v20 = vadd.f32 1.0, %v5263_v7  ;;  %v5265_v9 = vpop.eup %5264  ;;  %vm4781_vm6 = vmor %vm4779_vm8, %vm4780_vm7 }
 0x416   : > { %v4553_v19 = vmul.f32 %v5259_v51, %v4552_v45  ;;  %v4776_v16 = vsub.f32 1.0, %v4775_v36  ;;  %v4337_v32 = vadd.f32 1.0, %v5265_v9 }
 0x417   : > { %v4764_v26 = vadd.f32 %v5257_v23, %v4763_v22  ;;  %5266 = vrcp.f32 %v4353_v20  ;;  %v4799_v43 = vand.u32 2147483648, %v4353_v20  ;;  %vm4793_vm13 = vweird.f32 %v4353_v20 }
 0x418   : > { %v4554_v61 = vadd.f32 %v5259_v51, %v4553_v19  ;;  %v4777_v13 = vmul.f32 %v5261_v0, %v4776_v16  ;;  %5268 = vrcp.f32 %v4337_v32  ;;  %v4575_v52 = vand.u32 2147483648, %v4337_v32 }
 0x419   : > { %v4768_v54 = vsel %vm4767_vm4, %v5257_v23, %v4764_v26  ;;  %v4800_v40 = vor.u32 1.1754944e-38, %v4799_v43  ;;  %v4573_v28 = vand.u32 2147483647, %v4337_v32 }
 0x41a   : > { %v4773_v58 = vsel %vm4770_vm3, %v4772_v11, %v4768_v54  ;;  %v4558_v60 = vsel %vm4557_vm5, %v5259_v51, %v4554_v61  ;;  %v4778_v4 = vadd.f32 %v5261_v0, %v4777_v13  ;;  %vm4569_vm3 = vweird.f32 %v4337_v32 }
 0x41b   : > { %v4831_v39 = vmul.f32 %v4773_v58, %v9176_v42  ;;  %v4563_v57 = vsel %vm4560_vm9, %v4562_v59, %v4558_v60  ;;  %v4576_v63 = vor.u32 1.1754944e-38, %v4575_v52  ;;  %vm4574_vm0 = vcmp.eq.f32.partialorder %v4573_v28, 8.507059e+37 }
 0x41c   : > { %v4816_v42 = vmul.f32 %v4563_v57, %v9187_v41  ;;  %v4782_v53 = vsel %vm4781_vm6, %v5261_v0, %v4778_v4  ;;  %v4797_v41 = vand.u32 2147483647, %v4353_v20 }
 0x41d   : > { %4863 = vst.msk [vmem:[%s8901_s14 + $0xe8] sm:$0xff] %vm262_vm1, %v4831_v39  ;;  %v5267_v17 = vpop.eup %5266  ;;  %v4787_v55 = vsel %vm4784_vm11, %v4786_v48, %v4782_v53 }
 0x41e   : > { %4848 = vst.msk [vmem:[%s8901_s14 + $0x70] sm:$0xff] %vm262_vm1, %v4816_v42  ;;  %v4832_v33 = vmul.f32 %v4787_v55, %v9194_v14  ;;  %v4789_v50 = vmul.f32 %v5267_v17, %v4353_v20  ;;  %vm4794_vm12 = vweird.f32 %v5267_v17  ;;  %v5269_v10 = vpop.eup %5268  ;;  %vm4798_vm15 = vcmp.eq.f32.partialorder %v4797_v41, 8.507059e+37 }
 0x41f   : > { %v4565_v12 = vmul.f32 %v5269_v10, %v4337_v32  ;;  %vm4795_vm14 = vmor %vm4793_vm13, %vm4794_vm12  ;;  %vm4570_vm2 = vweird.f32 %v5269_v10 }
 0x420   : > { %4864 = vst.msk [vmem:[%s8901_s14 + $0xf0] sm:$0xff] %vm262_vm1, %v4832_v33  ;;  %v4790_v15 = vsub.f32 1.0, %v4789_v50  ;;  %vm4571_vm4 = vmor %vm4569_vm3, %vm4570_vm2 }
 0x421   : > { %v4566_v31 = vsub.f32 1.0, %v4565_v12 }
 0x422   : > { %v4791_v29 = vmul.f32 %v5267_v17, %v4790_v15 }
 0x423   : > { %v4567_v38 = vmul.f32 %v5269_v10, %v4566_v31 }
 0x424   : > { %v4792_v27 = vadd.f32 %v5267_v17, %v4791_v29 }
 0x425   : > { %v4568_v49 = vadd.f32 %v5269_v10, %v4567_v38 }
 0x426   : > { %v4796_v44 = vsel %vm4795_vm14, %v5267_v17, %v4792_v27 }
 0x427   : > { %v4801_v14 = vsel %vm4798_vm15, %v4800_v40, %v4796_v44  ;;  %v4572_v30 = vsel %vm4571_vm4, %v5269_v10, %v4568_v49 }
 0x428   : > { %v4833_v34 = vmul.f32 %v4801_v14, %v9204_v62  ;;  %v4577_v18 = vsel %vm4574_vm0, %v4576_v63, %v4572_v30 }
 0x429   : > { %v4817_v23 = vmul.f32 %v4577_v18, %v9215_v37 }
 0x42a   : > { %4865 = vst.msk [vmem:[%s8901_s14 + $0xf8] sm:$0xff] %vm262_vm1, %v4833_v34 }
 0x42b   : > { %4849 = vst.msk [vmem:[%s8901_s14 + $0x78] sm:$0xff] %vm262_vm1, %v4817_v23 }
 0x42c PF: > { %s15_s18 = sadd.s32 1, %s5278_s18  }
 0x42d   : > { %p12_p4 = scmp.ge.s32.totalorder %s15_s18, 4  }
 0x42f   :  { %14 = sbr.rel (!%p12_p4) target bundleno = 1 (0x1), region = 70 }

</bundles_post_ra>
